<compile_context>
chip_gen: v5e
topology: v5e:2x2
jax: 0.10.0
libtpu: 0.0.40
codegen_flags: <defaults>
</compile_context>

<pallas_src>
import functools

import jax
import jax.numpy as jnp
from jax import lax
from jax.experimental import pallas as pl
from jax.experimental.pallas import tpu as pltpu


def _round_up(x, m):
    return ((x + m - 1) // m) * m


# ----------------------------------------------------------------------------
# Fused kernel. Grid = (batch_tiles, time_chunks); time is the inner
# ("arbitrary") axis, h/c state persists in VMEM scratch across time chunks.
# ----------------------------------------------------------------------------
def fused_lstm_kernel(x_ref,                                   # [chunk_t*tile_b, D] bf16
                      wih0_ref, whh0_ref, b0_ref,              # layer 0
                      wih1_ref, whh1_ref, b1_ref,              # layer 1
                      w1_ref, bm1_ref, w2_ref, bm2_ref,        # MLP head
                      o_ref,                                   # [tile_b, Cp]
                      gx_ref,                                  # [chunk_t*tile_b, 4H] f32
                      h0seq_ref,                               # [chunk_t*tile_b, H] f32
                      h0_ref, c0_ref, h1_ref, c1_ref,          # [tile_b, H] f32 carries
                      *, chunk_t, tile_b, unroll):
    H = whh0_ref.shape[0]
    tc = pl.program_id(1)

    # Reset carried state at the start of every batch tile's time sweep.
    @pl.when(tc == 0)
    def _():
        zeros = jnp.zeros((tile_b, H), jnp.float32)
        h0_ref[...] = zeros
        c0_ref[...] = zeros
        h1_ref[...] = zeros
        c1_ref[...] = zeros

    def gates_to_hc(gates, c):
        # Gate layout after weight prep: [i, f, o, g] -> one contiguous [*,3H]
        # sigmoid slice + one [*,H] tanh slice (fewer EUP issues per step).
        s = jax.nn.sigmoid(gates[:, 0:3 * H])
        g = jnp.tanh(gates[:, 3 * H:4 * H])
        i_g = s[:, 0:H]
        f_g = s[:, H:2 * H]
        o_g = s[:, 2 * H:3 * H]
        c_new = f_g * c + i_g * g
        h_new = o_g * jnp.tanh(c_new)
        return h_new, c_new

    # ---- phase 1: hoisted layer-0 input projection for the whole chunk -----
    gx_ref[...] = (jnp.dot(x_ref[...], wih0_ref[...],
                           preferred_element_type=jnp.float32) + b0_ref[...])

    # ---- phase 2: layer-0 recurrence; save h0(t) for the layer-1 hoist -----
    def step0(t, carry):
        h, c = carry
        base = pl.multiple_of(t * tile_b, tile_b)
        g = gx_ref[pl.ds(base, tile_b), :] + jnp.dot(
            h.astype(jnp.bfloat16), whh0_ref[...],
            preferred_element_type=jnp.float32)
        h, c = gates_to_hc(g, c)
        h0seq_ref[pl.ds(base, tile_b), :] = h
        return h, c

    h0, c0 = lax.fori_loop(0, chunk_t, step0, (h0_ref[...], c0_ref[...]),
                           unroll=unroll)
    h0_ref[...] = h0
    c0_ref[...] = c0

    # ---- phase 3: hoisted layer-1 input projection (reuses gate scratch) ----
    # TODO(synk): at production scale h0seq could be stored bf16 to halve this
    # scratch (half-tile packed dynamic stores); kept f32 here for exactness.
    gx_ref[...] = (jnp.dot(h0seq_ref[...].astype(jnp.bfloat16), wih1_ref[...],
                           preferred_element_type=jnp.float32) + b1_ref[...])

    # ---- phase 4: layer-1 recurrence, only h1 @ Whh1 (K = H) per step -------
    def step1(t, carry):
        h, c = carry
        base = pl.multiple_of(t * tile_b, tile_b)
        g = gx_ref[pl.ds(base, tile_b), :] + jnp.dot(
            h.astype(jnp.bfloat16), whh1_ref[...],
            preferred_element_type=jnp.float32)
        return gates_to_hc(g, c)

    h1, c1 = lax.fori_loop(0, chunk_t, step1, (h1_ref[...], c1_ref[...]),
                           unroll=unroll)
    h1_ref[...] = h1
    c1_ref[...] = c1

    # ---- MLP head on the final hidden state, once per batch tile ------------
    @pl.when(tc == pl.num_programs(1) - 1)
    def _():
        z = jnp.dot(h1.astype(jnp.bfloat16), w1_ref[...],
                    preferred_element_type=jnp.float32) + bm1_ref[...]
        z = jnp.maximum(z, 0.0)
        logits = jnp.dot(z.astype(jnp.bfloat16), w2_ref[...],
                         preferred_element_type=jnp.float32) + bm2_ref[...]
        o_ref[...] = jax.nn.sigmoid(logits)


# ----------------------------------------------------------------------------
# Forward pass. Embedding gather + layout plumbing stay in XLA; everything
# else is the fused kernel.
# ----------------------------------------------------------------------------
@functools.partial(jax.jit, static_argnames=("num_classes", "max_chunk_t"))
def lstm_forward(token_ids, kparams, *, num_classes, max_chunk_t=64):
    B, T = token_ids.shape
    D = kparams["embedding"].shape[1]
    H = kparams["whh0_t"].shape[0]
    Cp = kparams["w2_t"].shape[1]          # already lane-dense padded

    # Batch tiling: sublane granularity; 2 tiles when B > 8 so v7x's second
    # TensorCore gets a "parallel" slice (neutral on single-TC v5e/v6e).
    if B <= 8:
        batch_tile = 8
    else:
        batch_tile = _round_up((B + 1) // 2, 8)
    Bp = _round_up(B, batch_tile)
    nb = Bp // batch_tile

    # Time chunking: caps the per-chunk gate scratch and lets the x DMA
    # double-buffer / overlap the recurrence instead of a serial prologue.
    chunk_t = min(T, max_chunk_t)
    while T % chunk_t:
        chunk_t -= 1
    n_chunks = T // chunk_t

    # Embedding gather directly in bf16 (table is stored bf16).
    x = kparams["embedding"][token_ids.T]                    # [T, B, D] bf16
    if Bp != B:
        x = jnp.pad(x, ((0, 0), (0, Bp - B), (0, 0)))
    # Re-arrange so each (batch-tile, time-chunk) block is one contiguous
    # [chunk_t*batch_tile, D] row slab (cheap layout plumbing in XLA).
    x2d = (x.reshape(T, nb, batch_tile, D)
            .transpose(1, 0, 2, 3)
            .reshape(nb * T * batch_tile, D))

    x_spec = pl.BlockSpec((chunk_t * batch_tile, D),
                          lambda b, t: (b * n_chunks + t, 0))
    w_names = ("wih0_t", "whh0_t", "b_l0", "wih1_t", "whh1_t", "b_l1",
               "w1_t", "b_m1", "w2_t", "b_m2")
    w_specs = [pl.BlockSpec(kparams[n].shape, lambda b, t: (0, 0))
               for n in w_names]

    kernel = functools.partial(fused_lstm_kernel,
                               chunk_t=chunk_t, tile_b=batch_tile,
                               unroll=min(chunk_t, 8))

    out_p = pl.pallas_call(
        kernel,
        out_shape=jax.ShapeDtypeStruct((Bp, Cp), jnp.float32),
        grid_spec=pltpu.PrefetchScalarGridSpec(
            num_scalar_prefetch=0,
            grid=(nb, n_chunks),
            in_specs=[x_spec] + w_specs,
            out_specs=pl.BlockSpec((batch_tile, Cp), lambda b, t: (b, 0)),
            scratch_shapes=[
                pltpu.VMEM((chunk_t * batch_tile, 4 * H), jnp.float32),  # gates
                pltpu.VMEM((chunk_t * batch_tile, H), jnp.float32),      # h0 seq
                pltpu.VMEM((batch_tile, H), jnp.float32),                # h0
                pltpu.VMEM((batch_tile, H), jnp.float32),                # c0
                pltpu.VMEM((batch_tile, H), jnp.float32),                # h1
                pltpu.VMEM((batch_tile, H), jnp.float32),                # c1
            ]),
        compiler_params=pltpu.CompilerParams(
            dimension_semantics=("parallel", "arbitrary"),
            # Safe on every generation at these shapes. TODO(synk): at
            # production scale (H=512, long T) re-derive chunk_t against v7x's
            # 64 MiB physical VMEM and budget 2x the x chunk for buffering.
            vmem_limit_bytes=32 * 1024 * 1024),
    )(x2d, *[kparams[n] for n in w_names])

    return out_p[:B, :num_classes]


# ----------------------------------------------------------------------------
# Pure-JAX reference with matching numerics (bf16 weights/x, f32 accumulate).
# Uses the raw PyTorch-layout parameters.
# ----------------------------------------------------------------------------
def lstm_forward_ref(token_ids, params):
    x = params["embedding"][token_ids.T]                     # [T, B, D] f32
    B = token_ids.shape[0]
    H = params["whh0"].shape[1]

    def run_layer(x_seq, wih, whh, bih, bhh):
        wih_t = wih.T.astype(jnp.bfloat16)
        whh_t = whh.T.astype(jnp.bfloat16)
        b = (bih + bhh)[None, :]

        def step(carry, x_t):
            h, c = carry
            gates = (jnp.dot(x_t.astype(jnp.bfloat16), wih_t,
                             preferred_element_type=jnp.float32)
                     + jnp.dot(h.astype(jnp.bfloat16), whh_t,
                               preferred_element_type=jnp.float32)
                     + b)
            i, f, g, o = jnp.split(gates, 4, axis=-1)
            i, f, o = jax.nn.sigmoid(i), jax.nn.sigmoid(f), jax.nn.sigmoid(o)
            g = jnp.tanh(g)
            c = f * c + i * g
            h = o * jnp.tanh(c)
            return (h, c), h

        init = (jnp.zeros((B, H), jnp.float32), jnp.zeros((B, H), jnp.float32))
        _, ys = jax.lax.scan(step, init, x_seq)
        return ys

    y0 = run_layer(x, params["wih0"], params["whh0"], params["bih0"], params["bhh0"])
    y1 = run_layer(y0, params["wih1"], params["whh1"], params["bih1"], params["bhh1"])
    last = y1[-1]
    z = jnp.maximum(
        jnp.dot(last.astype(jnp.bfloat16), params["w1"].T.astype(jnp.bfloat16),
                preferred_element_type=jnp.float32) + params["b1"][None, :], 0.0)
    logits = (jnp.dot(z.astype(jnp.bfloat16), params["w2"].T.astype(jnp.bfloat16),
                      preferred_element_type=jnp.float32) + params["b2"][None, :])
    return jax.nn.sigmoid(logits)


# ----------------------------------------------------------------------------
# Deterministic parameter construction (PyTorch layout), and one-time kernel
# weight prep (done OUTSIDE the per-call jitted forward).
# ----------------------------------------------------------------------------
def make_params(key, vocab, n_components, hidden, mlp_hidden, num_classes):
    keys = iter(jax.random.split(key, 16))
    k = 1.0 / jnp.sqrt(hidden)

    emb = jax.random.normal(next(keys), (vocab, n_components), jnp.float32)
    emb = emb.at[0].set(0.0)  # padding_idx=0

    def lstm_layer(in_dim):
        wih = jax.random.uniform(next(keys), (4 * hidden, in_dim), jnp.float32, -k, k)
        whh = jax.random.uniform(next(keys), (4 * hidden, hidden), jnp.float32, -k, k)
        bih = jax.random.uniform(next(keys), (4 * hidden,), jnp.float32, -k, k)
        bhh = jax.random.uniform(next(keys), (4 * hidden,), jnp.float32, -k, k)
        return wih, whh, bih, bhh

    wih0, whh0, bih0, bhh0 = lstm_layer(n_components)
    wih1, whh1, bih1, bhh1 = lstm_layer(hidden)

    k1 = 1.0 / jnp.sqrt(hidden)
    w1 = jax.random.uniform(next(keys), (mlp_hidden, hidden), jnp.float32, -k1, k1)
    b1 = jax.random.uniform(next(keys), (mlp_hidden,), jnp.float32, -k1, k1)
    k2 = 1.0 / jnp.sqrt(mlp_hidden)
    w2 = jax.random.uniform(next(keys), (num_classes, mlp_hidden), jnp.float32, -k2, k2)
    b2 = jax.random.uniform(next(keys), (num_classes,), jnp.float32, -k2, k2)

    return dict(embedding=emb,
                wih0=wih0, whh0=whh0, bih0=bih0, bhh0=bhh0,
                wih1=wih1, whh1=whh1, bih1=bih1, bhh1=bhh1,
                w1=w1, b1=b1, w2=w2, b2=b2)


def prep_kernel_params(params):
    """One-time weight prep: PyTorch gate order [i,f,g,o] -> [i,f,o,g],
    transpose to right-multiply form, bf16 cast, bias fusion (bih+bhh),
    lane-dense classifier padding, bf16 embedding table."""
    def reorder(w, axis=0):
        i, f, g, o = jnp.split(w, 4, axis=axis)
        return jnp.concatenate([i, f, o, g], axis=axis)

    def prep_layer(wih, whh, bih, bhh):
        wih_t = reorder(wih).T.astype(jnp.bfloat16)      # [in, 4H]
        whh_t = reorder(whh).T.astype(jnp.bfloat16)      # [H, 4H]
        b = reorder(bih + bhh).reshape(1, -1)            # f32 [1, 4H]
        return wih_t, whh_t, b

    wih0_t, whh0_t, b_l0 = prep_layer(params["wih0"], params["whh0"],
                                      params["bih0"], params["bhh0"])
    wih1_t, whh1_t, b_l1 = prep_layer(params["wih1"], params["whh1"],
                                      params["bih1"], params["bhh1"])

    C = params["w2"].shape[0]
    Cp = max(128, _round_up(C, 128))
    w2_t = jnp.pad(params["w2"].T, ((0, 0), (0, Cp - C))).astype(jnp.bfloat16)
    b_m2 = jnp.pad(params["b2"], (0, Cp - C)).reshape(1, -1)

    return dict(
        embedding=params["embedding"].astype(jnp.bfloat16),
        wih0_t=wih0_t, whh0_t=whh0_t, b_l0=b_l0,
        wih1_t=wih1_t, whh1_t=whh1_t, b_l1=b_l1,
        w1_t=params["w1"].T.astype(jnp.bfloat16), b_m1=params["b1"].reshape(1, -1),
        w2_t=w2_t, b_m2=b_m2)


if __name__ == "__main__":
    # Small, module-consistent shapes (module defaults scaled down).
    B, T = 10, 8
    VOCAB = 1001
    N_COMPONENTS = 64     # embedding dim (module default 100)
    HIDDEN = 128          # hidden_size   (module default 512)
    MLP_HIDDEN = 256      # linear_1 width (module default 2048)
    NUM_CLASSES = 43

    key = jax.random.PRNGKey(0)
    k_param, k_data = jax.random.split(key)
    params = make_params(k_param, VOCAB, N_COMPONENTS, HIDDEN,
                         MLP_HIDDEN, NUM_CLASSES)
    kparams = prep_kernel_params(params)      # one-time prep, outside the jit
    token_ids = jax.random.randint(k_data, (B, T), 0, VOCAB, dtype=jnp.int32)

    # max_chunk_t=4 at T=8 exercises the carried-state / multi-chunk grid path.
    out = lstm_forward(token_ids, kparams, num_classes=NUM_CLASSES, max_chunk_t=4)
    out = jax.block_until_ready(out)

    ref = lstm_forward_ref(token_ids, params)
    assert out.shape == (B, NUM_CLASSES)
    assert jnp.allclose(out, ref, atol=2e-3, rtol=2e-3), \
        float(jnp.max(jnp.abs(out - ref)))

    print("KERNEL_OK")
</pallas_src>

<mosaic_0001>
module attributes {stable_mosaic.version = 11 : i64} {
  func.func @fused_lstm_kernel(%arg0: i32, %arg1: i32, %arg2: memref<32x64xbf16, #tpu.memory_space<vmem>>, %arg3: memref<64x512xbf16, #tpu.memory_space<vmem>>, %arg4: memref<128x512xbf16, #tpu.memory_space<vmem>>, %arg5: memref<1x512xf32, #tpu.memory_space<vmem>>, %arg6: memref<128x512xbf16, #tpu.memory_space<vmem>>, %arg7: memref<128x512xbf16, #tpu.memory_space<vmem>>, %arg8: memref<1x512xf32, #tpu.memory_space<vmem>>, %arg9: memref<128x256xbf16, #tpu.memory_space<vmem>>, %arg10: memref<1x256xf32, #tpu.memory_space<vmem>>, %arg11: memref<256x128xbf16, #tpu.memory_space<vmem>>, %arg12: memref<1x128xf32, #tpu.memory_space<vmem>>, %arg13: memref<8x128xf32, #tpu.memory_space<vmem>>, %arg14: memref<32x512xf32, #tpu.memory_space<vmem>>, %arg15: memref<32x128xf32, #tpu.memory_space<vmem>>, %arg16: memref<8x128xf32, #tpu.memory_space<vmem>>, %arg17: memref<8x128xf32, #tpu.memory_space<vmem>>, %arg18: memref<8x128xf32, #tpu.memory_space<vmem>>, %arg19: memref<8x128xf32, #tpu.memory_space<vmem>>) attributes {dimension_semantics = [#tpu.dimension_semantics<parallel>, #tpu.dimension_semantics<arbitrary>], iteration_bounds = array<i64: 2, 2>, scalar_prefetch = 0 : i64, scratch_operands = 6 : i64, tpu.core_type = #tpu.core_type<tc>, window_params = [{transform_indices = @transform_0, window_bounds = array<i64: 32, 64>}, {pipeline_mode = #tpu.pipeline_mode<synchronous>, transform_indices = @transform_1, window_bounds = array<i64: 64, 512>}, {pipeline_mode = #tpu.pipeline_mode<synchronous>, transform_indices = @transform_2, window_bounds = array<i64: 128, 512>}, {pipeline_mode = #tpu.pipeline_mode<synchronous>, transform_indices = @transform_3, window_bounds = array<i64: 1, 512>}, {pipeline_mode = #tpu.pipeline_mode<synchronous>, transform_indices = @transform_4, window_bounds = array<i64: 128, 512>}, {pipeline_mode = #tpu.pipeline_mode<synchronous>, transform_indices = @transform_5, window_bounds = array<i64: 128, 512>}, {pipeline_mode = #tpu.pipeline_mode<synchronous>, transform_indices = @transform_6, window_bounds = array<i64: 1, 512>}, {pipeline_mode = #tpu.pipeline_mode<synchronous>, transform_indices = @transform_7, window_bounds = array<i64: 128, 256>}, {pipeline_mode = #tpu.pipeline_mode<synchronous>, transform_indices = @transform_8, window_bounds = array<i64: 1, 256>}, {pipeline_mode = #tpu.pipeline_mode<synchronous>, transform_indices = @transform_9, window_bounds = array<i64: 256, 128>}, {pipeline_mode = #tpu.pipeline_mode<synchronous>, transform_indices = @transform_10, window_bounds = array<i64: 1, 128>}, {transform_indices = @transform_11, window_bounds = array<i64: 8, 128>}]} {
    %c0_i32 = arith.constant 0 : i32
    %0 = arith.cmpi eq, %arg1, %c0_i32 : i32
    %1 = arith.extui %0 : i1 to i32
    %c0_i32_0 = arith.constant 0 : i32
    %2 = arith.cmpi ne, %1, %c0_i32_0 : i32
    scf.if %2 {
      %cst_92 = arith.constant 0.000000e+00 : f32
      %229 = vector.broadcast %cst_92 : f32 to vector<8x128xf32>
      %c0_93 = arith.constant 0 : index
      %c0_94 = arith.constant 0 : index
      %230 = vector.load %arg16[%c0_93, %c0_94] : memref<8x128xf32, #tpu.memory_space<vmem>>, vector<8x128xf32>
      tpu.vector_store %arg16[%c0_93, %c0_94], %229 {strides = array<i32>} : memref<8x128xf32, #tpu.memory_space<vmem>>, vector<8x128xf32>,
      %c0_95 = arith.constant 0 : index
      %c0_96 = arith.constant 0 : index
      %231 = vector.load %arg17[%c0_95, %c0_96] : memref<8x128xf32, #tpu.memory_space<vmem>>, vector<8x128xf32>
      tpu.vector_store %arg17[%c0_95, %c0_96], %229 {strides = array<i32>} : memref<8x128xf32, #tpu.memory_space<vmem>>, vector<8x128xf32>,
      %c0_97 = arith.constant 0 : index
      %c0_98 = arith.constant 0 : index
      %232 = vector.load %arg18[%c0_97, %c0_98] : memref<8x128xf32, #tpu.memory_space<vmem>>, vector<8x128xf32>
      tpu.vector_store %arg18[%c0_97, %c0_98], %229 {strides = array<i32>} : memref<8x128xf32, #tpu.memory_space<vmem>>, vector<8x128xf32>,
      %c0_99 = arith.constant 0 : index
      %c0_100 = arith.constant 0 : index
      %233 = vector.load %arg19[%c0_99, %c0_100] : memref<8x128xf32, #tpu.memory_space<vmem>>, vector<8x128xf32>
      tpu.vector_store %arg19[%c0_99, %c0_100], %229 {strides = array<i32>} : memref<8x128xf32, #tpu.memory_space<vmem>>, vector<8x128xf32>,
    } else {
    }
    %c0 = arith.constant 0 : index
    %c0_1 = arith.constant 0 : index
    %3 = vector.load %arg2[%c0, %c0_1] : memref<32x64xbf16, #tpu.memory_space<vmem>>, vector<32x64xbf16>
    %c0_2 = arith.constant 0 : index
    %c0_3 = arith.constant 0 : index
    %4 = vector.load %arg3[%c0_2, %c0_3] : memref<64x512xbf16, #tpu.memory_space<vmem>>, vector<64x512xbf16>
    %cst = arith.constant dense<0.000000e+00> : vector<32x512xf32>
    %5 = tpu.matmul %3, %4, %cst {dimension_numbers = #tpu.dot_dimension_numbers<[1], [0], [0], [1], [0, 0, 1, 1], [], []>} : vector<32x64xbf16>, vector<64x512xbf16>, vector<32x512xf32> -> vector<32x512xf32>
    %c0_4 = arith.constant 0 : index
    %c0_5 = arith.constant 0 : index
    %6 = vector.load %arg5[%c0_4, %c0_5] : memref<1x512xf32, #tpu.memory_space<vmem>>, vector<1x512xf32>
    %7 = vector.broadcast %6 : vector<1x512xf32> to vector<32x512xf32>
    %8 = arith.addf %5, %7 : vector<32x512xf32>
    %c0_6 = arith.constant 0 : index
    %c0_7 = arith.constant 0 : index
    %9 = vector.load %arg14[%c0_6, %c0_7] : memref<32x512xf32, #tpu.memory_space<vmem>>, vector<32x512xf32>
    tpu.vector_store %arg14[%c0_6, %c0_7], %8 {strides = array<i32>} : memref<32x512xf32, #tpu.memory_space<vmem>>, vector<32x512xf32>,
    %c0_8 = arith.constant 0 : index
    %c0_9 = arith.constant 0 : index
    %10 = vector.load %arg16[%c0_8, %c0_9] : memref<8x128xf32, #tpu.memory_space<vmem>>, vector<8x128xf32>
    %c0_10 = arith.constant 0 : index
    %c0_11 = arith.constant 0 : index
    %11 = vector.load %arg17[%c0_10, %c0_11] : memref<8x128xf32, #tpu.memory_space<vmem>>, vector<8x128xf32>
    %c0_i32_12 = arith.constant 0 : i32
    %c8_i32 = arith.constant 8 : i32
    %12 = arith.muli %c0_i32_12, %c8_i32 : i32
    %13 = tpu.assume_multiple %12, 8 : i32
    %14 = arith.index_cast %13 : i32 to index
    %c0_13 = arith.constant 0 : index
    %15 = vector.load %arg14[%14, %c0_13] : memref<32x512xf32, #tpu.memory_space<vmem>>, vector<8x512xf32>
    %16 = arith.truncf %10 : vector<8x128xf32> to vector<8x128xbf16>
    %c0_14 = arith.constant 0 : index
    %c0_15 = arith.constant 0 : index
    %17 = vector.load %arg4[%c0_14, %c0_15] : memref<128x512xbf16, #tpu.memory_space<vmem>>, vector<128x512xbf16>
    %cst_16 = arith.constant dense<0.000000e+00> : vector<8x512xf32>
    %18 = tpu.matmul %16, %17, %cst_16 {dimension_numbers = #tpu.dot_dimension_numbers<[1], [0], [0], [1], [0, 0, 1, 1], [], []>} : vector<8x128xbf16>, vector<128x512xbf16>, vector<8x512xf32> -> vector<8x512xf32>
    %19 = arith.addf %15, %18 : vector<8x512xf32>
    %20 = vector.extract_strided_slice %19 {offsets = [0, 0], sizes = [8, 384], strides = [1, 1]} : vector<8x512xf32> to vector<8x384xf32>
    %21 = arith.negf %20 : vector<8x384xf32>
    %22 = math.exp %21 : vector<8x384xf32>
    %cst_17 = arith.constant 1.000000e+00 : f32
    %23 = vector.broadcast %cst_17 : f32 to vector<8x384xf32>
    %24 = arith.addf %23, %22 : vector<8x384xf32>
    %25 = arith.divf %23, %24 : vector<8x384xf32>
    %26 = vector.extract_strided_slice %19 {offsets = [0, 384], sizes = [8, 128], strides = [1, 1]} : vector<8x512xf32> to vector<8x128xf32>
    %27 = math.tanh %26 : vector<8x128xf32>
    %28 = vector.extract_strided_slice %25 {offsets = [0, 0], sizes = [8, 128], strides = [1, 1]} : vector<8x384xf32> to vector<8x128xf32>
    %29 = vector.extract_strided_slice %25 {offsets = [0, 128], sizes = [8, 128], strides = [1, 1]} : vector<8x384xf32> to vector<8x128xf32>
    %30 = vector.extract_strided_slice %25 {offsets = [0, 256], sizes = [8, 128], strides = [1, 1]} : vector<8x384xf32> to vector<8x128xf32>
    %31 = arith.mulf %29, %11 : vector<8x128xf32>
    %32 = arith.mulf %28, %27 : vector<8x128xf32>
    %33 = arith.addf %31, %32 : vector<8x128xf32>
    %34 = math.tanh %33 : vector<8x128xf32>
    %35 = arith.mulf %30, %34 : vector<8x128xf32>
    %36 = arith.index_cast %13 : i32 to index
    %c0_18 = arith.constant 0 : index
    %37 = vector.load %arg15[%36, %c0_18] : memref<32x128xf32, #tpu.memory_space<vmem>>, vector<8x128xf32>
    tpu.vector_store %arg15[%36, %c0_18], %35 {strides = array<i32>} : memref<32x128xf32, #tpu.memory_space<vmem>>, vector<8x128xf32>,
    %c1_i32 = arith.constant 1 : i32
    %c8_i32_19 = arith.constant 8 : i32
    %38 = arith.muli %c1_i32, %c8_i32_19 : i32
    %39 = tpu.assume_multiple %38, 8 : i32
    %40 = arith.index_cast %39 : i32 to index
    %c0_20 = arith.constant 0 : index
    %41 = vector.load %arg14[%40, %c0_20] : memref<32x512xf32, #tpu.memory_space<vmem>>, vector<8x512xf32>
    %42 = arith.truncf %35 : vector<8x128xf32> to vector<8x128xbf16>
    %c0_21 = arith.constant 0 : index
    %c0_22 = arith.constant 0 : index
    %43 = vector.load %arg4[%c0_21, %c0_22] : memref<128x512xbf16, #tpu.memory_space<vmem>>, vector<128x512xbf16>
    %cst_23 = arith.constant dense<0.000000e+00> : vector<8x512xf32>
    %44 = tpu.matmul %42, %43, %cst_23 {dimension_numbers = #tpu.dot_dimension_numbers<[1], [0], [0], [1], [0, 0, 1, 1], [], []>} : vector<8x128xbf16>, vector<128x512xbf16>, vector<8x512xf32> -> vector<8x512xf32>
    %45 = arith.addf %41, %44 : vector<8x512xf32>
    %46 = vector.extract_strided_slice %45 {offsets = [0, 0], sizes = [8, 384], strides = [1, 1]} : vector<8x512xf32> to vector<8x384xf32>
    %47 = arith.negf %46 : vector<8x384xf32>
    %48 = math.exp %47 : vector<8x384xf32>
    %cst_24 = arith.constant 1.000000e+00 : f32
    %49 = vector.broadcast %cst_24 : f32 to vector<8x384xf32>
    %50 = arith.addf %49, %48 : vector<8x384xf32>
    %51 = arith.divf %49, %50 : vector<8x384xf32>
    %52 = vector.extract_strided_slice %45 {offsets = [0, 384], sizes = [8, 128], strides = [1, 1]} : vector<8x512xf32> to vector<8x128xf32>
    %53 = math.tanh %52 : vector<8x128xf32>
    %54 = vector.extract_strided_slice %51 {offsets = [0, 0], sizes = [8, 128], strides = [1, 1]} : vector<8x384xf32> to vector<8x128xf32>
    %55 = vector.extract_strided_slice %51 {offsets = [0, 128], sizes = [8, 128], strides = [1, 1]} : vector<8x384xf32> to vector<8x128xf32>
    %56 = vector.extract_strided_slice %51 {offsets = [0, 256], sizes = [8, 128], strides = [1, 1]} : vector<8x384xf32> to vector<8x128xf32>
    %57 = arith.mulf %55, %33 : vector<8x128xf32>
    %58 = arith.mulf %54, %53 : vector<8x128xf32>
    %59 = arith.addf %57, %58 : vector<8x128xf32>
    %60 = math.tanh %59 : vector<8x128xf32>
    %61 = arith.mulf %56, %60 : vector<8x128xf32>
    %62 = arith.index_cast %39 : i32 to index
    %c0_25 = arith.constant 0 : index
    %63 = vector.load %arg15[%62, %c0_25] : memref<32x128xf32, #tpu.memory_space<vmem>>, vector<8x128xf32>
    tpu.vector_store %arg15[%62, %c0_25], %61 {strides = array<i32>} : memref<32x128xf32, #tpu.memory_space<vmem>>, vector<8x128xf32>,
    %c2_i32 = arith.constant 2 : i32
    %c8_i32_26 = arith.constant 8 : i32
    %64 = arith.muli %c2_i32, %c8_i32_26 : i32
    %65 = tpu.assume_multiple %64, 8 : i32
    %66 = arith.index_cast %65 : i32 to index
    %c0_27 = arith.constant 0 : index
    %67 = vector.load %arg14[%66, %c0_27] : memref<32x512xf32, #tpu.memory_space<vmem>>, vector<8x512xf32>
    %68 = arith.truncf %61 : vector<8x128xf32> to vector<8x128xbf16>
    %c0_28 = arith.constant 0 : index
    %c0_29 = arith.constant 0 : index
    %69 = vector.load %arg4[%c0_28, %c0_29] : memref<128x512xbf16, #tpu.memory_space<vmem>>, vector<128x512xbf16>
    %cst_30 = arith.constant dense<0.000000e+00> : vector<8x512xf32>
    %70 = tpu.matmul %68, %69, %cst_30 {dimension_numbers = #tpu.dot_dimension_numbers<[1], [0], [0], [1], [0, 0, 1, 1], [], []>} : vector<8x128xbf16>, vector<128x512xbf16>, vector<8x512xf32> -> vector<8x512xf32>
    %71 = arith.addf %67, %70 : vector<8x512xf32>
    %72 = vector.extract_strided_slice %71 {offsets = [0, 0], sizes = [8, 384], strides = [1, 1]} : vector<8x512xf32> to vector<8x384xf32>
    %73 = arith.negf %72 : vector<8x384xf32>
    %74 = math.exp %73 : vector<8x384xf32>
    %cst_31 = arith.constant 1.000000e+00 : f32
    %75 = vector.broadcast %cst_31 : f32 to vector<8x384xf32>
    %76 = arith.addf %75, %74 : vector<8x384xf32>
    %77 = arith.divf %75, %76 : vector<8x384xf32>
    %78 = vector.extract_strided_slice %71 {offsets = [0, 384], sizes = [8, 128], strides = [1, 1]} : vector<8x512xf32> to vector<8x128xf32>
    %79 = math.tanh %78 : vector<8x128xf32>
    %80 = vector.extract_strided_slice %77 {offsets = [0, 0], sizes = [8, 128], strides = [1, 1]} : vector<8x384xf32> to vector<8x128xf32>
    %81 = vector.extract_strided_slice %77 {offsets = [0, 128], sizes = [8, 128], strides = [1, 1]} : vector<8x384xf32> to vector<8x128xf32>
    %82 = vector.extract_strided_slice %77 {offsets = [0, 256], sizes = [8, 128], strides = [1, 1]} : vector<8x384xf32> to vector<8x128xf32>
    %83 = arith.mulf %81, %59 : vector<8x128xf32>
    %84 = arith.mulf %80, %79 : vector<8x128xf32>
    %85 = arith.addf %83, %84 : vector<8x128xf32>
    %86 = math.tanh %85 : vector<8x128xf32>
    %87 = arith.mulf %82, %86 : vector<8x128xf32>
    %88 = arith.index_cast %65 : i32 to index
    %c0_32 = arith.constant 0 : index
    %89 = vector.load %arg15[%88, %c0_32] : memref<32x128xf32, #tpu.memory_space<vmem>>, vector<8x128xf32>
    tpu.vector_store %arg15[%88, %c0_32], %87 {strides = array<i32>} : memref<32x128xf32, #tpu.memory_space<vmem>>, vector<8x128xf32>,
    %c3_i32 = arith.constant 3 : i32
    %c8_i32_33 = arith.constant 8 : i32
    %90 = arith.muli %c3_i32, %c8_i32_33 : i32
    %91 = tpu.assume_multiple %90, 8 : i32
    %92 = arith.index_cast %91 : i32 to index
    %c0_34 = arith.constant 0 : index
    %93 = vector.load %arg14[%92, %c0_34] : memref<32x512xf32, #tpu.memory_space<vmem>>, vector<8x512xf32>
    %94 = arith.truncf %87 : vector<8x128xf32> to vector<8x128xbf16>
    %c0_35 = arith.constant 0 : index
    %c0_36 = arith.constant 0 : index
    %95 = vector.load %arg4[%c0_35, %c0_36] : memref<128x512xbf16, #tpu.memory_space<vmem>>, vector<128x512xbf16>
    %cst_37 = arith.constant dense<0.000000e+00> : vector<8x512xf32>
    %96 = tpu.matmul %94, %95, %cst_37 {dimension_numbers = #tpu.dot_dimension_numbers<[1], [0], [0], [1], [0, 0, 1, 1], [], []>} : vector<8x128xbf16>, vector<128x512xbf16>, vector<8x512xf32> -> vector<8x512xf32>
    %97 = arith.addf %93, %96 : vector<8x512xf32>
    %98 = vector.extract_strided_slice %97 {offsets = [0, 0], sizes = [8, 384], strides = [1, 1]} : vector<8x512xf32> to vector<8x384xf32>
    %99 = arith.negf %98 : vector<8x384xf32>
    %100 = math.exp %99 : vector<8x384xf32>
    %cst_38 = arith.constant 1.000000e+00 : f32
    %101 = vector.broadcast %cst_38 : f32 to vector<8x384xf32>
    %102 = arith.addf %101, %100 : vector<8x384xf32>
    %103 = arith.divf %101, %102 : vector<8x384xf32>
    %104 = vector.extract_strided_slice %97 {offsets = [0, 384], sizes = [8, 128], strides = [1, 1]} : vector<8x512xf32> to vector<8x128xf32>
    %105 = math.tanh %104 : vector<8x128xf32>
    %106 = vector.extract_strided_slice %103 {offsets = [0, 0], sizes = [8, 128], strides = [1, 1]} : vector<8x384xf32> to vector<8x128xf32>
    %107 = vector.extract_strided_slice %103 {offsets = [0, 128], sizes = [8, 128], strides = [1, 1]} : vector<8x384xf32> to vector<8x128xf32>
    %108 = vector.extract_strided_slice %103 {offsets = [0, 256], sizes = [8, 128], strides = [1, 1]} : vector<8x384xf32> to vector<8x128xf32>
    %109 = arith.mulf %107, %85 : vector<8x128xf32>
    %110 = arith.mulf %106, %105 : vector<8x128xf32>
    %111 = arith.addf %109, %110 : vector<8x128xf32>
    %112 = math.tanh %111 : vector<8x128xf32>
    %113 = arith.mulf %108, %112 : vector<8x128xf32>
    %114 = arith.index_cast %91 : i32 to index
    %c0_39 = arith.constant 0 : index
    %115 = vector.load %arg15[%114, %c0_39] : memref<32x128xf32, #tpu.memory_space<vmem>>, vector<8x128xf32>
    tpu.vector_store %arg15[%114, %c0_39], %113 {strides = array<i32>} : memref<32x128xf32, #tpu.memory_space<vmem>>, vector<8x128xf32>,
    %c4_i32 = arith.constant 4 : i32
    %c0_40 = arith.constant 0 : index
    %c0_41 = arith.constant 0 : index
    %116 = vector.load %arg16[%c0_40, %c0_41] : memref<8x128xf32, #tpu.memory_space<vmem>>, vector<8x128xf32>
    tpu.vector_store %arg16[%c0_40, %c0_41], %113 {strides = array<i32>} : memref<8x128xf32, #tpu.memory_space<vmem>>, vector<8x128xf32>,
    %c0_42 = arith.constant 0 : index
    %c0_43 = arith.constant 0 : index
    %117 = vector.load %arg17[%c0_42, %c0_43] : memref<8x128xf32, #tpu.memory_space<vmem>>, vector<8x128xf32>
    tpu.vector_store %arg17[%c0_42, %c0_43], %111 {strides = array<i32>} : memref<8x128xf32, #tpu.memory_space<vmem>>, vector<8x128xf32>,
    %c0_44 = arith.constant 0 : index
    %c0_45 = arith.constant 0 : index
    %118 = vector.load %arg15[%c0_44, %c0_45] : memref<32x128xf32, #tpu.memory_space<vmem>>, vector<32x128xf32>
    %119 = arith.truncf %118 : vector<32x128xf32> to vector<32x128xbf16>
    %c0_46 = arith.constant 0 : index
    %c0_47 = arith.constant 0 : index
    %120 = vector.load %arg6[%c0_46, %c0_47] : memref<128x512xbf16, #tpu.memory_space<vmem>>, vector<128x512xbf16>
    %cst_48 = arith.constant dense<0.000000e+00> : vector<32x512xf32>
    %121 = tpu.matmul %119, %120, %cst_48 {dimension_numbers = #tpu.dot_dimension_numbers<[1], [0], [0], [1], [0, 0, 1, 1], [], []>} : vector<32x128xbf16>, vector<128x512xbf16>, vector<32x512xf32> -> vector<32x512xf32>
    %c0_49 = arith.constant 0 : index
    %c0_50 = arith.constant 0 : index
    %122 = vector.load %arg8[%c0_49, %c0_50] : memref<1x512xf32, #tpu.memory_space<vmem>>, vector<1x512xf32>
    %123 = vector.broadcast %122 : vector<1x512xf32> to vector<32x512xf32>
    %124 = arith.addf %121, %123 : vector<32x512xf32>
    %c0_51 = arith.constant 0 : index
    %c0_52 = arith.constant 0 : index
    %125 = vector.load %arg14[%c0_51, %c0_52] : memref<32x512xf32, #tpu.memory_space<vmem>>, vector<32x512xf32>
    tpu.vector_store %arg14[%c0_51, %c0_52], %124 {strides = array<i32>} : memref<32x512xf32, #tpu.memory_space<vmem>>, vector<32x512xf32>,
    %c0_53 = arith.constant 0 : index
    %c0_54 = arith.constant 0 : index
    %126 = vector.load %arg18[%c0_53, %c0_54] : memref<8x128xf32, #tpu.memory_space<vmem>>, vector<8x128xf32>
    %c0_55 = arith.constant 0 : index
    %c0_56 = arith.constant 0 : index
    %127 = vector.load %arg19[%c0_55, %c0_56] : memref<8x128xf32, #tpu.memory_space<vmem>>, vector<8x128xf32>
    %c0_i32_57 = arith.constant 0 : i32
    %c8_i32_58 = arith.constant 8 : i32
    %128 = arith.muli %c0_i32_57, %c8_i32_58 : i32
    %129 = tpu.assume_multiple %128, 8 : i32
    %130 = arith.index_cast %129 : i32 to index
    %c0_59 = arith.constant 0 : index
    %131 = vector.load %arg14[%130, %c0_59] : memref<32x512xf32, #tpu.memory_space<vmem>>, vector<8x512xf32>
    %132 = arith.truncf %126 : vector<8x128xf32> to vector<8x128xbf16>
    %c0_60 = arith.constant 0 : index
    %c0_61 = arith.constant 0 : index
    %133 = vector.load %arg7[%c0_60, %c0_61] : memref<128x512xbf16, #tpu.memory_space<vmem>>, vector<128x512xbf16>
    %cst_62 = arith.constant dense<0.000000e+00> : vector<8x512xf32>
    %134 = tpu.matmul %132, %133, %cst_62 {dimension_numbers = #tpu.dot_dimension_numbers<[1], [0], [0], [1], [0, 0, 1, 1], [], []>} : vector<8x128xbf16>, vector<128x512xbf16>, vector<8x512xf32> -> vector<8x512xf32>
    %135 = arith.addf %131, %134 : vector<8x512xf32>
    %136 = vector.extract_strided_slice %135 {offsets = [0, 0], sizes = [8, 384], strides = [1, 1]} : vector<8x512xf32> to vector<8x384xf32>
    %137 = arith.negf %136 : vector<8x384xf32>
    %138 = math.exp %137 : vector<8x384xf32>
    %cst_63 = arith.constant 1.000000e+00 : f32
    %139 = vector.broadcast %cst_63 : f32 to vector<8x384xf32>
    %140 = arith.addf %139, %138 : vector<8x384xf32>
    %141 = arith.divf %139, %140 : vector<8x384xf32>
    %142 = vector.extract_strided_slice %135 {offsets = [0, 384], sizes = [8, 128], strides = [1, 1]} : vector<8x512xf32> to vector<8x128xf32>
    %143 = math.tanh %142 : vector<8x128xf32>
    %144 = vector.extract_strided_slice %141 {offsets = [0, 0], sizes = [8, 128], strides = [1, 1]} : vector<8x384xf32> to vector<8x128xf32>
    %145 = vector.extract_strided_slice %141 {offsets = [0, 128], sizes = [8, 128], strides = [1, 1]} : vector<8x384xf32> to vector<8x128xf32>
    %146 = vector.extract_strided_slice %141 {offsets = [0, 256], sizes = [8, 128], strides = [1, 1]} : vector<8x384xf32> to vector<8x128xf32>
    %147 = arith.mulf %145, %127 : vector<8x128xf32>
    %148 = arith.mulf %144, %143 : vector<8x128xf32>
    %149 = arith.addf %147, %148 : vector<8x128xf32>
    %150 = math.tanh %149 : vector<8x128xf32>
    %151 = arith.mulf %146, %150 : vector<8x128xf32>
    %c1_i32_64 = arith.constant 1 : i32
    %c8_i32_65 = arith.constant 8 : i32
    %152 = arith.muli %c1_i32_64, %c8_i32_65 : i32
    %153 = tpu.assume_multiple %152, 8 : i32
    %154 = arith.index_cast %153 : i32 to index
    %c0_66 = arith.constant 0 : index
    %155 = vector.load %arg14[%154, %c0_66] : memref<32x512xf32, #tpu.memory_space<vmem>>, vector<8x512xf32>
    %156 = arith.truncf %151 : vector<8x128xf32> to vector<8x128xbf16>
    %c0_67 = arith.constant 0 : index
    %c0_68 = arith.constant 0 : index
    %157 = vector.load %arg7[%c0_67, %c0_68] : memref<128x512xbf16, #tpu.memory_space<vmem>>, vector<128x512xbf16>
    %cst_69 = arith.constant dense<0.000000e+00> : vector<8x512xf32>
    %158 = tpu.matmul %156, %157, %cst_69 {dimension_numbers = #tpu.dot_dimension_numbers<[1], [0], [0], [1], [0, 0, 1, 1], [], []>} : vector<8x128xbf16>, vector<128x512xbf16>, vector<8x512xf32> -> vector<8x512xf32>
    %159 = arith.addf %155, %158 : vector<8x512xf32>
    %160 = vector.extract_strided_slice %159 {offsets = [0, 0], sizes = [8, 384], strides = [1, 1]} : vector<8x512xf32> to vector<8x384xf32>
    %161 = arith.negf %160 : vector<8x384xf32>
    %162 = math.exp %161 : vector<8x384xf32>
    %cst_70 = arith.constant 1.000000e+00 : f32
    %163 = vector.broadcast %cst_70 : f32 to vector<8x384xf32>
    %164 = arith.addf %163, %162 : vector<8x384xf32>
    %165 = arith.divf %163, %164 : vector<8x384xf32>
    %166 = vector.extract_strided_slice %159 {offsets = [0, 384], sizes = [8, 128], strides = [1, 1]} : vector<8x512xf32> to vector<8x128xf32>
    %167 = math.tanh %166 : vector<8x128xf32>
    %168 = vector.extract_strided_slice %165 {offsets = [0, 0], sizes = [8, 128], strides = [1, 1]} : vector<8x384xf32> to vector<8x128xf32>
    %169 = vector.extract_strided_slice %165 {offsets = [0, 128], sizes = [8, 128], strides = [1, 1]} : vector<8x384xf32> to vector<8x128xf32>
    %170 = vector.extract_strided_slice %165 {offsets = [0, 256], sizes = [8, 128], strides = [1, 1]} : vector<8x384xf32> to vector<8x128xf32>
    %171 = arith.mulf %169, %149 : vector<8x128xf32>
    %172 = arith.mulf %168, %167 : vector<8x128xf32>
    %173 = arith.addf %171, %172 : vector<8x128xf32>
    %174 = math.tanh %173 : vector<8x128xf32>
    %175 = arith.mulf %170, %174 : vector<8x128xf32>
    %c2_i32_71 = arith.constant 2 : i32
    %c8_i32_72 = arith.constant 8 : i32
    %176 = arith.muli %c2_i32_71, %c8_i32_72 : i32
    %177 = tpu.assume_multiple %176, 8 : i32
    %178 = arith.index_cast %177 : i32 to index
    %c0_73 = arith.constant 0 : index
    %179 = vector.load %arg14[%178, %c0_73] : memref<32x512xf32, #tpu.memory_space<vmem>>, vector<8x512xf32>
    %180 = arith.truncf %175 : vector<8x128xf32> to vector<8x128xbf16>
    %c0_74 = arith.constant 0 : index
    %c0_75 = arith.constant 0 : index
    %181 = vector.load %arg7[%c0_74, %c0_75] : memref<128x512xbf16, #tpu.memory_space<vmem>>, vector<128x512xbf16>
    %cst_76 = arith.constant dense<0.000000e+00> : vector<8x512xf32>
    %182 = tpu.matmul %180, %181, %cst_76 {dimension_numbers = #tpu.dot_dimension_numbers<[1], [0], [0], [1], [0, 0, 1, 1], [], []>} : vector<8x128xbf16>, vector<128x512xbf16>, vector<8x512xf32> -> vector<8x512xf32>
    %183 = arith.addf %179, %182 : vector<8x512xf32>
    %184 = vector.extract_strided_slice %183 {offsets = [0, 0], sizes = [8, 384], strides = [1, 1]} : vector<8x512xf32> to vector<8x384xf32>
    %185 = arith.negf %184 : vector<8x384xf32>
    %186 = math.exp %185 : vector<8x384xf32>
    %cst_77 = arith.constant 1.000000e+00 : f32
    %187 = vector.broadcast %cst_77 : f32 to vector<8x384xf32>
    %188 = arith.addf %187, %186 : vector<8x384xf32>
    %189 = arith.divf %187, %188 : vector<8x384xf32>
    %190 = vector.extract_strided_slice %183 {offsets = [0, 384], sizes = [8, 128], strides = [1, 1]} : vector<8x512xf32> to vector<8x128xf32>
    %191 = math.tanh %190 : vector<8x128xf32>
    %192 = vector.extract_strided_slice %189 {offsets = [0, 0], sizes = [8, 128], strides = [1, 1]} : vector<8x384xf32> to vector<8x128xf32>
    %193 = vector.extract_strided_slice %189 {offsets = [0, 128], sizes = [8, 128], strides = [1, 1]} : vector<8x384xf32> to vector<8x128xf32>
    %194 = vector.extract_strided_slice %189 {offsets = [0, 256], sizes = [8, 128], strides = [1, 1]} : vector<8x384xf32> to vector<8x128xf32>
    %195 = arith.mulf %193, %173 : vector<8x128xf32>
    %196 = arith.mulf %192, %191 : vector<8x128xf32>
    %197 = arith.addf %195, %196 : vector<8x128xf32>
    %198 = math.tanh %197 : vector<8x128xf32>
    %199 = arith.mulf %194, %198 : vector<8x128xf32>
    %c3_i32_78 = arith.constant 3 : i32
    %c8_i32_79 = arith.constant 8 : i32
    %200 = arith.muli %c3_i32_78, %c8_i32_79 : i32
    %201 = tpu.assume_multiple %200, 8 : i32
    %202 = arith.index_cast %201 : i32 to index
    %c0_80 = arith.constant 0 : index
    %203 = vector.load %arg14[%202, %c0_80] : memref<32x512xf32, #tpu.memory_space<vmem>>, vector<8x512xf32>
    %204 = arith.truncf %199 : vector<8x128xf32> to vector<8x128xbf16>
    %c0_81 = arith.constant 0 : index
    %c0_82 = arith.constant 0 : index
    %205 = vector.load %arg7[%c0_81, %c0_82] : memref<128x512xbf16, #tpu.memory_space<vmem>>, vector<128x512xbf16>
    %cst_83 = arith.constant dense<0.000000e+00> : vector<8x512xf32>
    %206 = tpu.matmul %204, %205, %cst_83 {dimension_numbers = #tpu.dot_dimension_numbers<[1], [0], [0], [1], [0, 0, 1, 1], [], []>} : vector<8x128xbf16>, vector<128x512xbf16>, vector<8x512xf32> -> vector<8x512xf32>
    %207 = arith.addf %203, %206 : vector<8x512xf32>
    %208 = vector.extract_strided_slice %207 {offsets = [0, 0], sizes = [8, 384], strides = [1, 1]} : vector<8x512xf32> to vector<8x384xf32>
    %209 = arith.negf %208 : vector<8x384xf32>
    %210 = math.exp %209 : vector<8x384xf32>
    %cst_84 = arith.constant 1.000000e+00 : f32
    %211 = vector.broadcast %cst_84 : f32 to vector<8x384xf32>
    %212 = arith.addf %211, %210 : vector<8x384xf32>
    %213 = arith.divf %211, %212 : vector<8x384xf32>
    %214 = vector.extract_strided_slice %207 {offsets = [0, 384], sizes = [8, 128], strides = [1, 1]} : vector<8x512xf32> to vector<8x128xf32>
    %215 = math.tanh %214 : vector<8x128xf32>
    %216 = vector.extract_strided_slice %213 {offsets = [0, 0], sizes = [8, 128], strides = [1, 1]} : vector<8x384xf32> to vector<8x128xf32>
    %217 = vector.extract_strided_slice %213 {offsets = [0, 128], sizes = [8, 128], strides = [1, 1]} : vector<8x384xf32> to vector<8x128xf32>
    %218 = vector.extract_strided_slice %213 {offsets = [0, 256], sizes = [8, 128], strides = [1, 1]} : vector<8x384xf32> to vector<8x128xf32>
    %219 = arith.mulf %217, %197 : vector<8x128xf32>
    %220 = arith.mulf %216, %215 : vector<8x128xf32>
    %221 = arith.addf %219, %220 : vector<8x128xf32>
    %222 = math.tanh %221 : vector<8x128xf32>
    %223 = arith.mulf %218, %222 : vector<8x128xf32>
    %c4_i32_85 = arith.constant 4 : i32
    %c0_86 = arith.constant 0 : index
    %c0_87 = arith.constant 0 : index
    %224 = vector.load %arg18[%c0_86, %c0_87] : memref<8x128xf32, #tpu.memory_space<vmem>>, vector<8x128xf32>
    tpu.vector_store %arg18[%c0_86, %c0_87], %223 {strides = array<i32>} : memref<8x128xf32, #tpu.memory_space<vmem>>, vector<8x128xf32>,
    %c0_88 = arith.constant 0 : index
    %c0_89 = arith.constant 0 : index
    %225 = vector.load %arg19[%c0_88, %c0_89] : memref<8x128xf32, #tpu.memory_space<vmem>>, vector<8x128xf32>
    tpu.vector_store %arg19[%c0_88, %c0_89], %221 {strides = array<i32>} : memref<8x128xf32, #tpu.memory_space<vmem>>, vector<8x128xf32>,
    %c1_i32_90 = arith.constant 1 : i32
    %226 = arith.cmpi eq, %arg1, %c1_i32_90 : i32
    %227 = arith.extui %226 : i1 to i32
    %c0_i32_91 = arith.constant 0 : i32
    %228 = arith.cmpi ne, %227, %c0_i32_91 : i32
    scf.if %228 {
      %229 = arith.truncf %223 : vector<8x128xf32> to vector<8x128xbf16>
      %c0_92 = arith.constant 0 : index
      %c0_93 = arith.constant 0 : index
      %230 = vector.load %arg9[%c0_92, %c0_93] : memref<128x256xbf16, #tpu.memory_space<vmem>>, vector<128x256xbf16>
      %cst_94 = arith.constant dense<0.000000e+00> : vector<8x256xf32>
      %231 = tpu.matmul %229, %230, %cst_94 {dimension_numbers = #tpu.dot_dimension_numbers<[1], [0], [0], [1], [0, 0, 1, 1], [], []>} : vector<8x128xbf16>, vector<128x256xbf16>, vector<8x256xf32> -> vector<8x256xf32>
      %c0_95 = arith.constant 0 : index
      %c0_96 = arith.constant 0 : index
      %232 = vector.load %arg10[%c0_95, %c0_96] : memref<1x256xf32, #tpu.memory_space<vmem>>, vector<1x256xf32>
      %233 = vector.broadcast %232 : vector<1x256xf32> to vector<8x256xf32>
      %234 = arith.addf %231, %233 : vector<8x256xf32>
      %cst_97 = arith.constant 0.000000e+00 : f32
      %235 = vector.broadcast %cst_97 : f32 to vector<8x256xf32>
      %236 = arith.maximumf %234, %235 : vector<8x256xf32>
      %237 = arith.truncf %236 : vector<8x256xf32> to vector<8x256xbf16>
      %c0_98 = arith.constant 0 : index
      %c0_99 = arith.constant 0 : index
      %238 = vector.load %arg11[%c0_98, %c0_99] : memref<256x128xbf16, #tpu.memory_space<vmem>>, vector<256x128xbf16>
      %cst_100 = arith.constant dense<0.000000e+00> : vector<8x128xf32>
      %239 = tpu.matmul %237, %238, %cst_100 {dimension_numbers = #tpu.dot_dimension_numbers<[1], [0], [0], [1], [0, 0, 1, 1], [], []>} : vector<8x256xbf16>, vector<256x128xbf16>, vector<8x128xf32> -> vector<8x128xf32>
      %c0_101 = arith.constant 0 : index
      %c0_102 = arith.constant 0 : index
      %240 = vector.load %arg12[%c0_101, %c0_102] : memref<1x128xf32, #tpu.memory_space<vmem>>, vector<1x128xf32>
      %241 = vector.broadcast %240 : vector<1x128xf32> to vector<8x128xf32>
      %242 = arith.addf %239, %241 : vector<8x128xf32>
      %243 = arith.negf %242 : vector<8x128xf32>
      %244 = math.exp %243 : vector<8x128xf32>
      %cst_103 = arith.constant 1.000000e+00 : f32
      %245 = vector.broadcast %cst_103 : f32 to vector<8x128xf32>
      %246 = arith.addf %245, %244 : vector<8x128xf32>
      %247 = arith.divf %245, %246 : vector<8x128xf32>
      %c0_104 = arith.constant 0 : index
      %c0_105 = arith.constant 0 : index
      %248 = vector.load %arg13[%c0_104, %c0_105] : memref<8x128xf32, #tpu.memory_space<vmem>>, vector<8x128xf32>
      tpu.vector_store %arg13[%c0_104, %c0_105], %247 {strides = array<i32>} : memref<8x128xf32, #tpu.memory_space<vmem>>, vector<8x128xf32>,
    } else {
    }
    return
  }
  func.func @transform_0(%arg0: i32, %arg1: i32) -> (i32, i32) {
    %c2_i32 = arith.constant 2 : i32
    %0 = arith.muli %arg0, %c2_i32 : i32
    %1 = arith.addi %0, %arg1 : i32
    %c0_i32 = arith.constant 0 : i32
    %c0_i32_0 = arith.constant 0 : i32
    return %1, %c0_i32 : i32, i32
  }
  func.func @transform_1(%arg0: i32, %arg1: i32) -> (i32, i32) {
    %c0_i32 = arith.constant 0 : i32
    %c0_i32_0 = arith.constant 0 : i32
    %c0_i32_1 = arith.constant 0 : i32
    return %c0_i32, %c0_i32_0 : i32, i32
  }
  func.func @transform_2(%arg0: i32, %arg1: i32) -> (i32, i32) {
    %c0_i32 = arith.constant 0 : i32
    %c0_i32_0 = arith.constant 0 : i32
    %c0_i32_1 = arith.constant 0 : i32
    return %c0_i32, %c0_i32_0 : i32, i32
  }
  func.func @transform_3(%arg0: i32, %arg1: i32) -> (i32, i32) {
    %c0_i32 = arith.constant 0 : i32
    %c0_i32_0 = arith.constant 0 : i32
    %c0_i32_1 = arith.constant 0 : i32
    return %c0_i32, %c0_i32_0 : i32, i32
  }
  func.func @transform_4(%arg0: i32, %arg1: i32) -> (i32, i32) {
    %c0_i32 = arith.constant 0 : i32
    %c0_i32_0 = arith.constant 0 : i32
    %c0_i32_1 = arith.constant 0 : i32
    return %c0_i32, %c0_i32_0 : i32, i32
  }
  func.func @transform_5(%arg0: i32, %arg1: i32) -> (i32, i32) {
    %c0_i32 = arith.constant 0 : i32
    %c0_i32_0 = arith.constant 0 : i32
    %c0_i32_1 = arith.constant 0 : i32
    return %c0_i32, %c0_i32_0 : i32, i32
  }
  func.func @transform_6(%arg0: i32, %arg1: i32) -> (i32, i32) {
    %c0_i32 = arith.constant 0 : i32
    %c0_i32_0 = arith.constant 0 : i32
    %c0_i32_1 = arith.constant 0 : i32
    return %c0_i32, %c0_i32_0 : i32, i32
  }
  func.func @transform_7(%arg0: i32, %arg1: i32) -> (i32, i32) {
    %c0_i32 = arith.constant 0 : i32
    %c0_i32_0 = arith.constant 0 : i32
    %c0_i32_1 = arith.constant 0 : i32
    return %c0_i32, %c0_i32_0 : i32, i32
  }
  func.func @transform_8(%arg0: i32, %arg1: i32) -> (i32, i32) {
    %c0_i32 = arith.constant 0 : i32
    %c0_i32_0 = arith.constant 0 : i32
    %c0_i32_1 = arith.constant 0 : i32
    return %c0_i32, %c0_i32_0 : i32, i32
  }
  func.func @transform_9(%arg0: i32, %arg1: i32) -> (i32, i32) {
    %c0_i32 = arith.constant 0 : i32
    %c0_i32_0 = arith.constant 0 : i32
    %c0_i32_1 = arith.constant 0 : i32
    return %c0_i32, %c0_i32_0 : i32, i32
  }
  func.func @transform_10(%arg0: i32, %arg1: i32) -> (i32, i32) {
    %c0_i32 = arith.constant 0 : i32
    %c0_i32_0 = arith.constant 0 : i32
    %c0_i32_1 = arith.constant 0 : i32
    return %c0_i32, %c0_i32_0 : i32, i32
  }
  func.func @transform_11(%arg0: i32, %arg1: i32) -> (i32, i32) {
    %c0_i32 = arith.constant 0 : i32
    %c0_i32_0 = arith.constant 0 : i32
    return %arg0, %c0_i32 : i32, i32
  }
}

</mosaic_0001>

<bundles_post_ra>
// kernel: lstm_forward.1
= control target key start
LH: loop header
LB: loop body
LE: loop exit
PB: predicated region body
PF: predicated region fallthrough
CT: control target
= control target key end

     0   :  { %s6958_s0 = inlined_call_operand.vmem [shape: bf16[128,64], index: 0, kind: input, shape index: {}]   ;;  %s6959_s1 = inlined_call_operand.vmem [shape: bf16[64,512], index: 1, kind: input, shape index: {}]   ;;  %s6960_s2 = inlined_call_operand.vmem [shape: bf16[128,512], index: 2, kind: input, shape index: {}]   ;;  %s6961_s3 = inlined_call_operand.vmem [shape: f32[1,512], index: 3, kind: input, shape index: {}]   ;;  %s6962_s4 = inlined_call_operand.vmem [shape: bf16[128,512], index: 4, kind: input, shape index: {}]   ;;  %s6963_s5 = inlined_call_operand.vmem [shape: bf16[128,512], index: 5, kind: input, shape index: {}]   ;;  %s6964_s6 = inlined_call_operand.vmem [shape: f32[1,512], index: 6, kind: input, shape index: {}]   ;;  %s6965_s7 = inlined_call_operand.vmem [shape: bf16[128,256], index: 7, kind: input, shape index: {}]   ;;  %s6966_s8 = inlined_call_operand.vmem [shape: f32[1,256], index: 8, kind: input, shape index: {}]   ;;  %s6967_s9 = inlined_call_operand.vmem [shape: bf16[256,128], index: 9, kind: input, shape index: {}]   ;;  %s6968_s10 = inlined_call_operand.vmem [shape: f32[1,128], index: 10, kind: input, shape index: {}]   ;;  %s6969_s11 = inlined_call_operand.hbm [shape: f32[16,128], index: 11, kind: output, shape index: {}]  }
   0x1   :  { %6977 = sst [smem:[#allocation27_spill]] %s6958_s0 }
   0x2   :  { %16 = vsyncpa [#allocation9], 0 }
   0x3   :  { %18 = vsyncpa [#allocation9 + $0x1], 0  ;;  %s4946_s17 = smov 0   ;;  %s4948_s18 = smov 0  }
   0x4   :  { %s4950_s19 = smov 0   ;;  %s4952_s20 = smov 0  }
   0x5   :  { %s4954_s21 = smov 0   ;;  %s4956_s22 = smov 0  }
   0x6   :  { %s4958_s23 = smov 0   ;;  %s4960_s24 = smov 0  }
   0x7 LB: > { %6978 = sst [smem:[#allocation11_spill]] %s4863_s19  ;;  %s3324_s25 = sadd.s32 4294967295, %s4883_s24   ;;  %s4883_s24 = sphi %s4960_s24, %s24_s24   ;;  %s4879_s23 = sphi %s4958_s23, %s7021_s23   ;;  %s4875_s22 = sphi %s4956_s22, %s7020_s22   ;;  %s4871_s21 = sphi %s4954_s21, %s7019_s21   ;;  %s4867_s20 = sphi %s4952_s20, %s7018_s20   ;;  %s4863_s19 = sphi %s4950_s19, %s7017_s19   ;;  %s4859_s18 = sphi %s4948_s18, %s7023_s18   ;;  %s4855_s17 = sphi %s4946_s17, %s7022_s17  }
   0x8   : > { %6979 = sst [smem:[#allocation12_spill]] %s4875_s22  ;;  %s3325_s26 = sadd.s32 4294967294, %s4883_s24  }
   0x9   : > { %6980 = sst [smem:[#allocation13_spill]] %s4879_s23  ;;  %s33_s27 = sadd.s32 1, %s4875_s22 }
   0xa   : > { %p34_p0 = scmp.ge.s32.totalorder %s33_s27, 2  ;;  %s36_s28 = sadd.s32 1, %s4879_s23 }
   0xb   : > { %p293_p1 = scmp.ne.s32.totalorder %s4863_s19, %s4859_s18  ;;  %p294_p2 = scmp.eq.s32.totalorder %s3324_s25, 3 }
   0xc   : > { %s7025_s27 = smov (%p34_p0, %s33_s27), 0  ;;  %s7027_s28 = smov (!%p34_p0, %s36_s28), %s4879_s23 }
   0xd   : > { %6981 = sst [smem:[#allocation14_spill]] %s7025_s27  ;;  %p4995_p3 = por %p294_p2, %p293_p1 }
   0xe   : > { %p299_p4 = scmp.ne.s32.totalorder %s4859_s18, %s4855_s17  ;;  %p38_p5 = scmp.ge.s32.totalorder %s7027_s28, 2 }
   0xf   : > { %p300_p6 = scmp.eq.s32.totalorder %s3325_s26, 3  ;;  %p3330_p7 = scmp.ge.s32.totalorder %s4883_s24, 1 }
  0x10   : > { %p361_p8 = scmp.lt.s32.totalorder %s4883_s24, 5  ;;  %s7029_s28 = smov (%p38_p5, %s7027_s28), 0 }
  0x11   : > { %6983 = sst [smem:[#allocation15_spill]] %s7029_s28  ;;  %p5005_p9 = por %p300_p6, %p299_p4 }
  0x12   : > { %p362_p10 = pnand %p3330_p7, %p361_p8  ;;  %s280_s12 = ssub.s32 %s4879_s23, %s7029_s28 }
  0x13   : > { %s283_s13 = sadd.s32 1, %s4863_s19  ;;  %p281_p11 = scmp.eq.s32.totalorder %s280_s12, 0 }
  0x14   : > { %365 = sbr.rel (%p362_p10) target bundleno = 1827 (0x723), region = 64 }
  0x15   : > { %s5013_s14 = scalar_select %p281_p11, %s4863_s19, %s283_s13  }
  0x17   : > { %6985 = sst [smem:[#allocation16_spill]] %s5013_s14 }
  0x19   : > { %s6973_s15 = sand.u32 1, %s4859_s18   ;;  %s3332_s16 = sshll.u32 %s4871_s21, 1 }
  0x1a   : > { %s5019_s25 = sshll.u32 %s6973_s15, 3  ;;  %s404_s26 = sadd.s32 %s4867_s20, %s3332_s16 }
  0x1b   : > { %s3333_s27 = sshll.u32 %s404_s26, 2  ;;  %s6986_s0 = sld [smem:[#allocation27_spill]] }
  0x1c   : > { %p406_p12 = scmp.lt.s32.totalorder %s3333_s27, 15  ;;  %p3335_p13 = scmp.ne.s32.totalorder %s4867_s20, 0 }
  0x1e   : > { %s7031_s27 = smov (!%p406_p12, %s3333_s27), 15  ;;  %417 = sbr.rel (%p3335_p13) target bundleno = 40 (0x28), region = 68 }
  0x1f   : > { %s3334_s28 = sshll.u32 %s7031_s27, 2 }
  0x21   : > { %s5025_s13 = scalar_lea.vmem %s6986_s0, %s3334_s28 }
  0x23   : > { %v4885_v0 = vmov 0.0  }
  0x24   : > { %418 = vst [vmem:[#allocation4] sm:$0xff] %v4885_v0 }
  0x25   : > { %419 = vst [vmem:[#allocation5] sm:$0xff] %v4885_v0 }
  0x26   : > { %420 = vst [vmem:[#allocation6] sm:$0xff] %v4885_v0 }
  0x27   : > { %421 = vst [vmem:[#allocation7] sm:$0xff] %v4885_v0 }
  0x28 PF: > { %v3394_v1 = vld [vmem:[%s6959_s1 + $0x60] sm:$0xf]  ;;  %v4358_v2 = vld [vmem:[%s6959_s1 + $0x6c] sm:$0xf0]  ;;  %v4356_v3 = vld [vmem:[%s6959_s1 + $0x64] sm:$0xf] }
  0x29   : > { %v3395_v4 = vor.u32 %v4358_v2, %v3394_v1  ;;  %v3396_v5 = vld [vmem:[%s6959_s1 + $0x70] sm:$0xf0]  ;;  %v3402_v6 = vld [vmem:[%s6959_s1 + $0x68] sm:$0xf]  ;;  %v4359_v7 = vld [vmem:[%s6959_s1 + $0x74] sm:$0xf0] }
  0x2a   : > { %v3399_v8 = vor.u32 %v4356_v3, %v3396_v5  ;;  %v3403_v9 = vor.u32 %v4359_v7, %v3402_v6  ;;  %v4357_v10 = vld [vmem:[%s6959_s1 + $0x6c] sm:$0xf]  ;;  %v3404_v11 = vld [vmem:[%s6959_s1 + $0x78] sm:$0xf0]  ;;  %v3378_v12 = vld [vmem:[%s6959_s1 + $0x40] sm:$0xf] }
  0x2b   : > { %553 = vmatpush.bf16.msra.mxu0 %v3395_v4  ;;  %v3407_v13 = vor.u32 %v4357_v10, %v3404_v11  ;;  %v4354_v14 = vld [vmem:[%s6959_s1 + $0x4c] sm:$0xf0]  ;;  %v4352_v15 = vld [vmem:[%s6959_s1 + $0x44] sm:$0xf]  ;;  %v3380_v16 = vld [vmem:[%s6959_s1 + $0x50] sm:$0xf0] }
  0x2c   : > { %572 = vmatpush.bf16.msra.mxu1 %v3399_v8  ;;  %591 = vmatpush.bf16.msra.mxu2 %v3403_v9  ;;  %v3379_v17 = vor.u32 %v4354_v14, %v3378_v12  ;;  %v3383_v18 = vor.u32 %v4352_v15, %v3380_v16  ;;  %v3386_v19 = vld [vmem:[%s6959_s1 + $0x48] sm:$0xf]  ;;  %v4355_v20 = vld [vmem:[%s6959_s1 + $0x54] sm:$0xf0]  ;;  %v4353_v21 = vld [vmem:[%s6959_s1 + $0x4c] sm:$0xf] }
  0x2d   : > { %610 = vmatpush.bf16.msra.mxu3 %v3407_v13  ;;  %v3387_v22 = vor.u32 %v4355_v20, %v3386_v19  ;;  %v3388_v23 = vld [vmem:[%s6959_s1 + $0x58] sm:$0xf0]  ;;  %v3362_v24 = vld [vmem:[%s6959_s1 + $0x20] sm:$0xf]  ;;  %v4350_v25 = vld [vmem:[%s6959_s1 + $0x2c] sm:$0xf0] }
  0x2e   : > { %v3391_v26 = vor.u32 %v4353_v21, %v3388_v23  ;;  %v4348_v27 = vld [vmem:[%s6959_s1 + $0x24] sm:$0xf]  ;;  %v3364_v28 = vld [vmem:[%s6959_s1 + $0x30] sm:$0xf0]  ;;  %v3370_v29 = vld [vmem:[%s6959_s1 + $0x28] sm:$0xf]  ;;  %v3363_v30 = vor.u32 %v4350_v25, %v3362_v24 }
  0x2f   : > { %554 = vmatpush.bf16.msra.mxu0 %v3379_v17  ;;  %v4351_v31 = vld [vmem:[%s6959_s1 + $0x34] sm:$0xf0]  ;;  %v4349_v32 = vld [vmem:[%s6959_s1 + $0x2c] sm:$0xf]  ;;  %v3372_v33 = vld [vmem:[%s6959_s1 + $0x38] sm:$0xf0]  ;;  %v3367_v34 = vor.u32 %v4348_v27, %v3364_v28 }
  0x30   : > { %573 = vmatpush.bf16.msra.mxu1 %v3383_v18  ;;  %592 = vmatpush.bf16.msra.mxu2 %v3387_v22  ;;  %v3371_v35 = vor.u32 %v4351_v31, %v3370_v29  ;;  %v3346_v36 = vld [vmem:[%s6959_s1] sm:$0xf]  ;;  %v4346_v37 = vld [vmem:[%s6959_s1 + $0xc] sm:$0xf0]  ;;  %v4344_v38 = vld [vmem:[%s6959_s1 + $0x4] sm:$0xf]  ;;  %v3375_v39 = vor.u32 %v4349_v32, %v3372_v33 }
  0x31   : > { %611 = vmatpush.bf16.msra.mxu3 %v3391_v26  ;;  %v3348_v40 = vld [vmem:[%s6959_s1 + $0x10] sm:$0xf0]  ;;  %v3354_v41 = vld [vmem:[%s6959_s1 + $0x8] sm:$0xf]  ;;  %v4347_v42 = vld [vmem:[%s6959_s1 + $0x14] sm:$0xf0]  ;;  %v3347_v45 = vor.u32 %v4346_v37, %v3346_v36 }
  0x32   : > { %v4345_v43 = vld [vmem:[%s6959_s1 + $0xc] sm:$0xf]  ;;  %v3356_v44 = vld [vmem:[%s6959_s1 + $0x18] sm:$0xf0]  ;;  %v3530_v46 = vld [vmem:[%s6960_s2 + $0xe0] sm:$0xf]  ;;  %v3351_v49 = vor.u32 %v4344_v38, %v3348_v40  ;;  %v3355_v50 = vor.u32 %v4347_v42, %v3354_v41 }
  0x33   : > { %555 = vmatpush.bf16.msra.mxu0 %v3363_v30  ;;  %v4390_v47 = vld [vmem:[%s6960_s2 + $0xec] sm:$0xf0]  ;;  %v4388_v48 = vld [vmem:[%s6960_s2 + $0xe4] sm:$0xf]  ;;  %v3532_v52 = vld [vmem:[%s6960_s2 + $0xf0] sm:$0xf0]  ;;  %v3359_v53 = vor.u32 %v4345_v43, %v3356_v44 }
  0x34   : > { %574 = vmatpush.bf16.msra.mxu1 %v3367_v34  ;;  %593 = vmatpush.bf16.msra.mxu2 %v3371_v35  ;;  %v4342_v51 = vld [vmem:[%s5025_s13] sm:$0xff]  ;;  %v3531_v54 = vor.u32 %v4390_v47, %v3530_v46  ;;  %v3538_v55 = vld [vmem:[%s6960_s2 + $0xe8] sm:$0xf]  ;;  %v4391_v56 = vld [vmem:[%s6960_s2 + $0xf4] sm:$0xf0]  ;;  %v3535_v58 = vor.u32 %v4388_v48, %v3532_v52  ;;  %vm542_vm0 = vcmask 523264  }
  0x35   : > { %612 = vmatpush.bf16.msra.mxu3 %v3375_v39  ;;  %v4389_v57 = vld [vmem:[%s6960_s2 + $0xec] sm:$0xf]  ;;  %v3540_v59 = vld [vmem:[%s6960_s2 + $0xf8] sm:$0xf0]  ;;  %v3514_v60 = vld [vmem:[%s6960_s2 + $0xc0] sm:$0xf]  ;;  %v3539_v0 = vor.u32 %v4391_v56, %v3538_v55 }
  0x36   : > { %v4386_v61 = vld [vmem:[%s6960_s2 + $0xcc] sm:$0xf0]  ;;  %v4384_v62 = vld [vmem:[%s6960_s2 + $0xc4] sm:$0xf]  ;;  %v3516_v63 = vld [vmem:[%s6960_s2 + $0xd0] sm:$0xf0]  ;;  %v3543_v1 = vor.u32 %v4389_v57, %v3540_v59 }
  0x37   : > { %556 = vmatpush.bf16.msra.mxu0 %v3347_v45  ;;  %v3515_v2 = vor.u32 %v4386_v61, %v3514_v60  ;;  %v3522_v3 = vld [vmem:[%s6960_s2 + $0xc8] sm:$0xf]  ;;  %v4387_v4 = vld [vmem:[%s6960_s2 + $0xd4] sm:$0xf0]  ;;  %v4385_v5 = vld [vmem:[%s6960_s2 + $0xcc] sm:$0xf]  ;;  %v3519_v6 = vor.u32 %v4384_v62, %v3516_v63 }
  0x38   : > { %575 = vmatpush.bf16.msra.mxu1 %v3351_v49  ;;  %594 = vmatpush.bf16.msra.mxu2 %v3355_v50  ;;  %v3524_v7 = vld [vmem:[%s6960_s2 + $0xd8] sm:$0xf0]  ;;  %v3498_v8 = vld [vmem:[%s6960_s2 + $0xa0] sm:$0xf]  ;;  %v4382_v9 = vld [vmem:[%s6960_s2 + $0xac] sm:$0xf0]  ;;  %v3523_v12 = vor.u32 %v4387_v4, %v3522_v3 }
  0x39   : > { %613 = vmatpush.bf16.msra.mxu3 %v3359_v53  ;;  %v4380_v10 = vld [vmem:[%s6960_s2 + $0xa4] sm:$0xf]  ;;  %v3500_v11 = vld [vmem:[%s6960_s2 + $0xb0] sm:$0xf0]  ;;  %v3527_v13 = vor.u32 %v4385_v5, %v3524_v7  ;;  %v3499_v14 = vor.u32 %v4382_v9, %v3498_v8  ;;  %v3506_v15 = vld [vmem:[%s6960_s2 + $0xa8] sm:$0xf] }
  0x3a   : > { %3408 = vmatmul.msk.bf16.vlgmr.msra.gmra.mxu0 %vm542_vm0, %v4342_v51  ;;  %v4383_v16 = vld [vmem:[%s6960_s2 + $0xb4] sm:$0xf0]  ;;  %v4381_v17 = vld [vmem:[%s6960_s2 + $0xac] sm:$0xf]  ;;  %v3503_v18 = vor.u32 %v4380_v10, %v3500_v11  ;;  %v3508_v19 = vld [vmem:[%s6960_s2 + $0xb8] sm:$0xf0] }
  0x3b   : > { %843 = vmatpush.bf16.msrb.mxu0 %v3531_v54  ;;  %3410 = vmatmul.msk.bf16.vlgmr.msra.gmra.mxu1 %vm542_vm0, %v4342_v51  ;;  %v3482_v20 = vld [vmem:[%s6960_s2 + $0x80] sm:$0xf]  ;;  %v4378_v21 = vld [vmem:[%s6960_s2 + $0x8c] sm:$0xf0]  ;;  %v4376_v22 = vld [vmem:[%s6960_s2 + $0x84] sm:$0xf]  ;;  %v3507_v24 = vor.u32 %v4383_v16, %v3506_v15  ;;  %v3511_v25 = vor.u32 %v4381_v17, %v3508_v19 }
  0x3c   : > { %856 = vmatpush.bf16.msrb.mxu1 %v3535_v58  ;;  %3412 = vmatmul.msk.bf16.vlgmr.msra.gmra.mxu2 %vm542_vm0, %v4342_v51  ;;  %v3484_v23 = vld [vmem:[%s6960_s2 + $0x90] sm:$0xf0]  ;;  %v3483_v26 = vor.u32 %v4378_v21, %v3482_v20  ;;  %v3490_v27 = vld [vmem:[%s6960_s2 + $0x88] sm:$0xf]  ;;  %v4379_v28 = vld [vmem:[%s6960_s2 + $0x94] sm:$0xf0] }
  0x3d   : > { %3414 = vmatmul.msk.bf16.vlgmr.msra.gmra.mxu3 %vm542_vm0, %v4342_v51  ;;  %869 = vmatpush.bf16.msrb.mxu2 %v3539_v0  ;;  %v4377_v29 = vld [vmem:[%s6960_s2 + $0x8c] sm:$0xf]  ;;  %v3487_v30 = vor.u32 %v4376_v22, %v3484_v23  ;;  %v3492_v31 = vld [vmem:[%s6960_s2 + $0x98] sm:$0xf0]  ;;  %v3466_v32 = vld [vmem:[%s6960_s2 + $0x60] sm:$0xf]  ;;  %v3491_v36 = vor.u32 %v4379_v28, %v3490_v27 }
  0x3e   : > { %882 = vmatpush.bf16.msrb.mxu3 %v3543_v1  ;;  %v4374_v33 = vld [vmem:[%s6960_s2 + $0x6c] sm:$0xf0]  ;;  %v4372_v34 = vld [vmem:[%s6960_s2 + $0x64] sm:$0xf]  ;;  %v3468_v35 = vld [vmem:[%s6960_s2 + $0x70] sm:$0xf0]  ;;  %v3495_v38 = vor.u32 %v4377_v29, %v3492_v31 }
  0x3f   : > { %844 = vmatpush.bf16.msrb.mxu0 %v3515_v2  ;;  %v4343_v37 = vld [vmem:[%s5025_s13 + $0x8] sm:$0xff]  ;;  %v3467_v39 = vor.u32 %v4374_v33, %v3466_v32  ;;  %v4375_v41 = vld [vmem:[%s6960_s2 + $0x74] sm:$0xf0]  ;;  %v3471_v43 = vor.u32 %v4372_v34, %v3468_v35  ;;  %v3476_v44 = vld [vmem:[%s6960_s2 + $0x78] sm:$0xf0]  ;;  %p4208_p0 = scmp.ne.s32.totalorder %s4867_s20, 1 }
  0x40   : > { %857 = vmatpush.bf16.msrb.mxu1 %v3519_v6  ;;  %v3474_v40 = vld [vmem:[%s6960_s2 + $0x68] sm:$0xf]  ;;  %v4373_v42 = vld [vmem:[%s6960_s2 + $0x6c] sm:$0xf]  ;;  %v3450_v45 = vld [vmem:[%s6960_s2 + $0x40] sm:$0xf] }
  0x41   : > { %870 = vmatpush.bf16.msrb.mxu2 %v3523_v12  ;;  %v4370_v46 = vld [vmem:[%s6960_s2 + $0x4c] sm:$0xf0]  ;;  %v4368_v47 = vld [vmem:[%s6960_s2 + $0x44] sm:$0xf]  ;;  %v3452_v48 = vld [vmem:[%s6960_s2 + $0x50] sm:$0xf0]  ;;  %v3475_v49 = vor.u32 %v4375_v41, %v3474_v40  ;;  %v3479_v50 = vor.u32 %v4373_v42, %v3476_v44 }
  0x42   : > { %883 = vmatpush.bf16.msrb.mxu3 %v3527_v13  ;;  %v3451_v51 = vor.u32 %v4370_v46, %v3450_v45  ;;  %v3458_v52 = vld [vmem:[%s6960_s2 + $0x48] sm:$0xf]  ;;  %v4371_v53 = vld [vmem:[%s6960_s2 + $0x54] sm:$0xf0]  ;;  %v4369_v54 = vld [vmem:[%s6960_s2 + $0x4c] sm:$0xf]  ;;  %v3455_v55 = vor.u32 %v4368_v47, %v3452_v48 }
  0x43   : > { %845 = vmatpush.bf16.msrb.mxu0 %v3499_v14  ;;  %v3460_v56 = vld [vmem:[%s6960_s2 + $0x58] sm:$0xf0]  ;;  %v3434_v57 = vld [vmem:[%s6960_s2 + $0x20] sm:$0xf]  ;;  %v4366_v58 = vld [vmem:[%s6960_s2 + $0x2c] sm:$0xf0]  ;;  %v3459_v61 = vor.u32 %v4371_v53, %v3458_v52 }
  0x44   : > { %858 = vmatpush.bf16.msrb.mxu1 %v3503_v18  ;;  %v4364_v59 = vld [vmem:[%s6960_s2 + $0x24] sm:$0xf]  ;;  %v3436_v60 = vld [vmem:[%s6960_s2 + $0x30] sm:$0xf0]  ;;  %v3463_v62 = vor.u32 %v4369_v54, %v3460_v56  ;;  %v3435_v63 = vor.u32 %v4366_v58, %v3434_v57  ;;  %v3442_v0 = vld [vmem:[%s6960_s2 + $0x28] sm:$0xf] }
  0x45   : > { %871 = vmatpush.bf16.msrb.mxu2 %v3507_v24  ;;  %v4367_v1 = vld [vmem:[%s6960_s2 + $0x34] sm:$0xf0]  ;;  %v4365_v2 = vld [vmem:[%s6960_s2 + $0x2c] sm:$0xf]  ;;  %v3439_v3 = vor.u32 %v4364_v59, %v3436_v60  ;;  %v3444_v4 = vld [vmem:[%s6960_s2 + $0x38] sm:$0xf0] }
  0x46   : > { %884 = vmatpush.bf16.msrb.mxu3 %v3511_v25  ;;  %v3418_v5 = vld [vmem:[%s6960_s2] sm:$0xf]  ;;  %v4362_v6 = vld [vmem:[%s6960_s2 + $0xc] sm:$0xf0]  ;;  %v4360_v7 = vld [vmem:[%s6960_s2 + $0x4] sm:$0xf]  ;;  %v3443_v9 = vor.u32 %v4367_v1, %v3442_v0  ;;  %v3447_v10 = vor.u32 %v4365_v2, %v3444_v4 }
  0x47   : > { %846 = vmatpush.bf16.msrb.mxu0 %v3483_v26  ;;  %v3420_v8 = vld [vmem:[%s6960_s2 + $0x10] sm:$0xf0]  ;;  %v3419_v11 = vor.u32 %v4362_v6, %v3418_v5  ;;  %v3426_v12 = vld [vmem:[%s6960_s2 + $0x8] sm:$0xf]  ;;  %v4363_v13 = vld [vmem:[%s6960_s2 + $0x14] sm:$0xf0] }
  0x48   : > { %859 = vmatpush.bf16.msrb.mxu1 %v3487_v30  ;;  %v3423_v14 = vor.u32 %v4360_v7, %v3420_v8  ;;  %v4361_v15 = vld [vmem:[%s6960_s2 + $0xc] sm:$0xf]  ;;  %v3428_v16 = vld [vmem:[%s6960_s2 + $0x18] sm:$0xf0]  ;;  %v641_v17 = vld [vmem:[#allocation4] sm:$0xff]  ;;  %v3427_v18 = vor.u32 %v4363_v13, %v3426_v12  ;;  %s7013_s20 = scalar_lea.vmem (!%p4208_p0), [#allocation8], %s5019_s25 }
  0x49   : > { %872 = vmatpush.bf16.msrb.mxu2 %v3491_v36  ;;  %v3431_v19 = vor.u32 %v4361_v15, %v3428_v16  ;;  %v650_v20 = vpack.c.bf16 %v641_v17, %v641_v17  ;;  %v442_v23 = vld [vmem:[%s6961_s3] sm:$0xf]  ;;  %v4422_v35 = vld [vmem:[%s6960_s2 + $0xec] sm:$0xf0]  ;;  %v4420_v36 = vld [vmem:[%s6960_s2 + $0xe4] sm:$0xf] }
  0x4a   : > { %885 = vmatpush.bf16.msrb.mxu3 %v3495_v38  ;;  %3409 = vmatmul.msk.bf16.gmra.mxu0 %vm542_vm0, %v4343_v37  ;;  %v5334_v24 = vperm.slane %v442_v23, 0  ;;  %v5338_v26 = vperm.slane %v442_v23, 1  ;;  %v5348_v32 = vperm.slane %v442_v23, 2  ;;  %v5350_v33 = vperm.slane %v442_v23, 3  ;;  %v3661_v34 = vld [vmem:[%s6960_s2 + $0xe0] sm:$0xf] }
  0x4b   : > { %847 = vmatpush.bf16.msrb.mxu0 %v3467_v39  ;;  %3411 = vmatmul.msk.bf16.gmra.mxu1 %vm542_vm0, %v4343_v37  ;;  %v3662_v38 = vor.u32 %v4422_v35, %v3661_v34  ;;  %v3663_v39 = vld [vmem:[%s6960_s2 + $0xf0] sm:$0xf0]  ;;  %v3669_v40 = vld [vmem:[%s6960_s2 + $0xe8] sm:$0xf]  ;;  %v4423_v41 = vld [vmem:[%s6960_s2 + $0xf4] sm:$0xf0] }
  0x4c   : > { %860 = vmatpush.bf16.msrb.mxu1 %v3471_v43  ;;  %3413 = vmatmul.msk.bf16.gmra.mxu2 %vm542_vm0, %v4343_v37  ;;  %v3666_v45 = vor.u32 %v4420_v36, %v3663_v39  ;;  %v3670_v46 = vor.u32 %v4423_v41, %v3669_v40  ;;  %v4421_v47 = vld [vmem:[%s6960_s2 + $0xec] sm:$0xf]  ;;  %v3671_v48 = vld [vmem:[%s6960_s2 + $0xf8] sm:$0xf0]  ;;  %v3645_v54 = vld [vmem:[%s6960_s2 + $0xc0] sm:$0xf] }
  0x4d   : > { %3415 = vmatmul.msk.bf16.gmra.mxu3 %vm542_vm0, %v4343_v37  ;;  %873 = vmatpush.bf16.msrb.mxu2 %v3475_v49  ;;  %v3674_v52 = vor.u32 %v4421_v47, %v3671_v48  ;;  %v4416_v56 = vld [vmem:[%s6960_s2 + $0xc4] sm:$0xf]  ;;  %v3647_v58 = vld [vmem:[%s6960_s2 + $0xd0] sm:$0xf0]  ;;  %v3653_v59 = vld [vmem:[%s6960_s2 + $0xc8] sm:$0xf] }
  0x4e   : > { %886 = vmatpush.bf16.msrb.mxu3 %v3479_v50  ;;  %v4419_v60 = vld [vmem:[%s6960_s2 + $0xd4] sm:$0xf0]  ;;  %v3655_v0 = vld [vmem:[%s6960_s2 + $0xd8] sm:$0xf0]  ;;  %v3629_v2 = vld [vmem:[%s6960_s2 + $0xa0] sm:$0xf] }
  0x4f   : > { %848 = vmatpush.bf16.msrb.mxu0 %v3451_v51  ;;  %v4412_v4 = vld [vmem:[%s6960_s2 + $0xa4] sm:$0xf]  ;;  %v3631_v7 = vld [vmem:[%s6960_s2 + $0xb0] sm:$0xf0]  ;;  %v3637_v8 = vld [vmem:[%s6960_s2 + $0xa8] sm:$0xf] }
  0x50   : > { %861 = vmatpush.bf16.msrb.mxu1 %v3455_v55  ;;  %v4418_v55 = vld [vmem:[%s6960_s2 + $0xcc] sm:$0xf0]  ;;  %v3634_v13 = vor.u32 %v4412_v4, %v3631_v7  ;;  %v4413_v15 = vld [vmem:[%s6960_s2 + $0xac] sm:$0xf]  ;;  %v3639_v16 = vld [vmem:[%s6960_s2 + $0xb8] sm:$0xf0] }
  0x51   : > { %874 = vmatpush.bf16.msrb.mxu2 %v3459_v61  ;;  %v3646_v57 = vor.u32 %v4418_v55, %v3645_v54  ;;  %v3650_v61 = vor.u32 %v4416_v56, %v3647_v58  ;;  %v4408_v34 = vld [vmem:[%s6960_s2 + $0x84] sm:$0xf]  ;;  %v3615_v36 = vld [vmem:[%s6960_s2 + $0x90] sm:$0xf0]  ;;  %v4409_v41 = vld [vmem:[%s6960_s2 + $0x8c] sm:$0xf] }
  0x52   : > { %887 = vmatpush.bf16.msrb.mxu3 %v3463_v62  ;;  %v3654_v62 = vor.u32 %v4419_v60, %v3653_v59  ;;  %v3618_v39 = vor.u32 %v4408_v34, %v3615_v36  ;;  %v4404_v47 = vld [vmem:[%s6960_s2 + $0x64] sm:$0xf]  ;;  %v3599_v54 = vld [vmem:[%s6960_s2 + $0x70] sm:$0xf0]  ;;  %v3605_v55 = vld [vmem:[%s6960_s2 + $0x68] sm:$0xf] }
  0x53   : > { %849 = vmatpush.bf16.msrb.mxu0 %v3435_v63  ;;  %v4417_v63 = vld [vmem:[%s6960_s2 + $0xcc] sm:$0xf]  ;;  %v4407_v56 = vld [vmem:[%s6960_s2 + $0x74] sm:$0xf0]  ;;  %v3602_v59 = vor.u32 %v4404_v47, %v3599_v54  ;;  %v4400_v4 = vld [vmem:[%s6960_s2 + $0x44] sm:$0xf] }
  0x54   : > { %862 = vmatpush.bf16.msrb.mxu1 %v3439_v3  ;;  %v3658_v1 = vor.u32 %v4417_v63, %v3655_v0  ;;  %v4414_v3 = vld [vmem:[%s6960_s2 + $0xac] sm:$0xf0]  ;;  %v3606_v60 = vor.u32 %v4407_v56, %v3605_v55  ;;  %v3583_v7 = vld [vmem:[%s6960_s2 + $0x50] sm:$0xf0]  ;;  %v4396_v34 = vld [vmem:[%s6960_s2 + $0x24] sm:$0xf] }
  0x55   : > { %875 = vmatpush.bf16.msrb.mxu2 %v3443_v9  ;;  %v3630_v6 = vor.u32 %v4414_v3, %v3629_v2  ;;  %v4415_v9 = vld [vmem:[%s6960_s2 + $0xb4] sm:$0xf0]  ;;  %v3581_v2 = vld [vmem:[%s6960_s2 + $0x40] sm:$0xf]  ;;  %v4402_v3 = vld [vmem:[%s6960_s2 + $0x4c] sm:$0xf0] }
  0x56   : > { %888 = vmatpush.bf16.msrb.mxu3 %v3447_v10  ;;  %v3573_v36 = vld [vmem:[%s6960_s2 + $0x28] sm:$0xf]  ;;  %v4394_v47 = vld [vmem:[%s6960_s2 + $0xc] sm:$0xf0]  ;;  %v3551_v54 = vld [vmem:[%s6960_s2 + $0x10] sm:$0xf0] }
  0x57   : > { %850 = vmatpush.bf16.msrb.mxu0 %v3419_v11  ;;  %v3557_v55 = vld [vmem:[%s6960_s2 + $0x8] sm:$0xf]  ;;  %v4395_v56 = vld [vmem:[%s6960_s2 + $0x14] sm:$0xf0] }
  0x58   : > { %863 = vmatpush.bf16.msrb.mxu1 %v3423_v14  ;;  %v3638_v14 = vor.u32 %v4415_v9, %v3637_v8  ;;  %v3589_v8 = vld [vmem:[%s6960_s2 + $0x48] sm:$0xf] }
  0x59   : > { %876 = vmatpush.bf16.msrb.mxu2 %v3427_v18 }
  0x5a   : > { %889 = vmatpush.bf16.msrb.mxu3 %v3431_v19  ;;  %851 = vmatmul.bf16.vlgmr.msrb.gmra.mxu0 %v650_v20 }
  0x5b   : > { %864 = vmatmul.bf16.vlgmr.msrb.gmra.mxu1 %v650_v20  ;;  %1163 = vmatpush.bf16.msra.mxu0 %v3662_v38  ;;  %v4411_v38 = vld [vmem:[%s6960_s2 + $0x94] sm:$0xf0] }
  0x5c   : > { %877 = vmatmul.bf16.vlgmr.msrb.gmra.mxu2 %v650_v20  ;;  %1176 = vmatpush.bf16.msra.mxu1 %v3666_v45  ;;  %v3597_v45 = vld [vmem:[%s6960_s2 + $0x60] sm:$0xf] }
  0x5d   : > { %890 = vmatmul.bf16.vlgmr.msrb.gmra.mxu3 %v650_v20  ;;  %1189 = vmatpush.bf16.msra.mxu2 %v3670_v46  ;;  %v3642_v20 = vor.u32 %v4413_v15, %v3639_v16  ;;  %v4406_v46 = vld [vmem:[%s6960_s2 + $0x6c] sm:$0xf0]  ;;  %v3591_v15 = vld [vmem:[%s6960_s2 + $0x58] sm:$0xf0]  ;;  %v3565_v16 = vld [vmem:[%s6960_s2 + $0x20] sm:$0xf] }
  0x5e   : > { %1202 = vmatpush.bf16.msra.mxu3 %v3674_v52  ;;  %v3598_v52 = vor.u32 %v4406_v46, %v3597_v45  ;;  %v3549_v46 = vld [vmem:[%s6960_s2] sm:$0xf] }
  0x5f   : > { %1164 = vmatpush.bf16.msra.mxu0 %v3646_v57 }
  0x60   : > { %1177 = vmatpush.bf16.msra.mxu1 %v3650_v61  ;;  %v4405_v61 = vld [vmem:[%s6960_s2 + $0x6c] sm:$0xf] }
  0x61   : > { %1190 = vmatpush.bf16.msra.mxu2 %v3654_v62  ;;  %v3607_v62 = vld [vmem:[%s6960_s2 + $0x78] sm:$0xf0] }
  0x62   : > { %1203 = vmatpush.bf16.msra.mxu3 %v3658_v1 }
  0x63   : > { %1165 = vmatpush.bf16.msra.mxu0 %v3630_v6  ;;  %v3582_v6 = vor.u32 %v4402_v3, %v3581_v2 }
  0x64   : > { %1178 = vmatpush.bf16.msra.mxu1 %v3634_v13  ;;  %v4401_v13 = vld [vmem:[%s6960_s2 + $0x4c] sm:$0xf] }
  0x65   : > { %1191 = vmatpush.bf16.msra.mxu2 %v3638_v14 }
  0x66   : > { %1204 = vmatpush.bf16.msra.mxu3 %v3642_v20 }
  0x68   : > { %1179 = vmatpush.bf16.msra.mxu1 %v3618_v39  ;;  %v3575_v39 = vld [vmem:[%s6960_s2 + $0x38] sm:$0xf0] }
  0x6c   : > { %1180 = vmatpush.bf16.msra.mxu1 %v3602_v59  ;;  %v3559_v59 = vld [vmem:[%s6960_s2 + $0x18] sm:$0xf0] }
  0xb7   : > { %v5327_v21 = vpop.f32.mrf.mxu0 }
  0xb8   : > { %v5329_v22 = vpop.f32.mrf.mxu1  ;;  %v559_v48 = vadd.f32 %v5327_v21, %v5334_v24 }
  0xb9   : > { %v578_v57 = vadd.f32 %v5329_v22, %v5338_v26 }
  0xbf   : > { %v5336_v25 = vpop.f32.mrf.mxu2  ;;  %v560_v28 = vpop.f32.mrf.mxu0 }
  0xc0   : > { %v5340_v27 = vpop.f32.mrf.mxu3  ;;  %v5343_v29 = vadd.f32 %v560_v28, %v5334_v24  ;;  %v579_v30 = vpop.f32.mrf.mxu1  ;;  %v3613_v28 = vld [vmem:[%s6960_s2 + $0x80] sm:$0xf]  ;;  %v597_v20 = vadd.f32 %v5336_v25, %v5348_v32  ;;  %v4399_v25 = vld [vmem:[%s6960_s2 + $0x34] sm:$0xf0] }
  0xc1   : > { %v5346_v31 = vadd.f32 %v579_v30, %v5338_v26  ;;  %v4410_v30 = vld [vmem:[%s6960_s2 + $0x8c] sm:$0xf0] }
  0xc2   : > { %v3614_v35 = vor.u32 %v4410_v30, %v3613_v28  ;;  %v3594_v28 = vor.u32 %v4401_v13, %v3591_v15 }
  0xc4   : > { %1166 = vmatpush.bf16.msra.mxu0 %v3614_v35  ;;  %v3567_v35 = vld [vmem:[%s6960_s2 + $0x30] sm:$0xf0] }
  0xc7   : > { %v598_v37 = vpop.f32.mrf.mxu2  ;;  %v563_v44 = vpop.f32.mrf.mxu0 }
  0xc8   : > { %v5371_v42 = vadd.f32 %v598_v37, %v5348_v32  ;;  %v617_v43 = vpop.f32.mrf.mxu3  ;;  %v5383_v50 = vadd.f32 %v563_v44, %v5334_v24  ;;  %v582_v51 = vpop.f32.mrf.mxu1  ;;  %v3621_v37 = vld [vmem:[%s6960_s2 + $0x88] sm:$0xf]  ;;  %1167 = vmatpush.bf16.msra.mxu0 %v3598_v52  ;;  %v3550_v52 = vor.u32 %v4394_v47, %v3549_v46 }
  0xc9   : > { %v5380_v49 = vadd.f32 %v617_v43, %v5350_v33  ;;  %v5386_v53 = vadd.f32 %v582_v51, %v5338_v26  ;;  %v3622_v40 = vor.u32 %v4411_v38, %v3621_v37  ;;  %v3623_v43 = vld [vmem:[%s6960_s2 + $0x98] sm:$0xf0]  ;;  %v3570_v38 = vor.u32 %v4396_v34, %v3567_v35 }
  0xca   : > { %v3626_v44 = vor.u32 %v4409_v41, %v3623_v43 }
  0xcb   : > { %1192 = vmatpush.bf16.msra.mxu2 %v3622_v40 }
  0xcc   : > { %1205 = vmatpush.bf16.msra.mxu3 %v3626_v44  ;;  %1168 = vmatpush.bf16.msra.mxu0 %v3582_v6  ;;  %v3574_v44 = vor.u32 %v4399_v25, %v3573_v36 }
  0xcf   : > { %v601_v5 = vpop.f32.mrf.mxu2  ;;  %v565_v12 = vpop.f32.mrf.mxu0  ;;  %1193 = vmatpush.bf16.msra.mxu2 %v3606_v60 }
  0xd0   : > { %v5431_v10 = vadd.f32 %v601_v5, %v5348_v32  ;;  %v620_v11 = vpop.f32.mrf.mxu3  ;;  %v5443_v18 = vadd.f32 %v565_v12, %v5334_v24  ;;  %v584_v19 = vpop.f32.mrf.mxu1  ;;  %v4403_v12 = vld [vmem:[%s6960_s2 + $0x54] sm:$0xf0] }
  0xd1   : > { %v5440_v17 = vadd.f32 %v620_v11, %v5350_v33  ;;  %v5446_v23 = vadd.f32 %v584_v19, %v5338_v26  ;;  %v3610_v26 = vor.u32 %v4405_v61, %v3607_v62  ;;  %v3586_v11 = vor.u32 %v4400_v4, %v3583_v7  ;;  %v4398_v19 = vld [vmem:[%s6960_s2 + $0x2c] sm:$0xf0] }
  0xd2   : > { %v3590_v14 = vor.u32 %v4403_v12, %v3589_v8  ;;  %v3566_v30 = vor.u32 %v4398_v19, %v3565_v16  ;;  %v3558_v61 = vor.u32 %v4395_v56, %v3557_v55  ;;  %v616_v4 = vadd.f32 %v5340_v27, %v5350_v33 }
  0xd3   : > { %1206 = vmatpush.bf16.msra.mxu3 %v3610_v26  ;;  %1181 = vmatpush.bf16.msra.mxu1 %v3586_v11 }
  0xd4   : > { %1194 = vmatpush.bf16.msra.mxu2 %v3590_v14  ;;  %1169 = vmatpush.bf16.msra.mxu0 %v3566_v30 }
  0xd7   : > { %v603_v51 = vpop.f32.mrf.mxu2  ;;  %v852_v58 = vpop.f32.mrf.mxu0  ;;  %1207 = vmatpush.bf16.msra.mxu3 %v3594_v28  ;;  %1182 = vmatpush.bf16.msra.mxu1 %v3570_v38 }
  0xd8   : > { %v5495_v21 = vadd.f32 %v603_v51, %v5348_v32  ;;  %v622_v24 = vpop.f32.mrf.mxu3  ;;  %v895_v0 = vadd.f32 %v852_v58, %v559_v48  ;;  %v865_v22 = vpop.f32.mrf.mxu1  ;;  %v4397_v32 = vld [vmem:[%s6960_s2 + $0x2c] sm:$0xf]  ;;  %v4392_v48 = vld [vmem:[%s6960_s2 + $0x4] sm:$0xf]  ;;  %1195 = vmatpush.bf16.msra.mxu2 %v3574_v44  ;;  %1170 = vmatpush.bf16.msra.mxu0 %v3550_v52 }
  0xd9   : > { %v5504_v63 = vadd.f32 %v622_v24, %v5350_v33  ;;  %v896_v1 = vadd.f32 %v865_v22, %v578_v57  ;;  %v3578_v45 = vor.u32 %v4397_v32, %v3575_v39  ;;  %v3554_v24 = vor.u32 %v4392_v48, %v3551_v54  ;;  %v4393_v58 = vld [vmem:[%s6960_s2 + $0xc] sm:$0xf] }
  0xda   : > { %v3544_v5 = vmul.f32 -1.442695, %v895_v0  ;;  %v3562_v22 = vor.u32 %v4393_v58, %v3559_v59  ;;  %v3792_v58 = vld [vmem:[%s6960_s2 + $0xe0] sm:$0xf]  ;;  %v4454_v59 = vld [vmem:[%s6960_s2 + $0xec] sm:$0xf0] }
  0xdb   : > { %v3545_v9 = vmul.f32 -1.442695, %v896_v1  ;;  %1208 = vmatpush.bf16.msra.mxu3 %v3578_v45  ;;  %1183 = vmatpush.bf16.msra.mxu1 %v3554_v24 }
  0xdc   : > { %4656 = vpow2.f32 %v3544_v5  ;;  %1196 = vmatpush.bf16.msra.mxu2 %v3558_v61  ;;  %v3793_v61 = vor.u32 %v4454_v59, %v3792_v58  ;;  %v4436_v58 = vld [vmem:[%s6960_s2 + $0x64] sm:$0xf] }
  0xdd   : > { %4658 = vpow2.f32 %v3545_v9 }
  0xde   : > { %1484 = vmatpush.bf16.msrb.mxu0 %v3793_v61  ;;  %v3736_v61 = vld [vmem:[%s6960_s2 + $0x68] sm:$0xf] }
  0xdf   : > { %v878_v37 = vpop.f32.mrf.mxu2  ;;  %v854_v43 = vpop.f32.mrf.mxu0  ;;  %1209 = vmatpush.bf16.msra.mxu3 %v3562_v22  ;;  %v4455_v22 = vld [vmem:[%s6960_s2 + $0xf4] sm:$0xf0] }
  0xe0   : > { %v897_v40 = vadd.f32 %v878_v37, %v597_v20  ;;  %v891_v41 = vpop.f32.mrf.mxu3  ;;  %v867_v51 = vpop.f32.mrf.mxu1  ;;  %v642_v37 = vld [vmem:[#allocation5] sm:$0xff] }
  0xe1   : > { %v898_v7 = vadd.f32 %v891_v41, %v616_v4 }
  0xe2   : > { %v3546_v57 = vmul.f32 -1.442695, %v897_v40  ;;  %v4657_v60 = vpop.eup %4656 }
  0xe3   : > { %v4659_v62 = vpop.eup %4658  ;;  %v908_v0 = vadd.f32 1.0, %v4657_v60  ;;  %v4452_v60 = vld [vmem:[%s6960_s2 + $0xe4] sm:$0xf] }
  0xe4   : > { %4660 = vpow2.f32 %v3546_v57  ;;  %v909_v26 = vadd.f32 1.0, %v4659_v62  ;;  %v3794_v62 = vld [vmem:[%s6960_s2 + $0xf0] sm:$0xf0] }
  0xe5   : > { %4662 = vrcp.f32 %v908_v0  ;;  %v922_v14 = vand.u32 2147483648, %v908_v0  ;;  %v920_v19 = vand.u32 2147483647, %v908_v0  ;;  %vm916_vm3 = vweird.f32 %v908_v0 }
  0xe6   : > { %4664 = vrcp.f32 %v909_v26  ;;  %v937_v15 = vand.u32 2147483648, %v909_v26  ;;  %v935_v28 = vand.u32 2147483647, %v909_v26  ;;  %vm931_vm4 = vweird.f32 %v909_v26 }
  0xe7   : > { %v880_v1 = vpop.f32.mrf.mxu2  ;;  %v923_v34 = vor.u32 1.1754944e-38, %v922_v14  ;;  %vm921_vm7 = vcmp.eq.f32.partialorder %v920_v19, 8.507059e+37 }
  0xe8   : > { %v893_v2 = vpop.f32.mrf.mxu3  ;;  %v938_v36 = vor.u32 1.1754944e-38, %v937_v15  ;;  %vm936_vm8 = vcmp.eq.f32.partialorder %v935_v28, 8.507059e+37  ;;  %v4449_v15 = vld [vmem:[%s6960_s2 + $0xcc] sm:$0xf]  ;;  %v4446_v28 = vld [vmem:[%s6960_s2 + $0xac] sm:$0xf0] }
  0xe9   : > { %v4453_v2 = vld [vmem:[%s6960_s2 + $0xec] sm:$0xf] }
  0xea   : > { %v4661_v3 = vpop.eup %4660 }
  0xeb   : > { %v910_v5 = vadd.f32 1.0, %v4661_v3  ;;  %v4663_v6 = vpop.eup %4662  ;;  %v3802_v3 = vld [vmem:[%s6960_s2 + $0xf8] sm:$0xf0] }
  0xec   : > { %v4665_v8 = vpop.eup %4664  ;;  %v912_v9 = vmul.f32 %v4663_v6, %v908_v0  ;;  %vm917_vm1 = vweird.f32 %v4663_v6  ;;  %v3800_v0 = vld [vmem:[%s6960_s2 + $0xe8] sm:$0xf]  ;;  %v3805_v4 = vor.u32 %v4453_v2, %v3802_v3 }
  0xed   : > { %4666 = vrcp.f32 %v910_v5  ;;  %v927_v11 = vmul.f32 %v4665_v8, %v909_v26  ;;  %vm932_vm2 = vweird.f32 %v4665_v8  ;;  %vm918_vm5 = vmor %vm916_vm3, %vm917_vm1  ;;  %v952_v48 = vand.u32 2147483648, %v910_v5 }
  0xee   : > { %v913_v12 = vsub.f32 1.0, %v912_v9  ;;  %4668 = vtanh.f32 %v898_v7  ;;  %vm933_vm6 = vmor %vm931_vm4, %vm932_vm2  ;;  %vm946_vm10 = vweird.f32 %v910_v5  ;;  %v950_v51 = vand.u32 2147483647, %v910_v5  ;;  %v4448_v7 = vld [vmem:[%s6960_s2 + $0xc4] sm:$0xf]  ;;  %1523 = vmatpush.bf16.msrb.mxu3 %v3805_v4 }
  0xef   : > { %v928_v13 = vsub.f32 1.0, %v927_v11  ;;  %v953_v54 = vor.u32 1.1754944e-38, %v952_v48  ;;  %v3797_v26 = vor.u32 %v4452_v60, %v3794_v62  ;;  %v3801_v1 = vor.u32 %v4455_v22, %v3800_v0  ;;  %v3778_v9 = vld [vmem:[%s6960_s2 + $0xd0] sm:$0xf0]  ;;  %v3784_v11 = vld [vmem:[%s6960_s2 + $0xc8] sm:$0xf] }
  0xf0   : > { %v914_v16 = vmul.f32 %v4663_v6, %v913_v12  ;;  %vm951_vm12 = vcmp.eq.f32.partialorder %v950_v51, 8.507059e+37  ;;  %v4451_v12 = vld [vmem:[%s6960_s2 + $0xd4] sm:$0xf0]  ;;  %v3730_v60 = vld [vmem:[%s6960_s2 + $0x70] sm:$0xf0] }
  0xf1   : > { %v929_v20 = vmul.f32 %v4665_v8, %v928_v13  ;;  %1497 = vmatpush.bf16.msrb.mxu1 %v3797_v26  ;;  %1510 = vmatpush.bf16.msrb.mxu2 %v3801_v1  ;;  %v3781_v13 = vor.u32 %v4448_v7, %v3778_v9  ;;  %v3785_v14 = vor.u32 %v4451_v12, %v3784_v11  ;;  %v4439_v62 = vld [vmem:[%s6960_s2 + $0x74] sm:$0xf0]  ;;  %v4437_v26 = vld [vmem:[%s6960_s2 + $0x6c] sm:$0xf]  ;;  %v3738_v1 = vld [vmem:[%s6960_s2 + $0x78] sm:$0xf0] }
  0xf2   : > { %v915_v27 = vadd.f32 %v4663_v6, %v914_v16  ;;  %v3786_v16 = vld [vmem:[%s6960_s2 + $0xd8] sm:$0xf0]  ;;  %v3733_v0 = vor.u32 %v4436_v58, %v3730_v60  ;;  %v3737_v22 = vor.u32 %v4439_v62, %v3736_v61  ;;  %v3741_v4 = vor.u32 %v4437_v26, %v3738_v1  ;;  %v3712_v7 = vld [vmem:[%s6960_s2 + $0x40] sm:$0xf]  ;;  %v4432_v9 = vld [vmem:[%s6960_s2 + $0x44] sm:$0xf] }
  0xf3   : > { %v4667_v30 = vpop.eup %4666  ;;  %v930_v35 = vadd.f32 %v4665_v8, %v929_v20  ;;  %v3789_v19 = vor.u32 %v4449_v15, %v3786_v16  ;;  %v3760_v20 = vld [vmem:[%s6960_s2 + $0xa0] sm:$0xf]  ;;  %v4435_v12 = vld [vmem:[%s6960_s2 + $0x54] sm:$0xf0]  ;;  %v3690_v60 = vld [vmem:[%s6960_s2 + $0x18] sm:$0xf0] }
  0xf4   : > { %v942_v33 = vmul.f32 %v4667_v30, %v910_v5  ;;  %v919_v38 = vsel %vm918_vm5, %v4663_v6, %v915_v27  ;;  %v4669_v25 = vpop.eup %4668  ;;  %vm947_vm9 = vweird.f32 %v4667_v30  ;;  %v3776_v5 = vld [vmem:[%s6960_s2 + $0xc0] sm:$0xf]  ;;  %v4450_v6 = vld [vmem:[%s6960_s2 + $0xcc] sm:$0xf0]  ;;  %v3761_v27 = vor.u32 %v4446_v28, %v3760_v20  ;;  %v3722_v20 = vld [vmem:[%s6960_s2 + $0x58] sm:$0xf0] }
  0xf5   : > { %v924_v39 = vsel %vm921_vm7, %v923_v34, %v919_v38  ;;  %v934_v40 = vsel %vm933_vm6, %v4665_v8, %v930_v35  ;;  %vm948_vm11 = vmor %vm946_vm10, %vm947_vm9  ;;  %v3777_v8 = vor.u32 %v4450_v6, %v3776_v5  ;;  %1498 = vmatpush.bf16.msrb.mxu1 %v3781_v13  ;;  %1511 = vmatpush.bf16.msrb.mxu2 %v3785_v14  ;;  %v3768_v34 = vld [vmem:[%s6960_s2 + $0xa8] sm:$0xf]  ;;  %v4447_v35 = vld [vmem:[%s6960_s2 + $0xb4] sm:$0xf0] }
  0xf6   : > { %v943_v32 = vsub.f32 1.0, %v942_v33  ;;  %v939_v41 = vsel %vm936_vm8, %v938_v36, %v934_v40  ;;  %v958_v43 = vmul.f32 %v4669_v25, %v924_v39  ;;  %1524 = vmatpush.bf16.msrb.mxu3 %v3789_v19  ;;  %v3762_v33 = vld [vmem:[%s6960_s2 + $0xb0] sm:$0xf0]  ;;  %v4445_v38 = vld [vmem:[%s6960_s2 + $0xac] sm:$0xf] }
  0xf7   : > { %v957_v45 = vmul.f32 %v939_v41, %v642_v37  ;;  %1485 = vmatpush.bf16.msrb.mxu0 %v3777_v8  ;;  %v3769_v37 = vor.u32 %v4447_v35, %v3768_v34  ;;  %v3770_v25 = vld [vmem:[%s6960_s2 + $0xb8] sm:$0xf0]  ;;  %v3744_v39 = vld [vmem:[%s6960_s2 + $0x80] sm:$0xf]  ;;  %v4442_v40 = vld [vmem:[%s6960_s2 + $0x8c] sm:$0xf0] }
  0xf8   : > { %v944_v44 = vmul.f32 %v4667_v30, %v943_v32  ;;  %v3773_v32 = vor.u32 %v4445_v38, %v3770_v25  ;;  %v4440_v41 = vld [vmem:[%s6960_s2 + $0x84] sm:$0xf]  ;;  %v4434_v8 = vld [vmem:[%s6960_s2 + $0x4c] sm:$0xf0]  ;;  %v4433_v19 = vld [vmem:[%s6960_s2 + $0x4c] sm:$0xf] }
  0xf9   : > { %v5582_v46 = vadd.f32 %v958_v43, %v957_v45  ;;  %1512 = vmatpush.bf16.msrb.mxu2 %v3769_v37  ;;  %v3745_v43 = vor.u32 %v4442_v40, %v3744_v39  ;;  %v3752_v45 = vld [vmem:[%s6960_s2 + $0x88] sm:$0xf]  ;;  %v3713_v11 = vor.u32 %v4434_v8, %v3712_v7  ;;  %v3696_v28 = vld [vmem:[%s6960_s2 + $0x20] sm:$0xf]  ;;  %v4428_v34 = vld [vmem:[%s6960_s2 + $0x24] sm:$0xf] }
  0xfa   : > { %v945_v47 = vadd.f32 %v4667_v30, %v944_v44  ;;  %1525 = vmatpush.bf16.msrb.mxu3 %v3773_v32  ;;  %v3746_v44 = vld [vmem:[%s6960_s2 + $0x90] sm:$0xf0]  ;;  %v4431_v38 = vld [vmem:[%s6960_s2 + $0x34] sm:$0xf0]  ;;  %v4429_v25 = vld [vmem:[%s6960_s2 + $0x2c] sm:$0xf] }
  0xfb   : > { %4670 = vtanh.f32 %v5582_v46  ;;  %1486 = vmatpush.bf16.msrb.mxu0 %v3761_v27  ;;  %v3749_v48 = vor.u32 %v4440_v41, %v3746_v44  ;;  %v3725_v27 = vor.u32 %v4433_v19, %v3722_v20  ;;  %v3698_v35 = vld [vmem:[%s6960_s2 + $0x30] sm:$0xf0]  ;;  %v3706_v32 = vld [vmem:[%s6960_s2 + $0x38] sm:$0xf0]  ;;  %v3680_v44 = vld [vmem:[%s6960_s2] sm:$0xf] }
  0xfc   : > { %v949_v52 = vsel %vm948_vm11, %v4667_v30, %v945_v47  ;;  %v4444_v30 = vld [vmem:[%s6960_s2 + $0xa4] sm:$0xf]  ;;  %v4443_v47 = vld [vmem:[%s6960_s2 + $0x94] sm:$0xf0]  ;;  %v3701_v37 = vor.u32 %v4428_v34, %v3698_v35 }
  0xfd   : > { %v954_v56 = vsel %vm951_vm12, %v953_v54, %v949_v52  ;;  %v3765_v36 = vor.u32 %v4444_v30, %v3762_v33  ;;  %v3753_v51 = vor.u32 %v4443_v47, %v3752_v45  ;;  %v4441_v52 = vld [vmem:[%s6960_s2 + $0x8c] sm:$0xf]  ;;  %v3754_v54 = vld [vmem:[%s6960_s2 + $0x98] sm:$0xf0]  ;;  %v4430_v30 = vld [vmem:[%s6960_s2 + $0x2c] sm:$0xf0] }
  0xfe   : > { %v3697_v33 = vor.u32 %v4430_v30, %v3696_v28  ;;  %v4426_v45 = vld [vmem:[%s6960_s2 + $0xc] sm:$0xf0]  ;;  %v4424_v47 = vld [vmem:[%s6960_s2 + $0x4] sm:$0xf] }
  0xff   : > { %1499 = vmatpush.bf16.msrb.mxu1 %v3765_v36  ;;  %1487 = vmatpush.bf16.msrb.mxu0 %v3745_v43  ;;  %v3704_v36 = vld [vmem:[%s6960_s2 + $0x28] sm:$0xf]  ;;  %v3709_v43 = vor.u32 %v4429_v25, %v3706_v32 }
 0x100   : > { %1513 = vmatpush.bf16.msrb.mxu2 %v3753_v51  ;;  %v3705_v41 = vor.u32 %v4431_v38, %v3704_v36 }
 0x101   : > { %v4671_v55 = vpop.eup %4670 }
 0x102   : > { %v5585_v57 = vmul.f32 %v4671_v55, %v954_v56  ;;  %v3757_v55 = vor.u32 %v4441_v52, %v3754_v54  ;;  %v3728_v56 = vld [vmem:[%s6960_s2 + $0x60] sm:$0xf]  ;;  %v3681_v54 = vor.u32 %v4426_v45, %v3680_v44 }
 0x103   : > { %1500 = vmatpush.bf16.msrb.mxu1 %v3749_v48 }
 0x104   : > { %v970_v24 = vpack.c.bf16 %v5585_v57, %v5585_v57  ;;  %1526 = vmatpush.bf16.msrb.mxu3 %v3757_v55  ;;  %1514 = vmatpush.bf16.msrb.mxu2 %v3737_v22  ;;  %v3682_v55 = vld [vmem:[%s6960_s2 + $0x10] sm:$0xf0] }
 0x105   : > { %v3685_v58 = vor.u32 %v4424_v47, %v3682_v55  ;;  %v3923_v55 = vld [vmem:[%s6960_s2 + $0xe0] sm:$0xf] }
 0x106   : > { %1171 = vmatmul.bf16.vlgmr.msra.gmra.mxu0 %v970_v24  ;;  %1184 = vmatmul.bf16.vlgmr.msra.gmra.mxu1 %v970_v24 }
 0x107   : > { %1197 = vmatmul.bf16.vlgmr.msra.gmra.mxu2 %v970_v24  ;;  %1210 = vmatmul.bf16.vlgmr.msra.gmra.mxu3 %v970_v24  ;;  %v4438_v24 = vld [vmem:[%s6960_s2 + $0x6c] sm:$0xf0] }
 0x108   : > { %v3729_v59 = vor.u32 %v4438_v24, %v3728_v56  ;;  %1501 = vmatpush.bf16.msrb.mxu1 %v3733_v0  ;;  %1527 = vmatpush.bf16.msrb.mxu3 %v3741_v4  ;;  %v3688_v56 = vld [vmem:[%s6960_s2 + $0x8] sm:$0xf]  ;;  %v4427_v24 = vld [vmem:[%s6960_s2 + $0x14] sm:$0xf0] }
 0x10a   : > { %1488 = vmatpush.bf16.msrb.mxu0 %v3729_v59  ;;  %v4425_v59 = vld [vmem:[%s6960_s2 + $0xc] sm:$0xf] }
 0x10b   : > { %v3693_v0 = vor.u32 %v4425_v59, %v3690_v60  ;;  %v3931_v59 = vld [vmem:[%s6960_s2 + $0xe8] sm:$0xf]  ;;  %v4487_v60 = vld [vmem:[%s6960_s2 + $0xf4] sm:$0xf0] }
 0x10c   : > { %1528 = vmatpush.bf16.msrb.mxu3 %v3725_v27 }
 0x10e   : > { %1489 = vmatpush.bf16.msrb.mxu0 %v3713_v11 }
 0x110   : > { %1529 = vmatpush.bf16.msrb.mxu3 %v3709_v43 }
 0x112   : > { %1490 = vmatpush.bf16.msrb.mxu0 %v3697_v33 }
 0x114   : > { %1530 = vmatpush.bf16.msrb.mxu3 %v3693_v0  ;;  %v4485_v0 = vld [vmem:[%s6960_s2 + $0xec] sm:$0xf] }
 0x116   : > { %1491 = vmatpush.bf16.msrb.mxu0 %v3681_v54 }
 0x183   : > { %v1172_v2 = vpop.f32.mrf.mxu0  ;;  %v1185_v3 = vpop.f32.mrf.mxu1 }
 0x184   : > { %v1215_v5 = vadd.f32 %v1172_v2, %v5343_v29  ;;  %v1216_v6 = vadd.f32 %v1185_v3, %v5346_v31  ;;  %v3714_v29 = vld [vmem:[%s6960_s2 + $0x50] sm:$0xf0]  ;;  %v3720_v31 = vld [vmem:[%s6960_s2 + $0x48] sm:$0xf] }
 0x185   : > { %v3717_v15 = vor.u32 %v4432_v9, %v3714_v29  ;;  %v3721_v16 = vor.u32 %v4435_v12, %v3720_v31 }
 0x186   : > { %v3675_v13 = vmul.f32 -1.442695, %v1215_v5  ;;  %v3676_v14 = vmul.f32 -1.442695, %v1216_v6 }
 0x187   : > { %1502 = vmatpush.bf16.msrb.mxu1 %v3717_v15  ;;  %1515 = vmatpush.bf16.msrb.mxu2 %v3721_v16 }
 0x188   : > { %4672 = vpow2.f32 %v3675_v13 }
 0x189   : > { %4674 = vpow2.f32 %v3676_v14 }
 0x18a   : > { %v1198_v39 = vpop.f32.mrf.mxu2  ;;  %v1211_v40 = vpop.f32.mrf.mxu3 }
 0x18b   : > { %v1217_v48 = vadd.f32 %v1198_v39, %v5371_v42  ;;  %v1174_v51 = vpop.f32.mrf.mxu0  ;;  %v1187_v52 = vpop.f32.mrf.mxu1  ;;  %1503 = vmatpush.bf16.msrb.mxu1 %v3701_v37  ;;  %1516 = vmatpush.bf16.msrb.mxu2 %v3705_v41  ;;  %v3689_v42 = vor.u32 %v4427_v24, %v3688_v56  ;;  %v1218_v7 = vadd.f32 %v1211_v40, %v5380_v49  ;;  %v4486_v56 = vld [vmem:[%s6960_s2 + $0xec] sm:$0xf0]  ;;  %v4484_v24 = vld [vmem:[%s6960_s2 + $0xe4] sm:$0xf] }
 0x18d   : > { %v3677_v61 = vmul.f32 -1.442695, %v1217_v48 }
 0x18e   : > { %v4673_v62 = vpop.eup %4672 }
 0x18f   : > { %v4675_v22 = vpop.eup %4674  ;;  %v1228_v26 = vadd.f32 1.0, %v4673_v62  ;;  %4676 = vpow2.f32 %v3677_v61  ;;  %1504 = vmatpush.bf16.msrb.mxu1 %v3685_v58  ;;  %1517 = vmatpush.bf16.msrb.mxu2 %v3689_v42  ;;  %v3924_v58 = vor.u32 %v4486_v56, %v3923_v55  ;;  %v3925_v42 = vld [vmem:[%s6960_s2 + $0xf0] sm:$0xf0]  ;;  %v3932_v62 = vor.u32 %v4487_v60, %v3931_v59  ;;  %v3867_v55 = vld [vmem:[%s6960_s2 + $0x68] sm:$0xf] }
 0x190   : > { %v1229_v1 = vadd.f32 1.0, %v4675_v22  ;;  %v3928_v61 = vor.u32 %v4484_v24, %v3925_v42  ;;  %v3933_v22 = vld [vmem:[%s6960_s2 + $0xf8] sm:$0xf0]  ;;  %v4471_v56 = vld [vmem:[%s6960_s2 + $0x74] sm:$0xf0] }
 0x191   : > { %4678 = vrcp.f32 %v1228_v26  ;;  %v1242_v12 = vand.u32 2147483648, %v1228_v26  ;;  %v1240_v15 = vand.u32 2147483647, %v1228_v26  ;;  %vm1236_vm15 = vweird.f32 %v1228_v26  ;;  %1805 = vmatpush.bf16.msra.mxu0 %v3924_v58  ;;  %v4469_v42 = vld [vmem:[%s6960_s2 + $0x6c] sm:$0xf] }
 0x192   : > { %4680 = vrcp.f32 %v1229_v1  ;;  %v1200_v2 = vpop.f32.mrf.mxu2  ;;  %v1213_v3 = vpop.f32.mrf.mxu3  ;;  %v1257_v13 = vand.u32 2147483648, %v1229_v1  ;;  %v1255_v19 = vand.u32 2147483647, %v1229_v1  ;;  %vm1251_vm0 = vweird.f32 %v1229_v1  ;;  %v3869_v59 = vld [vmem:[%s6960_s2 + $0x78] sm:$0xf0] }
 0x193   : > { %v1243_v30 = vor.u32 1.1754944e-38, %v1242_v12  ;;  %vm1241_vm3 = vcmp.eq.f32.partialorder %v1240_v15, 8.507059e+37  ;;  %1818 = vmatpush.bf16.msra.mxu1 %v3928_v61  ;;  %1831 = vmatpush.bf16.msra.mxu2 %v3932_v62  ;;  %v4482_v2 = vld [vmem:[%s6960_s2 + $0xcc] sm:$0xf0]  ;;  %v4480_v3 = vld [vmem:[%s6960_s2 + $0xc4] sm:$0xf]  ;;  %v3868_v58 = vor.u32 %v4471_v56, %v3867_v55  ;;  %v3872_v60 = vor.u32 %v4469_v42, %v3869_v59 }
 0x194   : > { %v1258_v33 = vor.u32 1.1754944e-38, %v1257_v13  ;;  %vm1256_vm4 = vcmp.eq.f32.partialorder %v1255_v19, 8.507059e+37  ;;  %v3891_v12 = vld [vmem:[%s6960_s2 + $0xa0] sm:$0xf]  ;;  %v4478_v13 = vld [vmem:[%s6960_s2 + $0xac] sm:$0xf0] }
 0x195   : > { %v4677_v4 = vpop.eup %4676  ;;  %v3892_v15 = vor.u32 %v4478_v13, %v3891_v12  ;;  %v3899_v19 = vld [vmem:[%s6960_s2 + $0xa8] sm:$0xf]  ;;  %v3843_v61 = vld [vmem:[%s6960_s2 + $0x40] sm:$0xf]  ;;  %v4466_v62 = vld [vmem:[%s6960_s2 + $0x4c] sm:$0xf0] }
 0x196   : > { %v1230_v5 = vadd.f32 1.0, %v4677_v4  ;;  %v3835_v12 = vld [vmem:[%s6960_s2 + $0x28] sm:$0xf]  ;;  %v4463_v13 = vld [vmem:[%s6960_s2 + $0x34] sm:$0xf0] }
 0x197   : > { %v4679_v6 = vpop.eup %4678  ;;  %v4517_v55 = vld [vmem:[%s6962_s4 + $0xec] sm:$0xf]  ;;  %v4064_v42 = vld [vmem:[%s6962_s4 + $0xf8] sm:$0xf0]  ;;  %v4038_v59 = vld [vmem:[%s6962_s4 + $0xc0] sm:$0xf] }
 0x198   : > { %v4681_v8 = vpop.eup %4680  ;;  %v1232_v9 = vmul.f32 %v4679_v6, %v1228_v26  ;;  %4682 = vrcp.f32 %v1230_v5  ;;  %vm1237_vm13 = vweird.f32 %v4679_v6  ;;  %v1272_v44 = vand.u32 2147483648, %v1230_v5 }
 0x199   : > { %v1247_v11 = vmul.f32 %v4681_v8, %v1229_v1  ;;  %4684 = vtanh.f32 %v1218_v7  ;;  %vm1252_vm14 = vweird.f32 %v4681_v8  ;;  %vm1238_vm1 = vmor %vm1236_vm15, %vm1237_vm13  ;;  %vm1266_vm6 = vweird.f32 %v1230_v5  ;;  %v3907_v1 = vld [vmem:[%s6960_s2 + $0xc0] sm:$0xf]  ;;  %v4483_v7 = vld [vmem:[%s6960_s2 + $0xd4] sm:$0xf0] }
 0x19a   : > { %v1233_v29 = vsub.f32 1.0, %v1232_v9  ;;  %vm1253_vm2 = vmor %vm1251_vm0, %vm1252_vm14  ;;  %v1270_v45 = vand.u32 2147483647, %v1230_v5  ;;  %v1273_v48 = vor.u32 1.1754944e-38, %v1272_v44  ;;  %v3936_v26 = vor.u32 %v4485_v0, %v3933_v22  ;;  %v3885_v44 = vld [vmem:[%s6960_s2 + $0x98] sm:$0xf0] }
 0x19b   : > { %v1248_v31 = vsub.f32 1.0, %v1247_v11  ;;  %v3908_v4 = vor.u32 %v4482_v2, %v3907_v1  ;;  %v4481_v11 = vld [vmem:[%s6960_s2 + $0xcc] sm:$0xf]  ;;  %v4464_v0 = vld [vmem:[%s6960_s2 + $0x44] sm:$0xf]  ;;  %v3844_v22 = vor.u32 %v4466_v62, %v3843_v61  ;;  %v4067_v61 = vor.u32 %v4517_v55, %v4064_v42 }
 0x19c   : > { %v1234_v14 = vmul.f32 %v4679_v6, %v1233_v29  ;;  %vm1271_vm8 = vcmp.eq.f32.partialorder %v1270_v45, 8.507059e+37  ;;  %1844 = vmatpush.bf16.msra.mxu3 %v3936_v26  ;;  %v3917_v29 = vld [vmem:[%s6960_s2 + $0xd8] sm:$0xf0]  ;;  %v3845_v26 = vld [vmem:[%s6960_s2 + $0x50] sm:$0xf0] }
 0x19d   : > { %v1249_v16 = vmul.f32 %v4681_v8, %v1248_v31  ;;  %1806 = vmatpush.bf16.msra.mxu0 %v3908_v4  ;;  %v3920_v31 = vor.u32 %v4481_v11, %v3917_v29  ;;  %v3851_v1 = vld [vmem:[%s6960_s2 + $0x48] sm:$0xf]  ;;  %v4467_v2 = vld [vmem:[%s6960_s2 + $0x54] sm:$0xf0]  ;;  %v4460_v11 = vld [vmem:[%s6960_s2 + $0x24] sm:$0xf] }
 0x19e   : > { %v4683_v20 = vpop.eup %4682  ;;  %v1235_v28 = vadd.f32 %v4679_v6, %v1234_v14  ;;  %v4476_v14 = vld [vmem:[%s6960_s2 + $0xa4] sm:$0xf]  ;;  %v3852_v4 = vor.u32 %v4467_v2, %v3851_v1  ;;  %v4040_v62 = vld [vmem:[%s6962_s4 + $0xd0] sm:$0xf0]  ;;  %v4515_v2 = vld [vmem:[%s6962_s4 + $0xd4] sm:$0xf0] }
 0x19f   : > { %v1262_v49 = vmul.f32 %v4683_v20, %v1230_v5  ;;  %v1250_v27 = vadd.f32 %v4681_v8, %v1249_v16  ;;  %v4685_v35 = vpop.eup %4684  ;;  %vm1267_vm5 = vweird.f32 %v4683_v20  ;;  %v3909_v5 = vld [vmem:[%s6960_s2 + $0xd0] sm:$0xf0] }
 0x1a0   : > { %v1239_v34 = vsel %vm1238_vm1, %v4679_v6, %v1235_v28  ;;  %vm1268_vm7 = vmor %vm1266_vm6, %vm1267_vm5  ;;  %v3915_v6 = vld [vmem:[%s6960_s2 + $0xc8] sm:$0xf]  ;;  %1845 = vmatpush.bf16.msra.mxu3 %v3920_v31  ;;  %v3893_v16 = vld [vmem:[%s6960_s2 + $0xb0] sm:$0xf0] }
 0x1a1   : > { %v1263_v36 = vsub.f32 1.0, %v1262_v49  ;;  %v1244_v37 = vsel %vm1241_vm3, %v1243_v30, %v1239_v34  ;;  %v1254_v38 = vsel %vm1253_vm2, %v4681_v8, %v1250_v27  ;;  %v3912_v8 = vor.u32 %v4480_v3, %v3909_v5  ;;  %v4477_v30 = vld [vmem:[%s6960_s2 + $0xac] sm:$0xf]  ;;  %v3901_v27 = vld [vmem:[%s6960_s2 + $0xb8] sm:$0xf0]  ;;  %1807 = vmatpush.bf16.msra.mxu0 %v3892_v15 }
 0x1a2   : > { %v1259_v25 = vsel %vm1256_vm4, %v1258_v33, %v1254_v38  ;;  %v1278_v32 = vmul.f32 %v4685_v35, %v1244_v37  ;;  %v3916_v9 = vor.u32 %v4483_v7, %v3915_v6  ;;  %v3896_v28 = vor.u32 %v4476_v14, %v3893_v16  ;;  %v3875_v34 = vld [vmem:[%s6960_s2 + $0x80] sm:$0xf]  ;;  %v4474_v35 = vld [vmem:[%s6960_s2 + $0x8c] sm:$0xf0]  ;;  %v3877_v38 = vld [vmem:[%s6960_s2 + $0x90] sm:$0xf0] }
 0x1a3   : > { %v1264_v39 = vmul.f32 %v4683_v20, %v1263_v36  ;;  %v1277_v40 = vmul.f32 %v1259_v25, %v5582_v46  ;;  %1819 = vmatpush.bf16.msra.mxu1 %v3912_v8  ;;  %v3904_v33 = vor.u32 %v4477_v30, %v3901_v27  ;;  %v4472_v36 = vld [vmem:[%s6960_s2 + $0x84] sm:$0xf]  ;;  %v3876_v37 = vor.u32 %v4474_v35, %v3875_v34  ;;  %v3883_v25 = vld [vmem:[%s6960_s2 + $0x88] sm:$0xf]  ;;  %v4465_v5 = vld [vmem:[%s6960_s2 + $0x4c] sm:$0xf] }
 0x1a4   : > { %1832 = vmatpush.bf16.msra.mxu2 %v3916_v9  ;;  %v3848_v3 = vor.u32 %v4464_v0, %v3845_v26  ;;  %v3853_v6 = vld [vmem:[%s6960_s2 + $0x58] sm:$0xf0]  ;;  %v3827_v8 = vld [vmem:[%s6960_s2 + $0x20] sm:$0xf]  ;;  %v4462_v9 = vld [vmem:[%s6960_s2 + $0x2c] sm:$0xf0]  ;;  %v3836_v15 = vor.u32 %v4463_v13, %v3835_v12 }
 0x1a5   : > { %v5786_v41 = vadd.f32 %v1278_v32, %v1277_v40  ;;  %v1265_v43 = vadd.f32 %v4683_v20, %v1264_v39  ;;  %1846 = vmatpush.bf16.msra.mxu3 %v3904_v33  ;;  %v4475_v32 = vld [vmem:[%s6960_s2 + $0x94] sm:$0xf0]  ;;  %v3880_v39 = vor.u32 %v4472_v36, %v3877_v38  ;;  %1808 = vmatpush.bf16.msra.mxu0 %v3876_v37  ;;  %v3829_v31 = vld [vmem:[%s6960_s2 + $0x30] sm:$0xf0]  ;;  %v4461_v16 = vld [vmem:[%s6960_s2 + $0x2c] sm:$0xf] }
 0x1a6   : > { %v3884_v40 = vor.u32 %v4475_v32, %v3883_v25  ;;  %v3856_v7 = vor.u32 %v4465_v5, %v3853_v6  ;;  %v3828_v29 = vor.u32 %v4462_v9, %v3827_v8  ;;  %v3832_v14 = vor.u32 %v4460_v11, %v3829_v31  ;;  %v4456_v30 = vld [vmem:[%s6960_s2 + $0x4] sm:$0xf]  ;;  %v3813_v33 = vld [vmem:[%s6960_s2 + $0x10] sm:$0xf0]  ;;  %v3819_v34 = vld [vmem:[%s6960_s2 + $0x8] sm:$0xf] }
 0x1a7   : > { %4686 = vtanh.f32 %v5786_v41  ;;  %v1269_v47 = vsel %vm1268_vm7, %v4683_v20, %v1265_v43  ;;  %v4479_v20 = vld [vmem:[%s6960_s2 + $0xb4] sm:$0xf0]  ;;  %1820 = vmatpush.bf16.msra.mxu1 %v3896_v28  ;;  %v4473_v43 = vld [vmem:[%s6960_s2 + $0x8c] sm:$0xf]  ;;  %v3811_v28 = vld [vmem:[%s6960_s2] sm:$0xf]  ;;  %v3816_v36 = vor.u32 %v4456_v30, %v3813_v33 }
 0x1a8   : > { %v1274_v52 = vsel %vm1271_vm8, %v1273_v48, %v1269_v47  ;;  %v3900_v49 = vor.u32 %v4479_v20, %v3899_v19  ;;  %v3888_v45 = vor.u32 %v4473_v43, %v3885_v44  ;;  %v3859_v47 = vld [vmem:[%s6960_s2 + $0x60] sm:$0xf]  ;;  %v4470_v48 = vld [vmem:[%s6960_s2 + $0x6c] sm:$0xf0]  ;;  %v3837_v19 = vld [vmem:[%s6960_s2 + $0x38] sm:$0xf0] }
 0x1a9   : > { %v3840_v20 = vor.u32 %v4461_v16, %v3837_v19  ;;  %v4459_v35 = vld [vmem:[%s6960_s2 + $0x14] sm:$0xf0]  ;;  %v4457_v38 = vld [vmem:[%s6960_s2 + $0xc] sm:$0xf]  ;;  %v3821_v25 = vld [vmem:[%s6960_s2 + $0x18] sm:$0xf0] }
 0x1aa   : > { %1833 = vmatpush.bf16.msra.mxu2 %v3900_v49  ;;  %1847 = vmatpush.bf16.msra.mxu3 %v3888_v45  ;;  %v4458_v49 = vld [vmem:[%s6960_s2 + $0xc] sm:$0xf0]  ;;  %v3820_v37 = vor.u32 %v4459_v35, %v3819_v34  ;;  %v4054_v32 = vld [vmem:[%s6962_s4 + $0xe0] sm:$0xf]  ;;  %v4516_v43 = vld [vmem:[%s6962_s4 + $0xe4] sm:$0xf] }
 0x1ab   : > { %1821 = vmatpush.bf16.msra.mxu1 %v3880_v39  ;;  %v3812_v27 = vor.u32 %v4458_v49, %v3811_v28  ;;  %v3824_v39 = vor.u32 %v4457_v38, %v3821_v25  ;;  %v4056_v44 = vld [vmem:[%s6962_s4 + $0xf0] sm:$0xf0]  ;;  %v4046_v0 = vld [vmem:[%s6962_s4 + $0xc8] sm:$0xf]  ;;  %v4048_v5 = vld [vmem:[%s6962_s4 + $0xd8] sm:$0xf0] }
 0x1ac   : > { %v4022_v6 = vld [vmem:[%s6962_s4 + $0xa0] sm:$0xf]  ;;  %v4510_v8 = vld [vmem:[%s6962_s4 + $0xac] sm:$0xf0]  ;;  %v4508_v9 = vld [vmem:[%s6962_s4 + $0xa4] sm:$0xf] }
 0x1ad   : > { %v4687_v51 = vpop.eup %4686  ;;  %v4024_v11 = vld [vmem:[%s6962_s4 + $0xb0] sm:$0xf0]  ;;  %v4030_v12 = vld [vmem:[%s6962_s4 + $0xa8] sm:$0xf]  ;;  %v4511_v13 = vld [vmem:[%s6962_s4 + $0xb4] sm:$0xf0] }
 0x1ae   : > { %v5789_v54 = vmul.f32 %v4687_v51, %v1274_v52  ;;  %1834 = vmatpush.bf16.msra.mxu2 %v3884_v40  ;;  %v4468_v51 = vld [vmem:[%s6960_s2 + $0x64] sm:$0xf]  ;;  %v3860_v52 = vor.u32 %v4470_v48, %v3859_v47  ;;  %1848 = vmatpush.bf16.msra.mxu3 %v3872_v60  ;;  %v4518_v40 = vld [vmem:[%s6962_s4 + $0xec] sm:$0xf0]  ;;  %v4027_v31 = vor.u32 %v4508_v9, %v4024_v11  ;;  %v4006_v28 = vld [vmem:[%s6962_s4 + $0x80] sm:$0xf] }
 0x1af   : > { %v4055_v48 = vor.u32 %v4518_v40, %v4054_v32  ;;  %v4514_v60 = vld [vmem:[%s6962_s4 + $0xcc] sm:$0xf0]  ;;  %v4031_v19 = vor.u32 %v4511_v13, %v4030_v12  ;;  %v4504_v35 = vld [vmem:[%s6962_s4 + $0x84] sm:$0xf]  ;;  %v4505_v38 = vld [vmem:[%s6962_s4 + $0x8c] sm:$0xf] }
 0x1b0   : > { %v1291_v46 = vpack.c.bf16 %v5789_v54, %v5789_v54  ;;  %1809 = vmatpush.bf16.msra.mxu0 %v3860_v52  ;;  %v4062_v52 = vld [vmem:[%s6962_s4 + $0xe8] sm:$0xf]  ;;  %v4506_v49 = vld [vmem:[%s6962_s4 + $0x8c] sm:$0xf0]  ;;  %v4016_v25 = vld [vmem:[%s6962_s4 + $0x98] sm:$0xf0] }
 0x1b1   : > { %v3992_v42 = vld [vmem:[%s6962_s4 + $0x70] sm:$0xf0]  ;;  %v4499_v9 = vld [vmem:[%s6962_s4 + $0x54] sm:$0xf0]  ;;  %v3984_v12 = vld [vmem:[%s6962_s4 + $0x58] sm:$0xf0] }
 0x1b2   : > { %1492 = vmatmul.bf16.vlgmr.msrb.gmra.mxu0 %v1291_v46  ;;  %1505 = vmatmul.bf16.vlgmr.msrb.gmra.mxu1 %v1291_v46  ;;  %v3958_v13 = vld [vmem:[%s6962_s4 + $0x20] sm:$0xf] }
 0x1b3   : > { %1518 = vmatmul.bf16.vlgmr.msrb.gmra.mxu2 %v1291_v46  ;;  %1531 = vmatmul.bf16.vlgmr.msrb.gmra.mxu3 %v1291_v46  ;;  %v3861_v46 = vld [vmem:[%s6960_s2 + $0x70] sm:$0xf0] }
 0x1b4   : > { %v3864_v24 = vor.u32 %v4468_v51, %v3861_v46  ;;  %1835 = vmatpush.bf16.msra.mxu2 %v3868_v58  ;;  %1810 = vmatpush.bf16.msra.mxu0 %v3844_v22  ;;  %v4059_v51 = vor.u32 %v4516_v43, %v4056_v44  ;;  %v4519_v46 = vld [vmem:[%s6962_s4 + $0xf4] sm:$0xf0] }
 0x1b5   : > { %1849 = vmatpush.bf16.msra.mxu3 %v3856_v7  ;;  %v4063_v58 = vor.u32 %v4519_v46, %v4062_v52  ;;  %v3990_v52 = vld [vmem:[%s6962_s4 + $0x60] sm:$0xf] }
 0x1b6   : > { %1822 = vmatpush.bf16.msra.mxu1 %v3864_v24 }
 0x1b8   : > { %1836 = vmatpush.bf16.msra.mxu2 %v3852_v4  ;;  %1811 = vmatpush.bf16.msra.mxu0 %v3828_v29  ;;  %v4513_v4 = vld [vmem:[%s6962_s4 + $0xcc] sm:$0xf]  ;;  %v4023_v29 = vor.u32 %v4510_v8, %v4022_v6  ;;  %v3982_v8 = vld [vmem:[%s6962_s4 + $0x48] sm:$0xf] }
 0x1b9   : > { %1850 = vmatpush.bf16.msra.mxu3 %v3840_v20  ;;  %v4051_v7 = vor.u32 %v4513_v4, %v4048_v5  ;;  %v4032_v20 = vld [vmem:[%s6962_s4 + $0xb8] sm:$0xf0]  ;;  %v4496_v4 = vld [vmem:[%s6962_s4 + $0x44] sm:$0xf] }
 0x1ba   : > { %1823 = vmatpush.bf16.msra.mxu1 %v3848_v3  ;;  %v4047_v3 = vor.u32 %v4515_v2, %v4046_v0 }
 0x1bc   : > { %1837 = vmatpush.bf16.msra.mxu2 %v3836_v15  ;;  %1812 = vmatpush.bf16.msra.mxu0 %v3812_v27 }
 0x1bd   : > { %1851 = vmatpush.bf16.msra.mxu3 %v3824_v39  ;;  %v4007_v39 = vor.u32 %v4506_v49, %v4006_v28  ;;  %v3983_v49 = vor.u32 %v4499_v9, %v3982_v8 }
 0x1be   : > { %1824 = vmatpush.bf16.msra.mxu1 %v3832_v14  ;;  %v4509_v14 = vld [vmem:[%s6962_s4 + $0xac] sm:$0xf] }
 0x1bf   : > { %v4035_v34 = vor.u32 %v4509_v14, %v4032_v20 }
 0x1c0   : > { %1838 = vmatpush.bf16.msra.mxu2 %v3820_v37  ;;  %2136 = vmatpush.bf16.msrb.mxu0 %v4055_v48  ;;  %v4014_v37 = vld [vmem:[%s6962_s4 + $0x88] sm:$0xf]  ;;  %v4019_v48 = vor.u32 %v4505_v38, %v4016_v25 }
 0x1c1   : > { %2193 = vmatpush.bf16.msrb.mxu3 %v4067_v61  ;;  %v3998_v61 = vld [vmem:[%s6962_s4 + $0x68] sm:$0xf] }
 0x1c2   : > { %1825 = vmatpush.bf16.msra.mxu1 %v3816_v36  ;;  %v4008_v36 = vld [vmem:[%s6962_s4 + $0x90] sm:$0xf0] }
 0x1c3   : > { %v4011_v40 = vor.u32 %v4504_v35, %v4008_v36  ;;  %v4192_v35 = vld [vmem:[%s6963_s5 + $0xf8] sm:$0xf0] }
 0x1c4   : > { %2174 = vmatpush.bf16.msrb.mxu2 %v4063_v58  ;;  %v4500_v58 = vld [vmem:[%s6962_s4 + $0x64] sm:$0xf] }
 0x1c5   : > { %2194 = vmatpush.bf16.msrb.mxu3 %v4051_v7  ;;  %v3976_v7 = vld [vmem:[%s6962_s4 + $0x50] sm:$0xf0] }
 0x1c6   : > { %2155 = vmatpush.bf16.msrb.mxu1 %v4059_v51  ;;  %v3979_v28 = vor.u32 %v4496_v4, %v3976_v7 }
 0x1c8   : > { %2175 = vmatpush.bf16.msrb.mxu2 %v4047_v3 }
 0x1c9   : > { %2195 = vmatpush.bf16.msrb.mxu3 %v4035_v34 }
 0x1cc   : > { %2176 = vmatpush.bf16.msrb.mxu2 %v4031_v19  ;;  %v4494_v19 = vld [vmem:[%s6962_s4 + $0x2c] sm:$0xf0] }
 0x1cd   : > { %2196 = vmatpush.bf16.msrb.mxu3 %v4019_v48  ;;  %v3942_v48 = vld [vmem:[%s6962_s4] sm:$0xf] }
 0x22f   : > { %v1493_v45 = vpop.f32.mrf.mxu0  ;;  %v1506_v47 = vpop.f32.mrf.mxu1 }
 0x230   : > { %v1536_v56 = vadd.f32 %v1493_v45, %v5383_v50  ;;  %v1537_v24 = vadd.f32 %v1506_v47, %v5386_v53  ;;  %v4039_v50 = vor.u32 %v4514_v60, %v4038_v59  ;;  %v4512_v53 = vld [vmem:[%s6962_s4 + $0xc4] sm:$0xf]  ;;  %v3995_v60 = vor.u32 %v4500_v58, %v3992_v42  ;;  %v3944_v58 = vld [vmem:[%s6962_s4 + $0x10] sm:$0xf0]  ;;  %v3950_v42 = vld [vmem:[%s6962_s4 + $0x8] sm:$0xf] }
 0x231   : > { %v4043_v1 = vor.u32 %v4512_v53, %v4040_v62 }
 0x232   : > { %v3806_v22 = vmul.f32 -1.442695, %v1536_v56  ;;  %v3807_v26 = vmul.f32 -1.442695, %v1537_v24  ;;  %2137 = vmatpush.bf16.msrb.mxu0 %v4039_v50  ;;  %v4502_v56 = vld [vmem:[%s6962_s4 + $0x6c] sm:$0xf0] }
 0x233   : > { %2156 = vmatpush.bf16.msrb.mxu1 %v4043_v1  ;;  %v3991_v24 = vor.u32 %v4502_v56, %v3990_v52  ;;  %v4503_v50 = vld [vmem:[%s6962_s4 + $0x74] sm:$0xf0]  ;;  %v3974_v1 = vld [vmem:[%s6962_s4 + $0x40] sm:$0xf]  ;;  %v4490_v52 = vld [vmem:[%s6962_s4 + $0xc] sm:$0xf0] }
 0x234   : > { %4688 = vpow2.f32 %v3806_v22  ;;  %v3999_v0 = vor.u32 %v4503_v50, %v3998_v61  ;;  %v4501_v22 = vld [vmem:[%s6962_s4 + $0x6c] sm:$0xf] }
 0x235   : > { %4690 = vpow2.f32 %v3807_v26  ;;  %v4000_v26 = vld [vmem:[%s6962_s4 + $0x78] sm:$0xf0] }
 0x236   : > { %v1519_v15 = vpop.f32.mrf.mxu2  ;;  %v1532_v16 = vpop.f32.mrf.mxu3  ;;  %2138 = vmatpush.bf16.msrb.mxu0 %v4023_v29  ;;  %v4003_v3 = vor.u32 %v4501_v22, %v4000_v26 }
 0x237   : > { %v1538_v30 = vadd.f32 %v1519_v15, %v5431_v10  ;;  %v1495_v27 = vpop.f32.mrf.mxu0  ;;  %v1508_v33 = vpop.f32.mrf.mxu1  ;;  %v4507_v10 = vld [vmem:[%s6962_s4 + $0x94] sm:$0xf0]  ;;  %2157 = vmatpush.bf16.msrb.mxu1 %v4027_v31  ;;  %v1539_v62 = vadd.f32 %v1532_v16, %v5440_v17  ;;  %v4498_v17 = vld [vmem:[%s6962_s4 + $0x4c] sm:$0xf0]  ;;  %v4497_v31 = vld [vmem:[%s6962_s4 + $0x4c] sm:$0xf] }
 0x238   : > { %v4015_v44 = vor.u32 %v4507_v10, %v4014_v37  ;;  %v3975_v6 = vor.u32 %v4498_v17, %v3974_v1  ;;  %2197 = vmatpush.bf16.msrb.mxu3 %v4003_v3  ;;  %v4492_v27 = vld [vmem:[%s6962_s4 + $0x24] sm:$0xf]  ;;  %v3960_v33 = vld [vmem:[%s6962_s4 + $0x30] sm:$0xf0]  ;;  %v3959_v37 = vor.u32 %v4494_v19, %v3958_v13  ;;  %v3966_v10 = vld [vmem:[%s6962_s4 + $0x28] sm:$0xf]  ;;  %v1932_v19 = vpack.c.bf16 %v5789_v54, %v5585_v57 }
 0x239   : > { %v3808_v32 = vmul.f32 -1.442695, %v1538_v30  ;;  %v3987_v30 = vor.u32 %v4497_v31, %v3984_v12  ;;  %v3963_v25 = vor.u32 %v4492_v27, %v3960_v33  ;;  %v4184_v57 = vld [vmem:[%s6963_s5 + $0xf0] sm:$0xf0]  ;;  %v4190_v54 = vld [vmem:[%s6963_s5 + $0xe8] sm:$0xf] }
 0x23a   : > { %v4689_v43 = vpop.eup %4688  ;;  %2139 = vmatpush.bf16.msrb.mxu0 %v4007_v39  ;;  %2177 = vmatpush.bf16.msrb.mxu2 %v4015_v44  ;;  %v4493_v39 = vld [vmem:[%s6962_s4 + $0x2c] sm:$0xf] }
 0x23b   : > { %v4691_v45 = vpop.eup %4690  ;;  %v6084_v47 = vadd.f32 1.0, %v4689_v43  ;;  %4692 = vpow2.f32 %v3808_v32  ;;  %2158 = vmatpush.bf16.msrb.mxu1 %v4011_v40  ;;  %v4495_v32 = vld [vmem:[%s6962_s4 + $0x34] sm:$0xf0]  ;;  %v3968_v40 = vld [vmem:[%s6962_s4 + $0x38] sm:$0xf0] }
 0x23c   : > { %v6086_v51 = vadd.f32 1.0, %v4691_v45  ;;  %2198 = vmatpush.bf16.msrb.mxu3 %v3987_v30  ;;  %v3967_v44 = vor.u32 %v4495_v32, %v3966_v10  ;;  %v3971_v45 = vor.u32 %v4493_v39, %v3968_v40  ;;  %v4551_v30 = vld [vmem:[%s6963_s5 + $0xf4] sm:$0xf0]  ;;  %v4166_v32 = vld [vmem:[%s6963_s5 + $0xc0] sm:$0xf] }
 0x23d   : > { %4694 = vrcp.f32 %v6084_v47  ;;  %v1561_v59 = vand.u32 2147483647, %v6084_v47  ;;  %v1563_v16 = vand.u32 2147483648, %v6084_v47  ;;  %vm1557_vm13 = vweird.f32 %v6084_v47  ;;  %v4546_v39 = vld [vmem:[%s6963_s5 + $0xcc] sm:$0xf0] }
 0x23e   : > { %4696 = vrcp.f32 %v6086_v51  ;;  %v1521_v46 = vpop.f32.mrf.mxu2  ;;  %v1534_v55 = vpop.f32.mrf.mxu3  ;;  %2140 = vmatpush.bf16.msrb.mxu0 %v3991_v24  ;;  %2178 = vmatpush.bf16.msrb.mxu2 %v3999_v0  ;;  %v1578_v15 = vand.u32 2147483648, %v6086_v51  ;;  %v1576_v36 = vand.u32 2147483647, %v6086_v51  ;;  %vm1572_vm12 = vweird.f32 %v6086_v51  ;;  %v3952_v0 = vld [vmem:[%s6962_s4 + $0x18] sm:$0xf0] }
 0x23f   : > { %2159 = vmatpush.bf16.msrb.mxu1 %v3995_v60  ;;  %vm6165_vm9 = vcmp.eq.f32.partialorder %v1561_v59, 8.507059e+37  ;;  %v4488_v46 = vld [vmem:[%s6962_s4 + $0x4] sm:$0xf]  ;;  %v3943_v24 = vor.u32 %v4490_v52, %v3942_v48  ;;  %v4491_v59 = vld [vmem:[%s6962_s4 + $0x14] sm:$0xf0]  ;;  %v6260_v33 = vor.u32 %v4551_v30, %v4190_v54 }
 0x240   : > { %v1579_v61 = vor.u32 1.1754944e-38, %v1578_v15  ;;  %vm1577_vm0 = vcmp.eq.f32.partialorder %v1576_v36, 8.507059e+37  ;;  %v3947_v26 = vor.u32 %v4488_v46, %v3944_v58  ;;  %v3951_v1 = vor.u32 %v4491_v59, %v3950_v42  ;;  %2199 = vmatpush.bf16.msrb.mxu3 %v3971_v45  ;;  %v4544_v40 = vld [vmem:[%s6963_s5 + $0xc4] sm:$0xf]  ;;  %v4542_v58 = vld [vmem:[%s6963_s5 + $0xac] sm:$0xf0] }
 0x241   : > { %v4693_v53 = vpop.eup %4692  ;;  %v4118_v30 = vld [vmem:[%s6963_s5 + $0x60] sm:$0xf] }
 0x242   : > { %v6119_v2 = vadd.f32 1.0, %v4693_v53  ;;  %2141 = vmatpush.bf16.msrb.mxu0 %v3975_v6  ;;  %2179 = vmatpush.bf16.msrb.mxu2 %v3983_v49 }
 0x243   : > { %v6127_v5 = vpop.eup %4694  ;;  %2160 = vmatpush.bf16.msrb.mxu1 %v3979_v28  ;;  %v4548_v28 = vld [vmem:[%s6963_s5 + $0xe4] sm:$0xf] }
 0x244   : > { %v6138_v11 = vpop.eup %4696  ;;  %v1553_v29 = vmul.f32 %v6127_v5, %v6084_v47  ;;  %4698 = vrcp.f32 %v6119_v2  ;;  %vm1558_vm10 = vweird.f32 %v6127_v5  ;;  %v1564_v47 = vor.u32 1.1754944e-38, %v1563_v16 }
 0x245   : > { %v1568_v14 = vmul.f32 %v6138_v11, %v6086_v51  ;;  %4700 = vtanh.f32 %v1539_v62  ;;  %vm1573_vm11 = vweird.f32 %v6138_v11  ;;  %vm1559_vm14 = vmor %vm1557_vm13, %vm1558_vm10  ;;  %v4489_v62 = vld [vmem:[%s6962_s4 + $0xc] sm:$0xf]  ;;  %v1593_v31 = vand.u32 2147483648, %v6119_v2 }
 0x246   : > { %v1554_v20 = vsub.f32 1.0, %v1553_v29  ;;  %2142 = vmatpush.bf16.msrb.mxu0 %v3959_v37  ;;  %vm1574_vm15 = vmor %vm1572_vm12, %vm1573_vm11  ;;  %2180 = vmatpush.bf16.msrb.mxu2 %v3967_v44  ;;  %v3955_v6 = vor.u32 %v4489_v62, %v3952_v0  ;;  %vm1587_vm2 = vweird.f32 %v6119_v2  ;;  %v6258_v27 = vor.u32 %v4548_v28, %v4184_v57  ;;  %v4547_v44 = vld [vmem:[%s6963_s5 + $0xd4] sm:$0xf0]  ;;  %v4541_v62 = vld [vmem:[%s6963_s5 + $0xac] sm:$0xf] }
 0x247   : > { %v1569_v34 = vsub.f32 1.0, %v1568_v14  ;;  %2161 = vmatpush.bf16.msrb.mxu1 %v3963_v25  ;;  %v1594_v13 = vor.u32 1.1754944e-38, %v1593_v31  ;;  %v4160_v0 = vld [vmem:[%s6963_s5 + $0xb8] sm:$0xf0]  ;;  %v4142_v31 = vld [vmem:[%s6963_s5 + $0x88] sm:$0xf] }
 0x248   : > { %v1555_v38 = vmul.f32 %v6127_v5, %v1554_v20  ;;  %2200 = vmatpush.bf16.msrb.mxu3 %v3955_v6  ;;  %v4550_v20 = vld [vmem:[%s6963_s5 + $0xec] sm:$0xf0]  ;;  %v4536_v6 = vld [vmem:[%s6963_s5 + $0x84] sm:$0xf] }
 0x249   : > { %v1570_v43 = vmul.f32 %v6138_v11, %v1569_v34  ;;  %v4549_v34 = vld [vmem:[%s6963_s5 + $0xec] sm:$0xf] }
 0x24a   : > { %v4699_v55 = vpop.eup %4698  ;;  %v1556_v56 = vadd.f32 %v6127_v5, %v1555_v38  ;;  %2143 = vmatpush.bf16.msrb.mxu0 %v3943_v24  ;;  %2181 = vmatpush.bf16.msrb.mxu2 %v3951_v1  ;;  %v6269_v10 = vor.u32 %v4549_v34, %v4192_v35  ;;  %v4150_v24 = vld [vmem:[%s6963_s5 + $0xa0] sm:$0xf]  ;;  %v4534_v35 = vld [vmem:[%s6963_s5 + $0x6c] sm:$0xf0] }
 0x24b   : > { %v4701_v60 = vpop.eup %4700  ;;  %v1583_v50 = vmul.f32 %v4699_v55, %v6119_v2  ;;  %v1571_v53 = vadd.f32 %v6138_v11, %v1570_v43  ;;  %2162 = vmatpush.bf16.msrb.mxu1 %v3947_v26  ;;  %vm1588_vm1 = vweird.f32 %v4699_v55  ;;  %v4174_v43 = vld [vmem:[%s6963_s5 + $0xc8] sm:$0xf]  ;;  %v6317_v59 = vor.u32 %v4542_v58, %v4150_v24  ;;  %v4102_v24 = vld [vmem:[%s6963_s5 + $0x40] sm:$0xf]  ;;  %v4530_v58 = vld [vmem:[%s6963_s5 + $0x4c] sm:$0xf0] }
 0x24c   : > { %v1560_v22 = vsel %vm1559_vm14, %v6127_v5, %v1556_v56  ;;  %vm1589_vm3 = vmor %vm1587_vm2, %vm1588_vm1  ;;  %v6298_v46 = vor.u32 %v4547_v44, %v4174_v43  ;;  %v4176_v56 = vld [vmem:[%s6963_s5 + $0xd8] sm:$0xf0]  ;;  %v4533_v43 = vld [vmem:[%s6963_s5 + $0x6c] sm:$0xf] }
 0x24d   : > { %v1584_v3 = vsub.f32 1.0, %v1583_v50  ;;  %v1565_v17 = vsel %vm6165_vm9, %v1564_v47, %v1560_v22  ;;  %v1575_v4 = vsel %vm1574_vm15, %v6138_v11, %v1571_v53  ;;  %v1591_v11 = vand.u32 2147483647, %v6119_v2  ;;  %v4182_v2 = vld [vmem:[%s6963_s5 + $0xe0] sm:$0xf] }
 0x24e   : > { %v1580_v7 = vsel %vm1577_vm0, %v1579_v61, %v1575_v4  ;;  %v1599_v8 = vmul.f32 %v4701_v60, %v1565_v17  ;;  %v6247_v49 = vor.u32 %v4550_v20, %v4182_v2  ;;  %v4540_v60 = vld [vmem:[%s6963_s5 + $0xa4] sm:$0xf]  ;;  %v4152_v61 = vld [vmem:[%s6963_s5 + $0xb0] sm:$0xf0]  ;;  %v4158_v50 = vld [vmem:[%s6963_s5 + $0xa8] sm:$0xf] }
 0x24f   : > { %v1585_v51 = vmul.f32 %v4699_v55, %v1584_v3  ;;  %v1598_v9 = vmul.f32 %v1580_v7, %v5786_v41  ;;  %vm1592_vm4 = vcmp.eq.f32.partialorder %v1591_v11, 8.507059e+37  ;;  %v6328_v47 = vor.u32 %v4540_v60, %v4152_v61  ;;  %v4543_v53 = vld [vmem:[%s6963_s5 + $0xb4] sm:$0xf0]  ;;  %v4134_v17 = vld [vmem:[%s6963_s5 + $0x80] sm:$0xf] }
 0x250   : > { %v6340_v1 = vor.u32 %v4543_v53, %v4158_v50  ;;  %v6342_v3 = vor.u32 %v4541_v62, %v4160_v0  ;;  %v4538_v4 = vld [vmem:[%s6963_s5 + $0x8c] sm:$0xf0]  ;;  %v4539_v11 = vld [vmem:[%s6963_s5 + $0x94] sm:$0xf0]  ;;  %v4128_v44 = vld [vmem:[%s6963_s5 + $0x78] sm:$0xf0]  ;;  %v6439_v50 = vor.u32 %v4530_v58, %v4102_v24 }
 0x251   : > { %v6226_v5 = vadd.f32 %v1599_v8, %v1598_v9  ;;  %v1586_v29 = vadd.f32 %v4699_v55, %v1585_v51  ;;  %v6355_v9 = vor.u32 %v4538_v4, %v4134_v17  ;;  %v4528_v53 = vld [vmem:[%s6963_s5 + $0x44] sm:$0xf]  ;;  %v4104_v62 = vld [vmem:[%s6963_s5 + $0x50] sm:$0xf0]  ;;  %v4110_v0 = vld [vmem:[%s6963_s5 + $0x48] sm:$0xf] }
 0x252   : > { %v4529_v17 = vld [vmem:[%s6963_s5 + $0x4c] sm:$0xf]  ;;  %v4112_v4 = vld [vmem:[%s6963_s5 + $0x58] sm:$0xf0] }
 0x253   : > { %4702 = vtanh.f32 %v6226_v5  ;;  %v1590_v12 = vsel %vm1589_vm3, %v4699_v55, %v1586_v29  ;;  %v4545_v55 = vld [vmem:[%s6963_s5 + $0xcc] sm:$0xf]  ;;  %v4136_v29 = vld [vmem:[%s6963_s5 + $0x90] sm:$0xf0] }
 0x254   : > { %v1595_v14 = vsel %vm1592_vm4, %v1594_v13, %v1590_v12  ;;  %v6315_v42 = vor.u32 %v4545_v55, %v4176_v56  ;;  %v6370_v12 = vor.u32 %v4539_v11, %v4142_v31  ;;  %v4537_v13 = vld [vmem:[%s6963_s5 + $0x8c] sm:$0xf]  ;;  %v6426_v56 = vor.u32 %v4533_v43, %v4128_v44  ;;  %v4070_v43 = vld [vmem:[%s6963_s5] sm:$0xf]  ;;  %v4522_v44 = vld [vmem:[%s6963_s5 + $0xc] sm:$0xf0] }
 0x255   : > { %v6477_v11 = vor.u32 %v4529_v17, %v4112_v4  ;;  %v4523_v17 = vld [vmem:[%s6963_s5 + $0x14] sm:$0xf0]  ;;  %v4521_v4 = vld [vmem:[%s6963_s5 + $0xc] sm:$0xf] }
 0x259   : > { %v4703_v41 = vpop.eup %4702 }
 0x25a   : > { %v6232_v15 = vmul.f32 %v4703_v41, %v1595_v14  ;;  %v4144_v41 = vld [vmem:[%s6963_s5 + $0x98] sm:$0xf0] }
 0x25c   : > { %v1612_v16 = vpack.c.bf16 %v6232_v15, %v6232_v15 }
 0x25e   : > { %1813 = vmatmul.bf16.vlgmr.msra.gmra.mxu0 %v1612_v16  ;;  %1826 = vmatmul.bf16.vlgmr.msra.gmra.mxu1 %v1612_v16 }
 0x25f   : > { %1839 = vmatmul.bf16.vlgmr.msra.gmra.mxu2 %v1612_v16  ;;  %1852 = vmatmul.bf16.vlgmr.msra.gmra.mxu3 %v1612_v16 }
 0x260   : > { %2427 = vmatpush.bf16.msra.mxu0 %v6247_v49  ;;  %2440 = vmatpush.bf16.msra.mxu1 %v6258_v27 }
 0x261   : > { %2453 = vmatpush.bf16.msra.mxu2 %v6260_v33  ;;  %2466 = vmatpush.bf16.msra.mxu3 %v6269_v10 }
 0x265   : > { %2454 = vmatpush.bf16.msra.mxu2 %v6298_v46  ;;  %2467 = vmatpush.bf16.msra.mxu3 %v6315_v42 }
 0x269   : > { %2455 = vmatpush.bf16.msra.mxu2 %v6340_v1  ;;  %2468 = vmatpush.bf16.msra.mxu3 %v6342_v3 }
 0x26d   : > { %2456 = vmatpush.bf16.msra.mxu2 %v6370_v12 }
 0x26e   : > { %2144 = vmatmul.bf16.vlgmr.msrb.gmra.mxu0 %v1932_v19  ;;  %2163 = vmatmul.bf16.vlgmr.msrb.gmra.mxu1 %v1932_v19 }
 0x26f   : > { %2182 = vmatmul.bf16.vlgmr.msrb.gmra.mxu2 %v1932_v19  ;;  %2201 = vmatmul.bf16.vlgmr.msrb.gmra.mxu3 %v1932_v19  ;;  %v6379_v19 = vor.u32 %v4537_v13, %v4144_v41  ;;  %v4526_v13 = vld [vmem:[%s6963_s5 + $0x2c] sm:$0xf0]  ;;  %v4524_v41 = vld [vmem:[%s6963_s5 + $0x24] sm:$0xf] }
 0x271   : > { %2469 = vmatpush.bf16.msra.mxu3 %v6379_v19 }
 0x275   : > { %2470 = vmatpush.bf16.msra.mxu3 %v6426_v56 }
 0x279   : > { %2471 = vmatpush.bf16.msra.mxu3 %v6477_v11 }
 0x2db   : > { %v1814_v36 = vpop.f32.mrf.mxu0  ;;  %v1827_v37 = vpop.f32.mrf.mxu1 }
 0x2dc   : > { %v1857_v38 = vadd.f32 %v1814_v36, %v5443_v18  ;;  %v1858_v25 = vadd.f32 %v1827_v37, %v5446_v23  ;;  %v6285_v18 = vor.u32 %v4546_v39, %v4166_v32  ;;  %v4168_v23 = vld [vmem:[%s6963_s5 + $0xd0] sm:$0xf0]  ;;  %v4532_v36 = vld [vmem:[%s6963_s5 + $0x64] sm:$0xf]  ;;  %v6408_v39 = vor.u32 %v4534_v35, %v4118_v30  ;;  %v4527_v35 = vld [vmem:[%s6963_s5 + $0x34] sm:$0xf0] }
 0x2dd   : > { %v6296_v52 = vor.u32 %v4544_v40, %v4168_v23  ;;  %v4535_v23 = vld [vmem:[%s6963_s5 + $0x74] sm:$0xf0] }
 0x2de   : > { %v3937_v45 = vmul.f32 -1.442695, %v1857_v38  ;;  %v3938_v48 = vmul.f32 -1.442695, %v1858_v25  ;;  %2428 = vmatpush.bf16.msra.mxu0 %v6285_v18  ;;  %v4120_v38 = vld [vmem:[%s6963_s5 + $0x70] sm:$0xf0] }
 0x2df   : > { %2441 = vmatpush.bf16.msra.mxu1 %v6296_v52  ;;  %v4126_v25 = vld [vmem:[%s6963_s5 + $0x68] sm:$0xf]  ;;  %v6410_v40 = vor.u32 %v4532_v36, %v4120_v38  ;;  %v4525_v36 = vld [vmem:[%s6963_s5 + $0x2c] sm:$0xf] }
 0x2e0   : > { %4704 = vpow2.f32 %v3937_v45  ;;  %v6424_v55 = vor.u32 %v4535_v23, %v4126_v25  ;;  %v4096_v23 = vld [vmem:[%s6963_s5 + $0x38] sm:$0xf0] }
 0x2e1   : > { %4706 = vpow2.f32 %v3938_v48  ;;  %v6531_v58 = vor.u32 %v4525_v36, %v4096_v23 }
 0x2e2   : > { %v1840_v22 = vpop.f32.mrf.mxu2  ;;  %v1853_v26 = vpop.f32.mrf.mxu3  ;;  %2429 = vmatpush.bf16.msra.mxu0 %v6317_v59  ;;  %2457 = vmatpush.bf16.msra.mxu2 %v6424_v55 }
 0x2e3   : > { %v1859_v7 = vadd.f32 %v1840_v22, %v5495_v21  ;;  %v1816_v8 = vpop.f32.mrf.mxu0  ;;  %v1829_v51 = vpop.f32.mrf.mxu1  ;;  %2442 = vmatpush.bf16.msra.mxu1 %v6328_v47  ;;  %v6368_v21 = vor.u32 %v4536_v6, %v4136_v29  ;;  %v1860_v61 = vadd.f32 %v1853_v26, %v5504_v63  ;;  %v4531_v26 = vld [vmem:[%s6963_s5 + $0x54] sm:$0xf0]  ;;  %v6473_v29 = vor.u32 %v4528_v53, %v4104_v62  ;;  %v4072_v53 = vld [vmem:[%s6963_s5 + $0x10] sm:$0xf0]  ;;  %v4078_v62 = vld [vmem:[%s6963_s5 + $0x8] sm:$0xf] }
 0x2e4   : > { %v4086_v8 = vld [vmem:[%s6963_s5 + $0x20] sm:$0xf]  ;;  %v6475_v31 = vor.u32 %v4531_v26, %v4110_v0  ;;  %v6546_v26 = vor.u32 %v4522_v44, %v4070_v43  ;;  %2472 = vmatpush.bf16.msra.mxu3 %v6531_v58 }
 0x2e5   : > { %v3939_v14 = vmul.f32 -1.442695, %v1859_v7  ;;  %v6515_v25 = vor.u32 %v4526_v13, %v4086_v8 }
 0x2e6   : > { %v4705_v16 = vpop.eup %4704  ;;  %2430 = vmatpush.bf16.msra.mxu0 %v6355_v9  ;;  %2458 = vmatpush.bf16.msra.mxu2 %v6475_v31 }
 0x2e7   : > { %v4707_v2 = vpop.eup %4706  ;;  %v6381_v20 = vadd.f32 1.0, %v4705_v16  ;;  %4708 = vpow2.f32 %v3939_v14  ;;  %2443 = vmatpush.bf16.msra.mxu1 %v6368_v21 }
 0x2e8   : > { %v6384_v28 = vadd.f32 1.0, %v4707_v2  ;;  %v4088_v2 = vld [vmem:[%s6963_s5 + $0x30] sm:$0xf0] }
 0x2e9   : > { %4710 = vrcp.f32 %v6381_v20  ;;  %v1882_v34 = vand.u32 2147483647, %v6381_v20  ;;  %v1884_v37 = vand.u32 2147483648, %v6381_v20  ;;  %vm1878_vm6 = vweird.f32 %v6381_v20 }
 0x2ea   : > { %4712 = vrcp.f32 %v6384_v28  ;;  %v1842_v57 = vpop.f32.mrf.mxu2  ;;  %v1855_v54 = vpop.f32.mrf.mxu3  ;;  %v1899_v45 = vand.u32 2147483648, %v6384_v28  ;;  %2431 = vmatpush.bf16.msra.mxu0 %v6408_v39  ;;  %v1897_v7 = vand.u32 2147483647, %v6384_v28  ;;  %vm1893_vm10 = vweird.f32 %v6384_v28 }
 0x2eb   : > { %2444 = vmatpush.bf16.msra.mxu1 %v6410_v40  ;;  %vm6486_vm7 = vcmp.eq.f32.partialorder %v1882_v34, 8.507059e+37  ;;  %v4094_v57 = vld [vmem:[%s6963_s5 + $0x28] sm:$0xf]  ;;  %v1885_v34 = vor.u32 1.1754944e-38, %v1884_v37  ;;  %v2145_v44 = vpop.f32.mrf.mxu0 }
 0x2ec   : > { %v1900_v54 = vor.u32 1.1754944e-38, %v1899_v45  ;;  %v6519_v37 = vor.u32 %v4527_v35, %v4094_v57  ;;  %vm1898_vm12 = vcmp.eq.f32.partialorder %v1897_v7, 8.507059e+37 }
 0x2ed   : > { %v4709_v32 = vpop.eup %4708 }
 0x2ee   : > { %v6422_v48 = vadd.f32 1.0, %v4709_v32  ;;  %2432 = vmatpush.bf16.msra.mxu0 %v6439_v50  ;;  %v6517_v32 = vor.u32 %v4524_v41, %v4088_v2  ;;  %2459 = vmatpush.bf16.msra.mxu2 %v6519_v37 }
 0x2ef   : > { %v6434_v60 = vpop.eup %4710  ;;  %2445 = vmatpush.bf16.msra.mxu1 %v6473_v29 }
 0x2f0   : > { %v6450_v22 = vpop.eup %4712  ;;  %v1874_v63 = vmul.f32 %v6434_v60, %v6381_v20  ;;  %4714 = vrcp.f32 %v6422_v48  ;;  %vm1879_vm5 = vweird.f32 %v6434_v60  ;;  %vm1908_vm14 = vweird.f32 %v6422_v48 }
 0x2f1   : > { %v1889_v6 = vmul.f32 %v6450_v22, %v6384_v28  ;;  %4716 = vtanh.f32 %v1860_v61  ;;  %vm1894_vm8 = vweird.f32 %v6450_v22  ;;  %vm6501_vm9 = vmor %vm1878_vm6, %vm1879_vm5  ;;  %v4520_v61 = vld [vmem:[%s6963_s5 + $0x4] sm:$0xf]  ;;  %v4080_v28 = vld [vmem:[%s6963_s5 + $0x18] sm:$0xf0]  ;;  %v1912_v16 = vand.u32 2147483647, %v6422_v48 }
 0x2f2   : > { %v1875_v51 = vsub.f32 1.0, %v1874_v63  ;;  %2433 = vmatpush.bf16.msra.mxu0 %v6515_v25  ;;  %vm1895_vm11 = vmor %vm1893_vm10, %vm1894_vm8  ;;  %v6564_v8 = vor.u32 %v4520_v61, %v4072_v53  ;;  %v6572_v57 = vor.u32 %v4521_v4, %v4080_v28  ;;  %v2202_v61 = vpop.f32.mrf.mxu3 }
 0x2f3   : > { %v1890_v14 = vsub.f32 1.0, %v1889_v6  ;;  %2446 = vmatpush.bf16.msra.mxu1 %v6517_v32  ;;  %vm1913_vm0 = vcmp.eq.f32.partialorder %v1912_v16, 8.507059e+37  ;;  %v6647_v53 = vpop.f32.mrf.mxu0 }
 0x2f4   : > { %v1876_v20 = vmul.f32 %v6434_v60, %v1875_v51  ;;  %v6566_v51 = vor.u32 %v4523_v17, %v4078_v62  ;;  %2473 = vmatpush.bf16.msra.mxu3 %v6572_v57 }
 0x2f5   : > { %v1891_v38 = vmul.f32 %v6450_v22, %v1890_v14 }
 0x2f6   : > { %v4715_v45 = vpop.eup %4714  ;;  %v1877_v24 = vadd.f32 %v6434_v60, %v1876_v20  ;;  %2434 = vmatpush.bf16.msra.mxu0 %v6546_v26  ;;  %2460 = vmatpush.bf16.msra.mxu2 %v6566_v51 }
 0x2f7   : > { %v1904_v0 = vmul.f32 %v4715_v45, %v6422_v48  ;;  %v1892_v63 = vadd.f32 %v6450_v22, %v1891_v38  ;;  %v4717_v13 = vpop.eup %4716  ;;  %2447 = vmatpush.bf16.msra.mxu1 %v6564_v8  ;;  %vm1909_vm13 = vweird.f32 %v4715_v45 }
 0x2f8   : > { %v1881_v6 = vsel %vm6501_vm9, %v6434_v60, %v1877_v24  ;;  %2590 = vmatpush.bf16.msrb.mxu3 %v6269_v10  ;;  %vm1910_vm15 = vmor %vm1908_vm14, %vm1909_vm13  ;;  %v2183_v24 = vpop.f32.mrf.mxu2 }
 0x2f9   : > { %v1905_v41 = vsub.f32 1.0, %v1904_v0  ;;  %v1886_v14 = vsel %vm6486_vm7, %v1885_v34, %v1881_v6  ;;  %v1896_v2 = vsel %vm1895_vm11, %v6450_v22, %v1892_v63 }
 0x2fa   : > { %v1901_v60 = vsel %vm1898_vm12, %v1900_v54, %v1896_v2  ;;  %v1920_v7 = vmul.f32 %v4717_v13, %v1886_v14  ;;  %2551 = vmatpush.bf16.msrb.mxu0 %v6247_v49  ;;  %2577 = vmatpush.bf16.msrb.mxu2 %v6260_v33  ;;  %v6653_v63 = vpop.f32.mrf.mxu3  ;;  %v1966_v13 = vld [vmem:[%s6964_s6] sm:$0xf] }
 0x2fb   : > { %v1906_v20 = vmul.f32 %v4715_v45, %v1905_v41  ;;  %v1919_v30 = vmul.f32 %v1901_v60, %v6226_v5  ;;  %2564 = vmatpush.bf16.msrb.mxu1 %v6258_v27  ;;  %v1914_v5 = vand.u32 2147483648, %v6422_v48  ;;  %6993 = vst [vmem:[#allocation17_spill] sm:$0xff] %v6653_v63  ;;  %v6670_v2 = vperm.slane %v1966_v13, 0 }
 0x2fc   : > { %2591 = vmatpush.bf16.msrb.mxu3 %v6315_v42  ;;  %v6672_v60 = vperm.slane %v1966_v13, 1 }
 0x2fd   : > { %v1921_v35 = vadd.f32 %v1920_v7, %v1919_v30  ;;  %v1907_v22 = vadd.f32 %v4715_v45, %v1906_v20  ;;  %v1915_v34 = vor.u32 1.1754944e-38, %v1914_v5  ;;  %v2146_v7 = vadd.f32 %v2145_v44, %v6670_v2 }
 0x2fe   : > { %2552 = vmatpush.bf16.msrb.mxu0 %v6285_v18  ;;  %2578 = vmatpush.bf16.msrb.mxu2 %v6298_v46 }
 0x2ff   : > { %4718 = vtanh.f32 %v1921_v35  ;;  %1927 = vst [vmem:[#allocation5] sm:$0xff] %v1921_v35  ;;  %v1911_v54 = vsel %vm1910_vm15, %v4715_v45, %v1907_v22  ;;  %2565 = vmatpush.bf16.msrb.mxu1 %v6296_v52  ;;  %v2164_v45 = vpop.f32.mrf.mxu1 }
 0x300   : > { %v1916_v38 = vsel %vm1913_vm0, %v1915_v34, %v1911_v54  ;;  %2592 = vmatpush.bf16.msrb.mxu3 %v6342_v3  ;;  %v6651_v0 = vpop.f32.mrf.mxu2  ;;  %v2165_v20 = vadd.f32 %v2164_v45, %v6672_v60  ;;  %v6680_v34 = vperm.slane %v1966_v13, 2 }
 0x302   : > { %2553 = vmatpush.bf16.msrb.mxu0 %v6317_v59  ;;  %2579 = vmatpush.bf16.msrb.mxu2 %v6340_v1 }
 0x303   : > { %2566 = vmatpush.bf16.msrb.mxu1 %v6328_v47 }
 0x304   : > { %2593 = vmatpush.bf16.msrb.mxu3 %v6379_v19 }
 0x305   : > { %v4719_v36 = vpop.eup %4718 }
 0x306   : > { %v1923_v23 = vmul.f32 %v4719_v36, %v1916_v38  ;;  %2554 = vmatpush.bf16.msrb.mxu0 %v6355_v9  ;;  %2580 = vmatpush.bf16.msrb.mxu2 %v6370_v12 }
 0x307   : > { %2567 = vmatpush.bf16.msrb.mxu1 %v6368_v21  ;;  %v6649_v62 = vpop.f32.mrf.mxu1 }
 0x308   : > { %1926 = vst [vmem:[#allocation4] sm:$0xff] %v1923_v23  ;;  %v1933_v48 = vpack.c.bf16 %v1923_v23, %v6232_v15  ;;  %2594 = vmatpush.bf16.msrb.mxu3 %v6426_v56  ;;  %v2228_v15 = vld [vmem:[#allocation6] sm:$0xff]  ;;  %v2184_v23 = vadd.f32 %v2183_v24, %v6680_v34 }
 0x309   : > { %v2234_v43 = vpack.c.bf16 %v2228_v15, %v2228_v15 }
 0x30a   : > { %2149 = vmatmul.bf16.gmra.mxu0 %v1933_v48  ;;  %2168 = vmatmul.bf16.gmra.mxu1 %v1933_v48 }
 0x30b   : > { %2187 = vmatmul.bf16.gmra.mxu2 %v1933_v48  ;;  %2206 = vmatmul.bf16.gmra.mxu3 %v1933_v48 }
 0x30c   : > { %2555 = vmatpush.bf16.msrb.mxu0 %v6408_v39  ;;  %2568 = vmatpush.bf16.msrb.mxu1 %v6410_v40 }
 0x30d   : > { %2581 = vmatpush.bf16.msrb.mxu2 %v6424_v55  ;;  %2595 = vmatpush.bf16.msrb.mxu3 %v6477_v11 }
 0x310   : > { %2556 = vmatpush.bf16.msrb.mxu0 %v6439_v50  ;;  %2569 = vmatpush.bf16.msrb.mxu1 %v6473_v29 }
 0x311   : > { %2582 = vmatpush.bf16.msrb.mxu2 %v6475_v31  ;;  %2596 = vmatpush.bf16.msrb.mxu3 %v6531_v58 }
 0x314   : > { %2557 = vmatpush.bf16.msrb.mxu0 %v6515_v25  ;;  %2570 = vmatpush.bf16.msrb.mxu1 %v6517_v32 }
 0x315   : > { %2583 = vmatpush.bf16.msrb.mxu2 %v6519_v37  ;;  %2597 = vmatpush.bf16.msrb.mxu3 %v6572_v57 }
 0x318   : > { %2558 = vmatpush.bf16.msrb.mxu0 %v6546_v26  ;;  %2571 = vmatpush.bf16.msrb.mxu1 %v6564_v8 }
 0x319   : > { %2584 = vmatpush.bf16.msrb.mxu2 %v6566_v51 }
 0x31a   : > { %2435 = vmatmul.bf16.vlgmr.msra.gmra.mxu0 %v2234_v43  ;;  %2448 = vmatmul.bf16.vlgmr.msra.gmra.mxu1 %v2234_v43 }
 0x31b   : > { %2461 = vmatmul.bf16.vlgmr.msra.gmra.mxu2 %v2234_v43  ;;  %2474 = vmatmul.bf16.vlgmr.msra.gmra.mxu3 %v2234_v43 }
 0x31c   : > { %2675 = vmatpush.bf16.msra.mxu0 %v6247_v49  ;;  %2688 = vmatpush.bf16.msra.mxu1 %v6258_v27 }
 0x31d   : > { %2701 = vmatpush.bf16.msra.mxu2 %v6260_v33  ;;  %2714 = vmatpush.bf16.msra.mxu3 %v6269_v10 }
 0x320   : > { %2676 = vmatpush.bf16.msra.mxu0 %v6285_v18  ;;  %2689 = vmatpush.bf16.msra.mxu1 %v6296_v52 }
 0x321   : > { %2702 = vmatpush.bf16.msra.mxu2 %v6298_v46  ;;  %2715 = vmatpush.bf16.msra.mxu3 %v6315_v42 }
 0x324   : > { %2677 = vmatpush.bf16.msra.mxu0 %v6317_v59  ;;  %2690 = vmatpush.bf16.msra.mxu1 %v6328_v47 }
 0x325   : > { %2703 = vmatpush.bf16.msra.mxu2 %v6340_v1  ;;  %2716 = vmatpush.bf16.msra.mxu3 %v6342_v3 }
 0x328   : > { %2678 = vmatpush.bf16.msra.mxu0 %v6355_v9  ;;  %2691 = vmatpush.bf16.msra.mxu1 %v6368_v21 }
 0x329   : > { %2704 = vmatpush.bf16.msra.mxu2 %v6370_v12  ;;  %2717 = vmatpush.bf16.msra.mxu3 %v6379_v19 }
 0x32c   : > { %2679 = vmatpush.bf16.msra.mxu0 %v6408_v39  ;;  %2692 = vmatpush.bf16.msra.mxu1 %v6410_v40 }
 0x32d   : > { %2705 = vmatpush.bf16.msra.mxu2 %v6424_v55  ;;  %2718 = vmatpush.bf16.msra.mxu3 %v6426_v56 }
 0x330   : > { %2680 = vmatpush.bf16.msra.mxu0 %v6439_v50  ;;  %2693 = vmatpush.bf16.msra.mxu1 %v6473_v29 }
 0x331   : > { %2706 = vmatpush.bf16.msra.mxu2 %v6475_v31  ;;  %2719 = vmatpush.bf16.msra.mxu3 %v6477_v11 }
 0x334   : > { %2681 = vmatpush.bf16.msra.mxu0 %v6515_v25  ;;  %2694 = vmatpush.bf16.msra.mxu1 %v6517_v32 }
 0x335   : > { %2707 = vmatpush.bf16.msra.mxu2 %v6519_v37  ;;  %2720 = vmatpush.bf16.msra.mxu3 %v6531_v58 }
 0x338   : > { %2682 = vmatpush.bf16.msra.mxu0 %v6546_v26  ;;  %2695 = vmatpush.bf16.msra.mxu1 %v6564_v8 }
 0x339   : > { %2708 = vmatpush.bf16.msra.mxu2 %v6566_v51  ;;  %2721 = vmatpush.bf16.msra.mxu3 %v6572_v57 }
 0x387   : > { %v6655_v17 = vpop.f32.mrf.mxu0  ;;  %v6657_v4 = vpop.f32.mrf.mxu1 }
 0x388   : > { %6994 = vst [vmem:[#allocation18_spill] sm:$0xff] %v6655_v17 }
 0x389   : > { %6995 = vst [vmem:[#allocation19_spill] sm:$0xff] %v6657_v4 }
 0x38e   : > { %v6659_v28 = vpop.f32.mrf.mxu2  ;;  %v6661_v6 = vpop.f32.mrf.mxu3 }
 0x38f   : > { %6996 = vst [vmem:[#allocation20_spill] sm:$0xff] %v6659_v28  ;;  %v6666_v41 = vpop.f32.mrf.mxu0  ;;  %v6668_v14 = vpop.f32.mrf.mxu1 }
 0x390   : > { %6997 = vst [vmem:[#allocation21_spill] sm:$0xff] %v6661_v6 }
 0x391   : > { %6998 = vst [vmem:[#allocation22_spill] sm:$0xff] %v6666_v41 }
 0x392   : > { %6999 = vst [vmem:[#allocation23_spill] sm:$0xff] %v6668_v14 }
 0x396   : > { %v6676_v30 = vpop.f32.mrf.mxu2  ;;  %v6678_v35 = vpop.f32.mrf.mxu3 }
 0x397   : > { %7000 = vst [vmem:[#allocation24_spill] sm:$0xff] %v6676_v30  ;;  %v2436_v22 = vpop.f32.mrf.mxu0  ;;  %v2449_v5 = vpop.f32.mrf.mxu1 }
 0x398   : > { %7001 = vst [vmem:[#allocation25_spill] sm:$0xff] %v6678_v35  ;;  %v2479_v16 = vadd.f32 %v2436_v22, %v2146_v7  ;;  %v2480_v54 = vadd.f32 %v2449_v5, %v2165_v20  ;;  %v6683_v20 = vperm.slane %v1966_v13, 3 }
 0x39a   : > { %v4196_v36 = vmul.f32 -1.442695, %v2479_v16  ;;  %v4197_v38 = vmul.f32 -1.442695, %v2480_v54  ;;  %7002 = vst [vmem:[#allocation26_spill] sm:$0xff] %v6683_v20  ;;  %v2203_v24 = vadd.f32 %v2202_v61, %v6683_v20 }
 0x39c   : > { %4720 = vpow2.f32 %v4196_v36 }
 0x39d   : > { %4722 = vpow2.f32 %v4197_v38 }
 0x39e   : > { %v2462_v48 = vpop.f32.mrf.mxu2  ;;  %v2475_v15 = vpop.f32.mrf.mxu3 }
 0x39f   : > { %v2481_v43 = vadd.f32 %v2462_v48, %v2184_v23  ;;  %v2438_v44 = vpop.f32.mrf.mxu0  ;;  %v2451_v45 = vpop.f32.mrf.mxu1  ;;  %v2482_v38 = vadd.f32 %v2475_v15, %v2203_v24 }
 0x3a1   : > { %v4198_v30 = vmul.f32 -1.442695, %v2481_v43 }
 0x3a2   : > { %v4721_v14 = vpop.eup %4720 }
 0x3a3   : > { %v4723_v35 = vpop.eup %4722  ;;  %v2492_v41 = vadd.f32 1.0, %v4721_v14  ;;  %4724 = vpow2.f32 %v4198_v30 }
 0x3a4   : > { %v2493_v7 = vadd.f32 1.0, %v4723_v35 }
 0x3a5   : > { %4726 = vrcp.f32 %v2492_v41  ;;  %v2506_v30 = vand.u32 2147483648, %v2492_v41  ;;  %v2504_v45 = vand.u32 2147483647, %v2492_v41  ;;  %vm2500_vm3 = vweird.f32 %v2492_v41 }
 0x3a6   : > { %4728 = vrcp.f32 %v2493_v7  ;;  %v2464_v22 = vpop.f32.mrf.mxu2  ;;  %v2477_v5 = vpop.f32.mrf.mxu3  ;;  %v2521_v13 = vand.u32 2147483648, %v2493_v7  ;;  %vm2515_vm4 = vweird.f32 %v2493_v7 }
 0x3a7   : > { %v2519_v5 = vand.u32 2147483647, %v2493_v7  ;;  %vm2505_vm7 = vcmp.eq.f32.partialorder %v2504_v45, 8.507059e+37 }
 0x3a9   : > { %v4725_v16 = vpop.eup %4724  ;;  %vm2520_vm8 = vcmp.eq.f32.partialorder %v2519_v5, 8.507059e+37 }
 0x3aa   : > { %v2494_v54 = vadd.f32 1.0, %v4725_v16  ;;  %v2507_v16 = vor.u32 1.1754944e-38, %v2506_v30 }
 0x3ab   : > { %v4727_v36 = vpop.eup %4726 }
 0x3ac   : > { %v4729_v23 = vpop.eup %4728  ;;  %v2496_v48 = vmul.f32 %v4727_v36, %v2492_v41  ;;  %4730 = vrcp.f32 %v2494_v54  ;;  %vm2501_vm1 = vweird.f32 %v4727_v36  ;;  %v2536_v30 = vand.u32 2147483648, %v2494_v54 }
 0x3ad   : > { %v2511_v43 = vmul.f32 %v4729_v23, %v2493_v7  ;;  %4732 = vtanh.f32 %v2482_v38  ;;  %vm2516_vm2 = vweird.f32 %v4729_v23  ;;  %vm2502_vm5 = vmor %vm2500_vm3, %vm2501_vm1  ;;  %vm2530_vm10 = vweird.f32 %v2494_v54 }
 0x3ae   : > { %v2497_v44 = vsub.f32 1.0, %v2496_v48  ;;  %vm2517_vm6 = vmor %vm2515_vm4, %vm2516_vm2  ;;  %v2522_v48 = vor.u32 1.1754944e-38, %v2521_v13  ;;  %v2534_v13 = vand.u32 2147483647, %v2494_v54  ;;  %v2537_v45 = vor.u32 1.1754944e-38, %v2536_v30 }
 0x3af   : > { %v2512_v14 = vsub.f32 1.0, %v2511_v43  ;;  %v2229_v43 = vld [vmem:[#allocation7] sm:$0xff] }
 0x3b0   : > { %v2498_v35 = vmul.f32 %v4727_v36, %v2497_v44  ;;  %vm2535_vm12 = vcmp.eq.f32.partialorder %v2534_v13, 8.507059e+37 }
 0x3b1   : > { %v2513_v22 = vmul.f32 %v4729_v23, %v2512_v14 }
 0x3b2   : > { %v4731_v6 = vpop.eup %4730  ;;  %v2499_v61 = vadd.f32 %v4727_v36, %v2498_v35 }
 0x3b3   : > { %v2526_v15 = vmul.f32 %v4731_v6, %v2494_v54  ;;  %v2514_v24 = vadd.f32 %v4729_v23, %v2513_v22  ;;  %v4733_v38 = vpop.eup %4732  ;;  %vm2531_vm9 = vweird.f32 %v4731_v6 }
 0x3b4   : > { %v2503_v28 = vsel %vm2502_vm5, %v4727_v36, %v2499_v61  ;;  %vm2532_vm11 = vmor %vm2530_vm10, %vm2531_vm9 }
 0x3b5   : > { %v2527_v44 = vsub.f32 1.0, %v2526_v15  ;;  %v2508_v4 = vsel %vm2505_vm7, %v2507_v16, %v2503_v28  ;;  %v2518_v17 = vsel %vm2517_vm6, %v4729_v23, %v2514_v24 }
 0x3b6   : > { %v2523_v14 = vsel %vm2520_vm8, %v2522_v48, %v2518_v17  ;;  %v2542_v63 = vmul.f32 %v4733_v38, %v2508_v4 }
 0x3b7   : > { %v2541_v20 = vmul.f32 %v2523_v14, %v2229_v43  ;;  %v2528_v35 = vmul.f32 %v4731_v6, %v2527_v44 }
 0x3b9   : > { %v6686_v41 = vadd.f32 %v2542_v63, %v2541_v20  ;;  %v2529_v7 = vadd.f32 %v4731_v6, %v2528_v35 }
 0x3bb   : > { %4734 = vtanh.f32 %v6686_v41  ;;  %v2533_v36 = vsel %vm2532_vm11, %v4731_v6, %v2529_v7 }
 0x3bc   : > { %v2538_v23 = vsel %vm2535_vm12, %v2537_v45, %v2533_v36 }
 0x3c1   : > { %v4735_v28 = vpop.eup %4734 }
 0x3c2   : > { %v2545_v22 = vmul.f32 %v4735_v28, %v2538_v23 }
 0x3c4   : > { %v2550_v17 = vpack.c.bf16 %v2545_v22, %v2545_v22 }
 0x3c6   : > { %2559 = vmatmul.bf16.vlgmr.msrb.gmra.mxu0 %v2550_v17  ;;  %2572 = vmatmul.bf16.vlgmr.msrb.gmra.mxu1 %v2550_v17 }
 0x3c7   : > { %2585 = vmatmul.bf16.vlgmr.msrb.gmra.mxu2 %v2550_v17  ;;  %2598 = vmatmul.bf16.vlgmr.msrb.gmra.mxu3 %v2550_v17 }
 0x3c8   : > { %2799 = vmatpush.bf16.msrb.mxu0 %v6247_v49  ;;  %2812 = vmatpush.bf16.msrb.mxu1 %v6258_v27  ;;  %v2148_v49 = vadd.f32 %v6647_v53, %v6670_v2  ;;  %v2167_v27 = vadd.f32 %v6649_v62, %v6672_v60 }
 0x3c9   : > { %2825 = vmatpush.bf16.msrb.mxu2 %v6260_v33  ;;  %2838 = vmatpush.bf16.msrb.mxu3 %v6269_v10 }
 0x3cc   : > { %2800 = vmatpush.bf16.msrb.mxu0 %v6285_v18  ;;  %2813 = vmatpush.bf16.msrb.mxu1 %v6296_v52 }
 0x3cd   : > { %2826 = vmatpush.bf16.msrb.mxu2 %v6298_v46  ;;  %2839 = vmatpush.bf16.msrb.mxu3 %v6315_v42 }
 0x3d0   : > { %2801 = vmatpush.bf16.msrb.mxu0 %v6317_v59  ;;  %2814 = vmatpush.bf16.msrb.mxu1 %v6328_v47  ;;  %v2186_v59 = vadd.f32 %v6651_v0, %v6680_v34 }
 0x3d1   : > { %2827 = vmatpush.bf16.msrb.mxu2 %v6340_v1  ;;  %2840 = vmatpush.bf16.msrb.mxu3 %v6342_v3 }
 0x3d4   : > { %2802 = vmatpush.bf16.msrb.mxu0 %v6355_v9  ;;  %2815 = vmatpush.bf16.msrb.mxu1 %v6368_v21 }
 0x3d5   : > { %2828 = vmatpush.bf16.msrb.mxu2 %v6370_v12  ;;  %2841 = vmatpush.bf16.msrb.mxu3 %v6379_v19 }
 0x3d8   : > { %2803 = vmatpush.bf16.msrb.mxu0 %v6408_v39  ;;  %2816 = vmatpush.bf16.msrb.mxu1 %v6410_v40 }
 0x3d9   : > { %2829 = vmatpush.bf16.msrb.mxu2 %v6424_v55  ;;  %2842 = vmatpush.bf16.msrb.mxu3 %v6426_v56 }
 0x3dc   : > { %2804 = vmatpush.bf16.msrb.mxu0 %v6439_v50  ;;  %2817 = vmatpush.bf16.msrb.mxu1 %v6473_v29 }
 0x3dd   : > { %2830 = vmatpush.bf16.msrb.mxu2 %v6475_v31  ;;  %2843 = vmatpush.bf16.msrb.mxu3 %v6477_v11  ;;  %v7003_v31 = vld [vmem:[#allocation26_spill] sm:$0xff]  ;;  %v7004_v11 = vld [vmem:[#allocation17_spill] sm:$0xff] }
 0x3e0   : > { %2805 = vmatpush.bf16.msrb.mxu0 %v6515_v25  ;;  %2818 = vmatpush.bf16.msrb.mxu1 %v6517_v32  ;;  %v2205_v25 = vadd.f32 %v7004_v11, %v7003_v31 }
 0x3e1   : > { %2831 = vmatpush.bf16.msrb.mxu2 %v6519_v37  ;;  %2844 = vmatpush.bf16.msrb.mxu3 %v6531_v58 }
 0x3e4   : > { %2806 = vmatpush.bf16.msrb.mxu0 %v6546_v26  ;;  %2819 = vmatpush.bf16.msrb.mxu1 %v6564_v8 }
 0x3e5   : > { %2832 = vmatpush.bf16.msrb.mxu2 %v6566_v51  ;;  %2845 = vmatpush.bf16.msrb.mxu3 %v6572_v57 }
 0x443   : > { %v2560_v33 = vpop.f32.mrf.mxu0  ;;  %v2573_v10 = vpop.f32.mrf.mxu1 }
 0x444   : > { %v2603_v18 = vadd.f32 %v2560_v33, %v2148_v49  ;;  %v2604_v52 = vadd.f32 %v2573_v10, %v2167_v27 }
 0x446   : > { %v4199_v46 = vmul.f32 -1.442695, %v2603_v18  ;;  %v4200_v42 = vmul.f32 -1.442695, %v2604_v52  ;;  %v7006_v52 = vld [vmem:[#allocation19_spill] sm:$0xff] }
 0x448   : > { %4736 = vpow2.f32 %v4199_v46  ;;  %v2170_v46 = vadd.f32 %v7006_v52, %v6672_v60 }
 0x449   : > { %4738 = vpow2.f32 %v4200_v42 }
 0x44a   : > { %v2586_v47 = vpop.f32.mrf.mxu2  ;;  %v2599_v1 = vpop.f32.mrf.mxu3 }
 0x44b   : > { %v2605_v3 = vadd.f32 %v2586_v47, %v2186_v59  ;;  %v2562_v9 = vpop.f32.mrf.mxu0  ;;  %v2575_v21 = vpop.f32.mrf.mxu1  ;;  %v2606_v58 = vadd.f32 %v2599_v1, %v2205_v25 }
 0x44c   : > { %v7007_v21 = vld [vmem:[#allocation20_spill] sm:$0xff] }
 0x44d   : > { %v4201_v12 = vmul.f32 -1.442695, %v2605_v3 }
 0x44e   : > { %v4737_v19 = vpop.eup %4736 }
 0x44f   : > { %v4739_v39 = vpop.eup %4738  ;;  %v2616_v40 = vadd.f32 1.0, %v4737_v19  ;;  %4740 = vpow2.f32 %v4201_v12  ;;  %v2189_v12 = vadd.f32 %v7007_v21, %v6680_v34 }
 0x450   : > { %v2617_v55 = vadd.f32 1.0, %v4739_v39 }
 0x451   : > { %4742 = vrcp.f32 %v2616_v40  ;;  %v2630_v62 = vand.u32 2147483648, %v2616_v40  ;;  %v2628_v4 = vand.u32 2147483647, %v2616_v40  ;;  %vm2624_vm15 = vweird.f32 %v2616_v40 }
 0x452   : > { %4744 = vrcp.f32 %v2617_v55  ;;  %v2588_v56 = vpop.f32.mrf.mxu2  ;;  %v2601_v50 = vpop.f32.mrf.mxu3  ;;  %v2645_v0 = vand.u32 2147483648, %v2617_v55  ;;  %v2643_v20 = vand.u32 2147483647, %v2617_v55  ;;  %vm2639_vm0 = vweird.f32 %v2617_v55 }
 0x453   : > { %v2631_v15 = vor.u32 1.1754944e-38, %v2630_v62  ;;  %vm2629_vm3 = vcmp.eq.f32.partialorder %v2628_v4, 8.507059e+37 }
 0x454   : > { %v2646_v24 = vor.u32 1.1754944e-38, %v2645_v0  ;;  %vm2644_vm4 = vcmp.eq.f32.partialorder %v2643_v20, 8.507059e+37 }
 0x455   : > { %v4741_v29 = vpop.eup %4740 }
 0x456   : > { %v2618_v32 = vadd.f32 1.0, %v4741_v29 }
 0x457   : > { %v4743_v37 = vpop.eup %4742 }
 0x458   : > { %v4745_v26 = vpop.eup %4744  ;;  %v2620_v8 = vmul.f32 %v4743_v37, %v2616_v40  ;;  %4746 = vrcp.f32 %v2618_v32  ;;  %vm2625_vm13 = vweird.f32 %v4743_v37  ;;  %v2660_v28 = vand.u32 2147483648, %v2618_v32 }
 0x459   : > { %v2635_v51 = vmul.f32 %v4745_v26, %v2617_v55  ;;  %4748 = vtanh.f32 %v2606_v58  ;;  %vm2640_vm14 = vweird.f32 %v4745_v26  ;;  %vm2626_vm1 = vmor %vm2624_vm15, %vm2625_vm13  ;;  %vm2654_vm6 = vweird.f32 %v2618_v32 }
 0x45a   : > { %v2621_v57 = vsub.f32 1.0, %v2620_v8  ;;  %vm2641_vm2 = vmor %vm2639_vm0, %vm2640_vm14  ;;  %v2658_v23 = vand.u32 2147483647, %v2618_v32  ;;  %v2661_v17 = vor.u32 1.1754944e-38, %v2660_v28  ;;  %v7008_v8 = vld [vmem:[#allocation21_spill] sm:$0xff] }
 0x45b   : > { %v2636_v53 = vsub.f32 1.0, %v2635_v51  ;;  %v2208_v51 = vadd.f32 %v7008_v8, %v7003_v31 }
 0x45c   : > { %v2622_v63 = vmul.f32 %v4743_v37, %v2621_v57  ;;  %vm2659_vm8 = vcmp.eq.f32.partialorder %v2658_v23, 8.507059e+37 }
 0x45d   : > { %v2637_v6 = vmul.f32 %v4745_v26, %v2636_v53 }
 0x45e   : > { %v4747_v54 = vpop.eup %4746  ;;  %v2623_v5 = vadd.f32 %v4743_v37, %v2622_v63 }
 0x45f   : > { %v2650_v61 = vmul.f32 %v4747_v54, %v2618_v32  ;;  %v2638_v16 = vadd.f32 %v4745_v26, %v2637_v6  ;;  %v4749_v43 = vpop.eup %4748  ;;  %vm2655_vm5 = vweird.f32 %v4747_v54 }
 0x460   : > { %v2627_v48 = vsel %vm2626_vm1, %v4743_v37, %v2623_v5  ;;  %vm2656_vm7 = vmor %vm2654_vm6, %vm2655_vm5 }
 0x461   : > { %v2651_v38 = vsub.f32 1.0, %v2650_v61  ;;  %v2632_v44 = vsel %vm2629_vm3, %v2631_v15, %v2627_v48  ;;  %v2642_v14 = vsel %vm2641_vm2, %v4745_v26, %v2638_v16 }
 0x462   : > { %v2647_v35 = vsel %vm2644_vm4, %v2646_v24, %v2642_v14  ;;  %v2666_v7 = vmul.f32 %v4749_v43, %v2632_v44 }
 0x463   : > { %v2665_v30 = vmul.f32 %v2647_v35, %v6686_v41  ;;  %v2652_v13 = vmul.f32 %v4747_v54, %v2651_v38  ;;  %v7005_v41 = vld [vmem:[#allocation18_spill] sm:$0xff] }
 0x464   : > { %v2151_v18 = vadd.f32 %v7005_v41, %v6670_v2 }
 0x465   : > { %v6730_v36 = vadd.f32 %v2666_v7, %v2665_v30  ;;  %v2653_v45 = vadd.f32 %v4747_v54, %v2652_v13 }
 0x467   : > { %4750 = vtanh.f32 %v6730_v36  ;;  %v2657_v22 = vsel %vm2656_vm7, %v4747_v54, %v2653_v45 }
 0x468   : > { %v2662_v27 = vsel %vm2659_vm8, %v2661_v17, %v2657_v22 }
 0x46d   : > { %v4751_v49 = vpop.eup %4750 }
 0x46e   : > { %v2669_v33 = vmul.f32 %v4751_v49, %v2662_v27 }
 0x470   : > { %v2674_v10 = vpack.c.bf16 %v2669_v33, %v2669_v33 }
 0x472   : > { %2683 = vmatmul.bf16.vlgmr.msra.gmra.mxu0 %v2674_v10  ;;  %2696 = vmatmul.bf16.vlgmr.msra.gmra.mxu1 %v2674_v10 }
 0x473   : > { %2709 = vmatmul.bf16.vlgmr.msra.gmra.mxu2 %v2674_v10  ;;  %2722 = vmatmul.bf16.vlgmr.msra.gmra.mxu3 %v2674_v10 }
 0x4ef   : > { %v2684_v42 = vpop.f32.mrf.mxu0  ;;  %v2697_v59 = vpop.f32.mrf.mxu1 }
 0x4f0   : > { %v2727_v47 = vadd.f32 %v2684_v42, %v2151_v18  ;;  %v2728_v1 = vadd.f32 %v2697_v59, %v2170_v46 }
 0x4f2   : > { %v4202_v3 = vmul.f32 -1.442695, %v2727_v47  ;;  %v4203_v9 = vmul.f32 -1.442695, %v2728_v1 }
 0x4f4   : > { %4752 = vpow2.f32 %v4202_v3  ;;  %v7010_v3 = vld [vmem:[#allocation23_spill] sm:$0xff] }
 0x4f5   : > { %4754 = vpow2.f32 %v4203_v9  ;;  %v2172_v9 = vadd.f32 %v7010_v3, %v6672_v60 }
 0x4f6   : > { %v2710_v19 = vpop.f32.mrf.mxu2  ;;  %v2723_v39 = vpop.f32.mrf.mxu3 }
 0x4f7   : > { %v2729_v40 = vadd.f32 %v2710_v19, %v2189_v12  ;;  %v2686_v55 = vpop.f32.mrf.mxu0  ;;  %v2699_v56 = vpop.f32.mrf.mxu1  ;;  %v2730_v62 = vadd.f32 %v2723_v39, %v2208_v51 }
 0x4f8   : > { %v7011_v56 = vld [vmem:[#allocation24_spill] sm:$0xff] }
 0x4f9   : > { %v4204_v50 = vmul.f32 -1.442695, %v2729_v40 }
 0x4fa   : > { %v4753_v29 = vpop.eup %4752 }
 0x4fb   : > { %v4755_v11 = vpop.eup %4754  ;;  %v2740_v25 = vadd.f32 1.0, %v4753_v29  ;;  %4756 = vpow2.f32 %v4204_v50  ;;  %v2191_v50 = vadd.f32 %v7011_v56, %v6680_v34 }
 0x4fc   : > { %v2741_v32 = vadd.f32 1.0, %v4755_v11 }
 0x4fd   : > { %4758 = vrcp.f32 %v2740_v25  ;;  %v2754_v54 = vand.u32 2147483648, %v2740_v25  ;;  %v2752_v15 = vand.u32 2147483647, %v2740_v25  ;;  %vm2748_vm11 = vweird.f32 %v2740_v25 }
 0x4fe   : > { %4760 = vrcp.f32 %v2741_v32  ;;  %v2712_v37 = vpop.f32.mrf.mxu2  ;;  %v2725_v58 = vpop.f32.mrf.mxu3  ;;  %v2769_v5 = vand.u32 2147483648, %v2741_v32  ;;  %v2767_v24 = vand.u32 2147483647, %v2741_v32  ;;  %vm2763_vm12 = vweird.f32 %v2741_v32 }
 0x4ff   : > { %v2755_v44 = vor.u32 1.1754944e-38, %v2754_v54  ;;  %vm2753_vm15 = vcmp.eq.f32.partialorder %v2752_v15, 8.507059e+37 }
 0x500   : > { %v2770_v35 = vor.u32 1.1754944e-38, %v2769_v5  ;;  %vm2768_vm0 = vcmp.eq.f32.partialorder %v2767_v24, 8.507059e+37 }
 0x501   : > { %v4757_v26 = vpop.eup %4756 }
 0x502   : > { %v2742_v57 = vadd.f32 1.0, %v4757_v26 }
 0x503   : > { %v4759_v53 = vpop.eup %4758 }
 0x504   : > { %v4761_v0 = vpop.eup %4760  ;;  %v2744_v63 = vmul.f32 %v4759_v53, %v2740_v25  ;;  %4762 = vrcp.f32 %v2742_v57  ;;  %vm2749_vm9 = vweird.f32 %v4759_v53  ;;  %v2784_v10 = vand.u32 2147483648, %v2742_v57 }
 0x505   : > { %v2759_v4 = vmul.f32 %v4761_v0, %v2741_v32  ;;  %4764 = vtanh.f32 %v2730_v62  ;;  %vm2764_vm10 = vweird.f32 %v4761_v0  ;;  %vm2750_vm13 = vmor %vm2748_vm11, %vm2749_vm9  ;;  %vm2778_vm2 = vweird.f32 %v2742_v57  ;;  %v7012_v62 = vld [vmem:[#allocation25_spill] sm:$0xff] }
 0x506   : > { %v2745_v6 = vsub.f32 1.0, %v2744_v63  ;;  %vm2765_vm14 = vmor %vm2763_vm12, %vm2764_vm10  ;;  %v2782_v41 = vand.u32 2147483647, %v2742_v57  ;;  %v2785_v52 = vor.u32 1.1754944e-38, %v2784_v10  ;;  %v2210_v34 = vadd.f32 %v7012_v62, %v7003_v31 }
 0x507   : > { %v2760_v20 = vsub.f32 1.0, %v2759_v4 }
 0x508   : > { %v2746_v61 = vmul.f32 %v4759_v53, %v2745_v6  ;;  %vm2783_vm4 = vcmp.eq.f32.partialorder %v2782_v41, 8.507059e+37 }
 0x509   : > { %v2761_v16 = vmul.f32 %v4761_v0, %v2760_v20 }
 0x50a   : > { %v4763_v48 = vpop.eup %4762  ;;  %v2747_v43 = vadd.f32 %v4759_v53, %v2746_v61 }
 0x50b   : > { %v2774_v38 = vmul.f32 %v4763_v48, %v2742_v57  ;;  %v2762_v14 = vadd.f32 %v4761_v0, %v2761_v16  ;;  %v4765_v30 = vpop.eup %4764  ;;  %vm2779_vm1 = vweird.f32 %v4763_v48 }
 0x50c   : > { %v2751_v7 = vsel %vm2750_vm13, %v4759_v53, %v2747_v43  ;;  %vm2780_vm3 = vmor %vm2778_vm2, %vm2779_vm1 }
 0x50d   : > { %v2775_v13 = vsub.f32 1.0, %v2774_v38  ;;  %v2756_v45 = vsel %vm2753_vm15, %v2755_v44, %v2751_v7  ;;  %v2766_v28 = vsel %vm2765_vm14, %v4761_v0, %v2762_v14 }
 0x50e   : > { %v2771_v23 = vsel %vm2768_vm0, %v2770_v35, %v2766_v28  ;;  %v2790_v22 = vmul.f32 %v4765_v30, %v2756_v45 }
 0x50f   : > { %v2789_v17 = vmul.f32 %v2771_v23, %v6730_v36  ;;  %v2776_v49 = vmul.f32 %v4763_v48, %v2775_v13  ;;  %v7009_v36 = vld [vmem:[#allocation22_spill] sm:$0xff] }
 0x510   : > { %v2153_v1 = vadd.f32 %v7009_v36, %v6670_v2 }
 0x511   : > { %v6742_v27 = vadd.f32 %v2790_v22, %v2789_v17  ;;  %v2777_v33 = vadd.f32 %v4763_v48, %v2776_v49 }
 0x513   : > { %4766 = vtanh.f32 %v6742_v27  ;;  %v2781_v18 = vsel %vm2780_vm3, %v4763_v48, %v2777_v33 }
 0x514   : > { %v2786_v42 = vsel %vm2783_vm4, %v2785_v52, %v2781_v18 }
 0x519   : > { %v4767_v46 = vpop.eup %4766 }
 0x51a   : > { %v2793_v59 = vmul.f32 %v4767_v46, %v2786_v42 }
 0x51c   : > { %v2798_v47 = vpack.c.bf16 %v2793_v59, %v2793_v59 }
 0x51e   : > { %2807 = vmatmul.bf16.vlgmr.msrb.gmra.mxu0 %v2798_v47  ;;  %2820 = vmatmul.bf16.vlgmr.msrb.gmra.mxu1 %v2798_v47 }
 0x51f   : > { %2833 = vmatmul.bf16.vlgmr.msrb.gmra.mxu2 %v2798_v47  ;;  %2846 = vmatmul.bf16.vlgmr.msrb.gmra.mxu3 %v2798_v47 }
 0x59b   : > { %v2808_v21 = vpop.f32.mrf.mxu0  ;;  %v2821_v12 = vpop.f32.mrf.mxu1 }
 0x59c   : > { %v2851_v19 = vadd.f32 %v2808_v21, %v2153_v1  ;;  %v2852_v39 = vadd.f32 %v2821_v12, %v2172_v9 }
 0x59e   : > { %v4205_v40 = vmul.f32 -1.442695, %v2851_v19  ;;  %v4206_v55 = vmul.f32 -1.442695, %v2852_v39 }
 0x5a0   : > { %4768 = vpow2.f32 %v4205_v40 }
 0x5a1   : > { %4770 = vpow2.f32 %v4206_v55 }
 0x5a2   : > { %v2834_v29 = vpop.f32.mrf.mxu2  ;;  %v2847_v11 = vpop.f32.mrf.mxu3 }
 0x5a3   : > { %v2853_v25 = vadd.f32 %v2834_v29, %v2191_v50  ;;  %v2810_v32 = vpop.f32.mrf.mxu0  ;;  %v2823_v37 = vpop.f32.mrf.mxu1  ;;  %v2854_v4 = vadd.f32 %v2847_v11, %v2210_v34 }
 0x5a5   : > { %v4207_v2 = vmul.f32 -1.442695, %v2853_v25 }
 0x5a6   : > { %v4769_v58 = vpop.eup %4768 }
 0x5a7   : > { %v4771_v26 = vpop.eup %4770  ;;  %v2864_v60 = vadd.f32 1.0, %v4769_v58  ;;  %4772 = vpow2.f32 %v4207_v2 }
 0x5a8   : > { %v2865_v8 = vadd.f32 1.0, %v4771_v26 }
 0x5a9   : > { %4774 = vrcp.f32 %v2864_v60  ;;  %v2878_v15 = vand.u32 2147483648, %v2864_v60  ;;  %v2876_v48 = vand.u32 2147483647, %v2864_v60  ;;  %vm2872_vm7 = vweird.f32 %v2864_v60 }
 0x5aa   : > { %4776 = vrcp.f32 %v2865_v8  ;;  %v2836_v51 = vpop.f32.mrf.mxu2  ;;  %v2849_v57 = vpop.f32.mrf.mxu3  ;;  %v2893_v16 = vand.u32 2147483648, %v2865_v8  ;;  %v2891_v38 = vand.u32 2147483647, %v2865_v8  ;;  %vm2887_vm8 = vweird.f32 %v2865_v8 }
 0x5ab   : > { %v2879_v35 = vor.u32 1.1754944e-38, %v2878_v15  ;;  %vm2877_vm11 = vcmp.eq.f32.partialorder %v2876_v48, 8.507059e+37 }
 0x5ac   : > { %v2894_v30 = vor.u32 1.1754944e-38, %v2893_v16  ;;  %vm2892_vm12 = vcmp.eq.f32.partialorder %v2891_v38, 8.507059e+37 }
 0x5ad   : > { %v4773_v53 = vpop.eup %4772 }
 0x5ae   : > { %v2866_v0 = vadd.f32 1.0, %v4773_v53 }
 0x5af   : > { %v4775_v63 = vpop.eup %4774 }
 0x5b0   : > { %v4777_v6 = vpop.eup %4776  ;;  %v2868_v20 = vmul.f32 %v4775_v63, %v2864_v60  ;;  %4778 = vrcp.f32 %v2866_v0  ;;  %vm2873_vm5 = vweird.f32 %v4775_v63  ;;  %v2908_v52 = vand.u32 2147483648, %v2866_v0 }
 0x5b1   : > { %v2883_v54 = vmul.f32 %v4777_v6, %v2865_v8  ;;  %4780 = vtanh.f32 %v2854_v4  ;;  %vm2888_vm6 = vweird.f32 %v4777_v6  ;;  %vm2874_vm9 = vmor %vm2872_vm7, %vm2873_vm5  ;;  %vm2902_vm14 = vweird.f32 %v2866_v0 }
 0x5b2   : > { %v2869_v5 = vsub.f32 1.0, %v2868_v20  ;;  %vm2889_vm10 = vmor %vm2887_vm8, %vm2888_vm6  ;;  %v2906_v46 = vand.u32 2147483647, %v2866_v0  ;;  %v2909_v59 = vor.u32 1.1754944e-38, %v2908_v52 }
 0x5b3   : > { %v2884_v61 = vsub.f32 1.0, %v2883_v54 }
 0x5b4   : > { %v2870_v24 = vmul.f32 %v4775_v63, %v2869_v5  ;;  %vm2907_vm0 = vcmp.eq.f32.partialorder %v2906_v46, 8.507059e+37 }
 0x5b5   : > { %v2885_v43 = vmul.f32 %v4777_v6, %v2884_v61 }
 0x5b6   : > { %v4779_v44 = vpop.eup %4778  ;;  %v2871_v31 = vadd.f32 %v4775_v63, %v2870_v24 }
 0x5b7   : > { %v2898_v14 = vmul.f32 %v4779_v44, %v2866_v0  ;;  %v2886_v7 = vadd.f32 %v4777_v6, %v2885_v43  ;;  %v4781_v45 = vpop.eup %4780  ;;  %vm2903_vm13 = vweird.f32 %v4779_v44 }
 0x5b8   : > { %v2875_v13 = vsel %vm2874_vm9, %v4775_v63, %v2871_v31  ;;  %vm2904_vm15 = vmor %vm2902_vm14, %vm2903_vm13 }
 0x5b9   : > { %v2899_v28 = vsub.f32 1.0, %v2898_v14  ;;  %v2880_v23 = vsel %vm2877_vm11, %v2879_v35, %v2875_v13  ;;  %v2890_v22 = vsel %vm2889_vm10, %v4777_v6, %v2886_v7 }
 0x5ba   : > { %v2895_v17 = vsel %vm2892_vm12, %v2894_v30, %v2890_v22  ;;  %v2914_v49 = vmul.f32 %v4781_v45, %v2880_v23 }
 0x5bb   : > { %v2900_v33 = vmul.f32 %v4779_v44, %v2899_v28  ;;  %v2913_v10 = vmul.f32 %v2895_v17, %v6742_v27 }
 0x5bd   : > { %v2915_v41 = vadd.f32 %v2914_v49, %v2913_v10  ;;  %v2901_v18 = vadd.f32 %v4779_v44, %v2900_v33 }
 0x5bf   : > { %4782 = vtanh.f32 %v2915_v41  ;;  %2919 = vst [vmem:[#allocation7] sm:$0xff] %v2915_v41  ;;  %v2905_v42 = vsel %vm2904_vm15, %v4779_v44, %v2901_v18 }
 0x5c0   : > { %v2910_v36 = vsel %vm2907_vm0, %v2909_v59, %v2905_v42 }
 0x5c4   : > { %2923 = sbr.rel (%p4208_p0) target bundleno = 1812 (0x714), region = 72 }
 0x5c5   : > { %v4783_v47 = vpop.eup %4782 }
 0x5c6   : > { %v6754_v1 = vmul.f32 %v4783_v47, %v2910_v36 }
 0x5c8   : > { %2918 = vst [vmem:[#allocation6] sm:$0xff] %v6754_v1 }
 0x5c9   : > { %v4267_v27 = vld [vmem:[%s6965_s7 + $0x70] sm:$0xf]  ;;  %v4567_v3 = vld [vmem:[%s6965_s7 + $0x74] sm:$0xf0]  ;;  %v4566_v9 = vld [vmem:[%s6965_s7 + $0x74] sm:$0xf]  ;;  %v2924_v59 = vpack.c.bf16 %v6754_v1, %v6754_v1 }
 0x5ca   : > { %v4268_v21 = vor.u32 %v4567_v3, %v4267_v27  ;;  %v4269_v12 = vld [vmem:[%s6965_s7 + $0x78] sm:$0xf0]  ;;  %v4259_v19 = vld [vmem:[%s6965_s7 + $0x60] sm:$0xf]  ;;  %v4565_v39 = vld [vmem:[%s6965_s7 + $0x64] sm:$0xf0] }
 0x5cb   : > { %v4272_v40 = vor.u32 %v4566_v9, %v4269_v12  ;;  %v4564_v55 = vld [vmem:[%s6965_s7 + $0x64] sm:$0xf]  ;;  %v4261_v56 = vld [vmem:[%s6965_s7 + $0x68] sm:$0xf0]  ;;  %v4260_v50 = vor.u32 %v4565_v39, %v4259_v19  ;;  %v4251_v11 = vld [vmem:[%s6965_s7 + $0x50] sm:$0xf] }
 0x5cc   : > { %3027 = vmatpush.bf16.msra.mxu0 %v4268_v21  ;;  %v4264_v29 = vor.u32 %v4564_v55, %v4261_v56  ;;  %v4563_v25 = vld [vmem:[%s6965_s7 + $0x54] sm:$0xf0]  ;;  %v4562_v32 = vld [vmem:[%s6965_s7 + $0x54] sm:$0xf]  ;;  %v4253_v37 = vld [vmem:[%s6965_s7 + $0x58] sm:$0xf0] }
 0x5cd   : > { %3040 = vmatpush.bf16.msra.mxu1 %v4272_v40  ;;  %v4252_v2 = vor.u32 %v4563_v25, %v4251_v11  ;;  %v4256_v58 = vor.u32 %v4562_v32, %v4253_v37  ;;  %v4243_v26 = vld [vmem:[%s6965_s7 + $0x40] sm:$0xf]  ;;  %v4561_v60 = vld [vmem:[%s6965_s7 + $0x44] sm:$0xf0]  ;;  %v4560_v8 = vld [vmem:[%s6965_s7 + $0x44] sm:$0xf] }
 0x5ce   : > { %v4245_v51 = vld [vmem:[%s6965_s7 + $0x48] sm:$0xf0]  ;;  %v4575_v57 = vld [vmem:[%s6967_s9 + $0x38] sm:$0xff]  ;;  %v4244_v53 = vor.u32 %v4561_v60, %v4243_v26  ;;  %v4235_v0 = vld [vmem:[%s6965_s7 + $0x30] sm:$0xf] }
 0x5cf   : > { %v4583_v62 = vld [vmem:[%s6967_s9 + $0x78] sm:$0xff]  ;;  %v4248_v34 = vor.u32 %v4560_v8, %v4245_v51  ;;  %3189 = vmatpush.bf16.msra.mxu2 %v4575_v57  ;;  %v4574_v4 = vld [vmem:[%s6967_s9 + $0x30] sm:$0xff]  ;;  %v4227_v15 = vld [vmem:[%s6965_s7 + $0x20] sm:$0xf] }
 0x5d0   : > { %3028 = vmatpush.bf16.msra.mxu0 %v4260_v50  ;;  %v4559_v63 = vld [vmem:[%s6965_s7 + $0x34] sm:$0xf0]  ;;  %v4558_v6 = vld [vmem:[%s6965_s7 + $0x34] sm:$0xf]  ;;  %v4237_v20 = vld [vmem:[%s6965_s7 + $0x38] sm:$0xf0]  ;;  %3202 = vmatpush.bf16.msra.mxu3 %v4583_v62 }
 0x5d1   : > { %3041 = vmatpush.bf16.msra.mxu1 %v4264_v29  ;;  %v4582_v54 = vld [vmem:[%s6967_s9 + $0x70] sm:$0xff]  ;;  %v4236_v5 = vor.u32 %v4559_v63, %v4235_v0  ;;  %v4240_v61 = vor.u32 %v4558_v6, %v4237_v20  ;;  %v4557_v16 = vld [vmem:[%s6965_s7 + $0x24] sm:$0xf0]  ;;  %v4556_v48 = vld [vmem:[%s6965_s7 + $0x24] sm:$0xf] }
 0x5d2   : > { %v4573_v24 = vld [vmem:[%s6967_s9 + $0x28] sm:$0xff]  ;;  %v4228_v44 = vor.u32 %v4557_v16, %v4227_v15  ;;  %v4219_v14 = vld [vmem:[%s6965_s7 + $0x10] sm:$0xf]  ;;  %v4555_v35 = vld [vmem:[%s6965_s7 + $0x14] sm:$0xf0] }
 0x5d3   : > { %3190 = vmatpush.bf16.msra.mxu2 %v4574_v4  ;;  %v4229_v43 = vld [vmem:[%s6965_s7 + $0x28] sm:$0xf0]  ;;  %v4572_v7 = vld [vmem:[%s6967_s9 + $0x20] sm:$0xff]  ;;  %v4554_v30 = vld [vmem:[%s6965_s7 + $0x14] sm:$0xf]  ;;  %v4220_v28 = vor.u32 %v4555_v35, %v4219_v14 }
 0x5d4   : > { %3029 = vmatpush.bf16.msra.mxu0 %v4252_v2  ;;  %3203 = vmatpush.bf16.msra.mxu3 %v4582_v54  ;;  %v4581_v38 = vld [vmem:[%s6967_s9 + $0x68] sm:$0xff]  ;;  %v4232_v31 = vor.u32 %v4556_v48, %v4229_v43  ;;  %v4221_v13 = vld [vmem:[%s6965_s7 + $0x18] sm:$0xf0]  ;;  %v4580_v45 = vld [vmem:[%s6967_s9 + $0x60] sm:$0xff] }
 0x5d5   : > { %3042 = vmatpush.bf16.msra.mxu1 %v4256_v58  ;;  %v4224_v23 = vor.u32 %v4554_v30, %v4221_v13  ;;  %v4211_v22 = vld [vmem:[%s6965_s7] sm:$0xf]  ;;  %v4553_v17 = vld [vmem:[%s6965_s7 + $0x4] sm:$0xf0]  ;;  %v4571_v49 = vld [vmem:[%s6967_s9 + $0x18] sm:$0xff] }
 0x5d6   : > { %v4552_v33 = vld [vmem:[%s6965_s7 + $0x4] sm:$0xf]  ;;  %v4213_v10 = vld [vmem:[%s6965_s7 + $0x8] sm:$0xf0]  ;;  %v4579_v41 = vld [vmem:[%s6967_s9 + $0x58] sm:$0xff]  ;;  %v4212_v18 = vor.u32 %v4553_v17, %v4211_v22 }
 0x5d7   : > { %3191 = vmatpush.bf16.msra.mxu2 %v4573_v24  ;;  %v4216_v52 = vor.u32 %v4552_v33, %v4213_v10  ;;  %v4570_v46 = vld [vmem:[%s6967_s9 + $0x10] sm:$0xff]  ;;  %v4569_v47 = vld [vmem:[%s6967_s9 + $0x8] sm:$0xff]  ;;  %v4568_v1 = vld [vmem:[%s6967_s9] sm:$0xff] }
 0x5d8   : > { %3030 = vmatpush.bf16.msra.mxu0 %v4244_v53  ;;  %3204 = vmatpush.bf16.msra.mxu3 %v4581_v38  ;;  %v4578_v42 = vld [vmem:[%s6967_s9 + $0x50] sm:$0xff]  ;;  %v4577_v36 = vld [vmem:[%s6967_s9 + $0x48] sm:$0xff]  ;;  %v4576_v27 = vld [vmem:[%s6967_s9 + $0x40] sm:$0xff] }
 0x5d9   : > { %3043 = vmatpush.bf16.msra.mxu1 %v4248_v34  ;;  %v2941_v3 = vld [vmem:[%s6966_s8] sm:$0x3] }
 0x5da   : > { %v2943_v9 = vperm.slane %v2941_v3, 0  ;;  %v2944_v21 = vperm.slane %v2941_v3, 1  ;;  %v4784_v32 = vld [vmem:[%s6968_s10] ss:$0 sm:$0xff] }
 0x5db   : > { %3192 = vmatpush.bf16.msra.mxu2 %v4572_v7 }
 0x5dc   : > { %3031 = vmatpush.bf16.msra.mxu0 %v4236_v5  ;;  %3205 = vmatpush.bf16.msra.mxu3 %v4580_v45 }
 0x5dd   : > { %3044 = vmatpush.bf16.msra.mxu1 %v4240_v61 }
 0x5df   : > { %3193 = vmatpush.bf16.msra.mxu2 %v4571_v49 }
 0x5e0   : > { %3032 = vmatpush.bf16.msra.mxu0 %v4228_v44  ;;  %3206 = vmatpush.bf16.msra.mxu3 %v4579_v41 }
 0x5e1   : > { %3045 = vmatpush.bf16.msra.mxu1 %v4232_v31 }
 0x5e3   : > { %3194 = vmatpush.bf16.msra.mxu2 %v4570_v46 }
 0x5e4   : > { %3033 = vmatpush.bf16.msra.mxu0 %v4220_v28  ;;  %3207 = vmatpush.bf16.msra.mxu3 %v4578_v42 }
 0x5e5   : > { %3046 = vmatpush.bf16.msra.mxu1 %v4224_v23 }
 0x5e7   : > { %3195 = vmatpush.bf16.msra.mxu2 %v4569_v47 }
 0x5e8   : > { %3034 = vmatpush.bf16.msra.mxu0 %v4212_v18  ;;  %3208 = vmatpush.bf16.msra.mxu3 %v4577_v36 }
 0x5e9   : > { %3047 = vmatpush.bf16.msra.mxu1 %v4216_v52 }
 0x5eb   : > { %3035 = vmatmul.bf16.vlgmr.msra.gmra.mxu0 %v2924_v59  ;;  %3196 = vmatpush.bf16.msra.mxu2 %v4568_v1 }
 0x5ec   : > { %3048 = vmatmul.bf16.vlgmr.msra.gmra.mxu1 %v2924_v59  ;;  %3209 = vmatpush.bf16.msra.mxu3 %v4576_v27 }
 0x668   : > { %v3036_v12 = vpop.f32.mrf.mxu0 }
 0x669   : > { %v3037_v19 = vadd.f32 %v3036_v12, %v2943_v9  ;;  %v3049_v39 = vpop.f32.mrf.mxu1 }
 0x66a   : > { %v3050_v40 = vadd.f32 %v3049_v39, %v2944_v21 }
 0x66b   : > { %v3053_v55 = vmax.f32 %v3037_v19, 0.0 }
 0x66c   : > { %v3054_v56 = vmax.f32 %v3050_v40, 0.0 }
 0x66d   : > { %v3055_v50 = vpack.c.bf16 %v3053_v55, %v3053_v55 }
 0x66e   : > { %v3056_v29 = vpack.c.bf16 %v3054_v56, %v3054_v56 }
 0x66f   : > { %3197 = vmatmul.bf16.vlgmr.msra.gmra.mxu2 %v3055_v50 }
 0x670   : > { %3210 = vmatmul.bf16.vlgmr.msra.gmra.mxu3 %v3056_v29  ;;  %v3038_v11 = vpop.f32.mrf.mxu0 }
 0x671   : > { %v3051_v25 = vpop.f32.mrf.mxu1 }
 0x6f2   : > { %v3198_v37 = vpop.f32.mrf.mxu2 }
 0x6f3   : > { %v3199_v2 = vadd.f32 %v4784_v32, %v3198_v37  ;;  %v3211_v58 = vpop.f32.mrf.mxu3 }
 0x6f5   : > { %v3212_v26 = vadd.f32 %v3211_v58, %v3199_v2 }
 0x6f7   : > { %v4337_v60 = vmul.f32 -1.442695, %v3212_v26 }
 0x6f9   : > { %4785 = vpow2.f32 %v4337_v60 }
 0x6fa   : > { %v3200_v8 = vpop.f32.mrf.mxu2 }
 0x6fb   : > { %v3213_v51 = vpop.f32.mrf.mxu3 }
 0x6ff   : > { %v4786_v57 = vpop.eup %4785 }
 0x700   : > { %v3218_v53 = vadd.f32 1.0, %v4786_v57 }
 0x702   : > { %4787 = vrcp.f32 %v3218_v53  ;;  %v3230_v63 = vand.u32 2147483648, %v3218_v53  ;;  %v3228_v6 = vand.u32 2147483647, %v3218_v53  ;;  %vm3224_vm2 = vweird.f32 %v3218_v53 }
 0x704   : > { %v3231_v54 = vor.u32 1.1754944e-38, %v3230_v63  ;;  %vm3229_vm4 = vcmp.eq.f32.partialorder %v3228_v6, 8.507059e+37 }
 0x708   : > { %v4788_v62 = vpop.eup %4787 }
 0x709   : > { %v3220_v34 = vmul.f32 %v4788_v62, %v3218_v53  ;;  %vm3225_vm1 = vweird.f32 %v4788_v62 }
 0x70a   : > { %vm3226_vm3 = vmor %vm3224_vm2, %vm3225_vm1 }
 0x70b   : > { %v3221_v0 = vsub.f32 1.0, %v3220_v34 }
 0x70d   : > { %v3222_v4 = vmul.f32 %v4788_v62, %v3221_v0 }
 0x70f   : > { %v3223_v20 = vadd.f32 %v4788_v62, %v3222_v4 }
 0x711   : > { %v3227_v5 = vsel %vm3226_vm3, %v4788_v62, %v3223_v20 }
 0x712   : > { %v3232_v61 = vsel %vm3229_vm4, %v3231_v54, %v3227_v5 }
 0x713   : > { %3234 = vst [vmem:[%s7013_s20] sm:$0xff] %v3232_v61 }
 0x714 PF: > { %s4339_s22 = sshll.u32 %s4871_s21, 3  ;;  %s7014_s19 = scalar_lea.vmem [#allocation8], %s5019_s25 }
 0x715   : > { %s3246_s14 = scalar_lea.hbm %s6969_s11, %s4339_s22  ;;  %s3248_s12 = sshll.u32 %s7014_s19, 4  ;;  %s3249_s12 = int_to_ptr.vmem [resolvable:$true] %s3248_s12 }
 0x716   : > { %s3250_s13 = sshll.u32 %s3246_s14, 4  ;;  %s7015_s16 = sand.u32 1, %s4859_s18   ;;  %s3251_s13 = int_to_ptr.hbm [resolvable:$true] %s3250_s13 }
 0x717   : > { %s3236_s15 = scalar_lea.sflag [#allocation9], %s7015_s16  ;;  %s4803_s26 = sshra.s32 %s3251_s13, 4  ;;  %s4804_s26 = int_to_ptr.hbm [resolvable:$true] %s4803_s26 }
 0x718   : > { %s4805_s27 = scalar_lea.hbm %s4804_s26, 8  ;;  %s4809_s20 = scalar_lea.hbm %s6969_s11, 16 }
 0x719   : > { %p4806_p1 = scmp.ne.s32.totalorder %s4804_s26, %s4805_s27  ;;  %p4810_p5 = scmp.lt.s32.totalorder %s4804_s26, %s6969_s11 }
 0x71a   : > { %p4811_p6 = scmp.lt.s32.totalorder %s4809_s20, %s4805_s27 }
 0x71b   : > { %p4807_p2 = pnand %p4806_p1, %p4995_p3 }
 0x71c   : > { %p4812_p7 = por %p4811_p6, %p4810_p5 }
 0x71d   : > { %p4808_p4 = pneg %p4807_p2 }
 0x71f   : > { %p4813_p8 = pnand %p4812_p7, %p4808_p4 }
 0x721   : > { %4816 = shalt.err (!%p4813_p8)
}
 0x722   : > { %4584 = dma.vmem_to_hbm [thread:$0]  (%p4995_p3), %s3249_s12, 128, %s3251_s13, %s3236_s15  }
 0x723 PF: > { %p4590_p10 = scmp.ge.s32.totalorder %s4883_s24, 2  ;;  %s3262_s25 = sand.u32 1, %s4855_s17  }
 0x724   : > { %s3263_s0 = scalar_lea.sflag [#allocation9], %s3262_s25 }
 0x725   : > { %p4587_p11 = pnand %p4590_p10, %p5005_p9 }
 0x727   : > { %p4588_p12 = pneg %p4587_p11 }
 0x729   : > { %4850 = dma.done.wait (%p4588_p12), %s3263_s0, 128  }
 0x72a   : > { %4852 = vsyncadd (%p4588_p12), %s3263_s0, 4294967168  ;;  %s24_s24 = sadd.s32 1, %s4883_s24   ;;  %s7016_s14 = sld [smem:[#allocation11_spill]] }
 0x72b   : > { %p21_p13 = scmp.ge.s32.totalorder %s24_s24, 6   ;;  %s7017_s19 = sld [smem:[#allocation16_spill]] }
 0x72c   : > { %s7018_s20 = sld [smem:[#allocation12_spill]]  ;;  %s7022_s17 = smov %s4859_s18 }
 0x72d   : > { %s7019_s21 = sld [smem:[#allocation13_spill]]  ;;  %23 = sbr.rel (!%p21_p13) target bundleno = 7 (0x7), region = 114 }
 0x72e   : > { %s7020_s22 = sld [smem:[#allocation14_spill]] }
 0x72f   : > { %s7021_s23 = sld [smem:[#allocation15_spill]] }
 0x730   : > { %s7023_s18 = smov %s7016_s14 }
 0x732   :  { %3269 = vsyncpa [#allocation9], 1 }
 0x733   :  { %3271 = vsyncpa [#allocation9 + $0x1], 1 }

</bundles_post_ra>
